<compile_context>
chip_gen: v5e
topology: v5e:2x2
jax: 0.10.0
libtpu: 0.0.40
codegen_flags: <defaults>
</compile_context>

<pallas_src>
import functools

import jax
import jax.numpy as jnp
from jax.experimental import pallas as pl
from jax.experimental.pallas import tpu as pltpu

LN_EPS = 1e-5
BN_EPS = 1e-5
MM_DTYPE = jnp.bfloat16        # MXU input dtype (accumulation stays float32)
ACT_DTYPE = jnp.bfloat16       # HBM activation dtype (float32 for bit-safety)
DEF_ROW_TILE = 512             # row tile for the pointwise matmul kernel
DEF_KV_TILE = 512              # KV tile for the attention kernel
NEG_INF = -1e30

_SQRT_2_OVER_PI = 0.7978845608028654


def _gelu(y):
    # TODO(synk): PyTorch nn.GELU() is erf-exact; tanh approximation used here
    # (max |diff| ~1e-3) because lax.erf has no guaranteed Mosaic lowering.
    return 0.5 * y * (1.0 + jnp.tanh(_SQRT_2_OVER_PI * (y + 0.044715 * y * y * y)))


def _nbytes(shape, dtype):
    n = 1
    for s in shape:
        n *= int(s)
    return n * jnp.dtype(dtype).itemsize


def _vmem_limit(block_bytes):
    # 2x for double-buffering of the streamed blocks + headroom.
    return int(min(max(2 * block_bytes + (4 << 20), 16 << 20), 128 << 20))


# ----------------------------------------------------------------------------
# Pointwise matmul + folded BN affine (+ GELU)  — used by the patch embed
# ----------------------------------------------------------------------------
def _matmul_affine_kernel(x_ref, w_ref, s_ref, t_ref, o_ref, *, apply_gelu):
    y = jnp.dot(x_ref[...].astype(MM_DTYPE), w_ref[...],
                preferred_element_type=jnp.float32)
    y = y * s_ref[...] + t_ref[...]
    if apply_gelu:
        y = _gelu(y)
    o_ref[...] = y.astype(o_ref.dtype)


def _pick_row_tile(R, row_tile=DEF_ROW_TILE):
    tm = min(row_tile, R)
    if R >= 16:
        # at least two grid steps so both v7x TensorCores get work
        tm = min(tm, ((R + 1) // 2 + 7) // 8 * 8)
    tm = max(8, (tm // 8) * 8)
    for cand in range(tm, 7, -8):          # prefer an exact divisor: no pad copy
        if R % cand == 0:
            return cand
    return tm


def matmul_affine(x, w, scale, shift, *, apply_gelu, out_dtype=ACT_DTYPE,
                  row_tile=DEF_ROW_TILE):
    """Row-tiled fused matmul + (folded-bias) BN affine (+ GELU)."""
    R, K = x.shape
    C = w.shape[1]
    tm = _pick_row_tile(R, row_tile)
    Rp = pl.cdiv(R, tm) * tm
    if Rp != R:
        # TODO(synk): handle a ragged tail with an in-kernel row mask instead.
        x = jnp.pad(x, ((0, Rp - R), (0, 0)))

    est = (_nbytes((tm, K), x.dtype) + _nbytes((K, C), MM_DTYPE)
           + 2 * _nbytes((1, C), jnp.float32) + _nbytes((tm, C), out_dtype))
    out = pl.pallas_call(
        functools.partial(_matmul_affine_kernel, apply_gelu=apply_gelu),
        out_shape=jax.ShapeDtypeStruct((Rp, C), out_dtype),
        grid=(Rp // tm,),
        in_specs=[
            pl.BlockSpec((tm, K), lambda i: (i, 0)),
            pl.BlockSpec((K, C), lambda i: (0, 0)),     # weights stay resident
            pl.BlockSpec((1, C), lambda i: (0, 0)),
            pl.BlockSpec((1, C), lambda i: (0, 0)),
        ],
        out_specs=pl.BlockSpec((tm, C), lambda i: (i, 0)),
        compiler_params=pltpu.CompilerParams(
            dimension_semantics=("parallel",),
            vmem_limit_bytes=_vmem_limit(est)),
    )(x, w.astype(MM_DTYPE), scale.reshape(1, C), shift.reshape(1, C))
    return out[:R] if Rp != R else out


# ----------------------------------------------------------------------------
# Fully fused ConvLayer3: 1x1+BN+GELU -> kxk+BN+GELU -> 1x1+BN+GELU +residual
# ----------------------------------------------------------------------------
def _convlayer3_kernel(x_ref, w1_ref, s1_ref, t1_ref, wk_ref, s2_ref, t2_ref,
                       w3_ref, s3_ref, t3_ref, o_ref, yp_ref, im_ref,
                       *, ksize, hh, ww):
    d = w1_ref.shape[0]
    pad = ksize // 2
    n = hh * ww

    # ---- 1x1 conv + BN + GELU (y stays on-chip, never HBM) -----------------
    y = jnp.dot(x_ref[0].astype(MM_DTYPE), w1_ref[...],
                preferred_element_type=jnp.float32)
    y = _gelu(y * s1_ref[...] + t1_ref[...])                     # (n, d) f32

    # ---- zero-padded y (padding belongs to y, matching Conv2d(pad=k//2)) ---
    yp_ref[...] = jnp.zeros(yp_ref.shape, yp_ref.dtype)
    for i in range(hh):
        yp_ref[pad + i, pad:pad + ww, :] = y[i * ww:(i + 1) * ww, :]

    # ---- in-VMEM im2col -> ONE wide-K (k*k*d) MXU contraction ---------------
    for di in range(ksize):
        for dj in range(ksize):
            c0 = (di * ksize + dj) * d
            im_ref[:, c0:c0 + d] = (
                yp_ref[di:di + hh, dj:dj + ww, :].reshape(n, d)
                .astype(MM_DTYPE))
    z = jnp.dot(im_ref[...], wk_ref[...], preferred_element_type=jnp.float32)
    z = _gelu(z * s2_ref[...] + t2_ref[...])                      # (n, d) f32

    # ---- 1x1 conv + BN + GELU + residual add --------------------------------
    r = jnp.dot(z.astype(MM_DTYPE), w3_ref[...],
                preferred_element_type=jnp.float32)
    r = _gelu(r * s3_ref[...] + t3_ref[...])
    o_ref[0] = (y + r).astype(o_ref.dtype)


def convlayer3_fused(x, w1, s1, t1, wk, s2, t2, w3, s3, t3, hh, ww, ksize):
    """Fused ConvLayer3 on x: (B, H*W, D) -> (B, H*W, D)."""
    B, N, D = x.shape
    assert N == hh * ww
    pad = ksize // 2
    hpad, wpad = hh + 2 * pad, ww + 2 * pad
    KK = ksize * ksize * D
    wk_flat = wk.reshape(KK, D)                      # [ (ky*k+kx)*D + cin, cout ]
    vec = lambda a: a.reshape(1, D)

    est = (_nbytes((1, N, D), x.dtype) + _nbytes((1, N, D), ACT_DTYPE)
           + 2 * _nbytes((D, D), MM_DTYPE) + _nbytes((KK, D), MM_DTYPE)
           + 6 * _nbytes((1, D), jnp.float32)
           + _nbytes((hpad, wpad, D), jnp.float32)
           + _nbytes((N, KK), MM_DTYPE))
    kern = functools.partial(_convlayer3_kernel, ksize=ksize, hh=hh, ww=ww)
    # TODO(synk): for large feature maps (v7x's 64 MiB VMEM) split each image
    # into row bands with a k//2 halo instead of one block per image.
    return pl.pallas_call(
        kern,
        out_shape=jax.ShapeDtypeStruct((B, N, D), ACT_DTYPE),
        grid=(B,),
        in_specs=[
            pl.BlockSpec((1, N, D), lambda b: (b, 0, 0)),
            pl.BlockSpec((D, D), lambda b: (0, 0)),
            pl.BlockSpec((1, D), lambda b: (0, 0)),
            pl.BlockSpec((1, D), lambda b: (0, 0)),
            pl.BlockSpec((KK, D), lambda b: (0, 0)),
            pl.BlockSpec((1, D), lambda b: (0, 0)),
            pl.BlockSpec((1, D), lambda b: (0, 0)),
            pl.BlockSpec((D, D), lambda b: (0, 0)),
            pl.BlockSpec((1, D), lambda b: (0, 0)),
            pl.BlockSpec((1, D), lambda b: (0, 0)),
        ],
        out_specs=pl.BlockSpec((1, N, D), lambda b: (b, 0, 0)),
        scratch_shapes=[
            pltpu.VMEM((hpad, wpad, D), jnp.float32),   # zero-padded y
            pltpu.VMEM((N, KK), MM_DTYPE),              # im2col patch matrix
        ],
        compiler_params=pltpu.CompilerParams(
            dimension_semantics=("parallel",),
            vmem_limit_bytes=_vmem_limit(est)),
    )(x, w1.astype(MM_DTYPE), vec(s1), vec(t1),
      wk_flat.astype(MM_DTYPE), vec(s2), vec(t2),
      w3.astype(MM_DTYPE), vec(s3), vec(t3))


# ----------------------------------------------------------------------------
# latent <- LayerNorm(latent + Attention(latent, inp))   (heads=1, to_out=Id)
# ----------------------------------------------------------------------------
def _attn_ln_kernel(lat_ref, inp_ref, wq_ref, wk_ref, wv_ref, g_ref, b_ref,
                    o_ref, q_s, m_s, l_s, acc_s, *, scale, n_valid, need_mask):
    kv = pl.program_id(1)
    tk = inp_ref.shape[1]

    @pl.when(kv == 0)
    def _():
        q = jnp.dot(lat_ref[0].astype(MM_DTYPE), wq_ref[...],
                    preferred_element_type=jnp.float32)
        q_s[...] = (q * scale).astype(MM_DTYPE)            # pre-scale q once
        m_s[...] = jnp.full(m_s.shape, NEG_INF, m_s.dtype)
        l_s[...] = jnp.zeros(l_s.shape, l_s.dtype)
        acc_s[...] = jnp.zeros(acc_s.shape, acc_s.dtype)

    ctx = inp_ref[0].astype(MM_DTYPE)                                 # (tk, D)
    k = jnp.dot(ctx, wk_ref[...], preferred_element_type=jnp.float32)
    v = jnp.dot(ctx, wv_ref[...], preferred_element_type=jnp.float32)
    sim = jax.lax.dot_general(q_s[...], k.astype(MM_DTYPE),
                              (((1,), (1,)), ((), ())),
                              preferred_element_type=jnp.float32)     # (Mp, tk)
    if need_mask:
        col = jax.lax.broadcasted_iota(jnp.int32, sim.shape, 1) + kv * tk
        sim = jnp.where(col < n_valid, sim, NEG_INF)
        row = jax.lax.broadcasted_iota(jnp.int32, v.shape, 0) + kv * tk
        v = jnp.where(row < n_valid, v, 0.0)

    m_new = jnp.maximum(m_s[...], jnp.max(sim, axis=-1, keepdims=True))
    alpha = jnp.exp(m_s[...] - m_new)
    p = jnp.exp(sim - m_new)
    l_s[...] = alpha * l_s[...] + jnp.sum(p, axis=-1, keepdims=True)
    acc_s[...] = alpha * acc_s[...] + jnp.dot(
        p.astype(MM_DTYPE), v.astype(MM_DTYPE),
        preferred_element_type=jnp.float32)
    m_s[...] = m_new

    @pl.when(kv == pl.num_programs(1) - 1)
    def _():
        attn_out = acc_s[...] * pl.reciprocal(l_s[...], approx=True)
        y = lat_ref[0].astype(jnp.float32) + attn_out        # residual (f32)
        mu = jnp.mean(y, axis=-1, keepdims=True)             # LayerNorm over D
        dlt = y - mu
        var = jnp.mean(dlt * dlt, axis=-1, keepdims=True)
        yn = dlt * jax.lax.rsqrt(var + LN_EPS)
        o_ref[0] = (yn * g_ref[...] + b_ref[...]).astype(o_ref.dtype)


def attn_residual_layernorm(latent_pad, inp, wq, wk, wv, ln_g, ln_b, scale,
                            kv_tile=DEF_KV_TILE):
    B, Mp, D = latent_pad.shape
    N = inp.shape[1]
    tk = max(8, (min(kv_tile, N) // 8) * 8)
    nkv = pl.cdiv(N, tk)
    need_mask = (nkv * tk != N)        # ragged KV tail masked in-kernel (no pad)

    est = (_nbytes((1, Mp, D), latent_pad.dtype) + _nbytes((1, tk, D), inp.dtype)
           + 3 * _nbytes((D, D), MM_DTYPE) + 2 * _nbytes((1, D), jnp.float32)
           + _nbytes((1, Mp, D), ACT_DTYPE)
           + _nbytes((Mp, D), MM_DTYPE) + 2 * _nbytes((Mp, 1), jnp.float32)
           + _nbytes((Mp, D), jnp.float32))
    kern = functools.partial(_attn_ln_kernel, scale=scale, n_valid=N,
                             need_mask=need_mask)
    return pl.pallas_call(
        kern,
        out_shape=jax.ShapeDtypeStruct((B, Mp, D), ACT_DTYPE),
        grid=(B, nkv),
        in_specs=[
            pl.BlockSpec((1, Mp, D), lambda b, kv: (b, 0, 0)),
            pl.BlockSpec((1, tk, D), lambda b, kv: (b, kv, 0)),
            pl.BlockSpec((D, D), lambda b, kv: (0, 0)),
            pl.BlockSpec((D, D), lambda b, kv: (0, 0)),
            pl.BlockSpec((D, D), lambda b, kv: (0, 0)),
            pl.BlockSpec((1, D), lambda b, kv: (0, 0)),
            pl.BlockSpec((1, D), lambda b, kv: (0, 0)),
        ],
        out_specs=pl.BlockSpec((1, Mp, D), lambda b, kv: (b, 0, 0)),
        scratch_shapes=[
            pltpu.VMEM((Mp, D), MM_DTYPE),       # pre-scaled q
            pltpu.VMEM((Mp, 1), jnp.float32),    # running max
            pltpu.VMEM((Mp, 1), jnp.float32),    # running denominator
            pltpu.VMEM((Mp, D), jnp.float32),    # running numerator
        ],
        compiler_params=pltpu.CompilerParams(
            dimension_semantics=("parallel", "arbitrary"),
            vmem_limit_bytes=_vmem_limit(est)),
    )(latent_pad, inp, wq.astype(MM_DTYPE), wk.astype(MM_DTYPE),
      wv.astype(MM_DTYPE), ln_g.reshape(1, D), ln_b.reshape(1, D))


# ----------------------------------------------------------------------------
# Host glue
# ----------------------------------------------------------------------------
def bn_fold(gamma, beta, mean, var):
    s = gamma / jnp.sqrt(var + BN_EPS)
    return s, beta - mean * s


def fold_bias(bn_s, bn_t, bias):
    # BN(x@w + b) = (x@w) * s + (t + b*s)
    return bn_s, bn_t + bias * bn_s


def embed(x_nchw, w, bias, bn_s, bn_t, ps, D):
    # Conv2d(3, D, ps, stride=ps) == non-overlapping patch matmul.
    B, C, H, W = x_nchw.shape
    x = jnp.transpose(x_nchw, (0, 2, 3, 1))               # NCHW -> NHWC
    Hp, Wp = H // ps, W // ps
    x = x.reshape(B, Hp, ps, Wp, ps, C).transpose(0, 1, 3, 2, 4, 5)
    x = x.reshape(B * Hp * Wp, ps * ps * C)
    s, t = fold_bias(bn_s, bn_t, bias)
    out = matmul_affine(x, w, s, t, apply_gelu=True)
    return out.reshape(B, Hp * Wp, D), Hp, Wp


# ----------------------------------------------------------------------------
# Parameters (deterministic, synthetic) and the full forward pass
# ----------------------------------------------------------------------------
def init_params(key, cfg):
    D, ks, ps = cfg['hidden_dim'], cfg['kernel_size'], cfg['patch_size']
    keys = iter(jax.random.split(key, 256))

    def nrm(shape, s=0.05):
        return s * jax.random.normal(next(keys), shape, jnp.float32)

    def bn(dim):
        gamma = 1.0 + 0.1 * jax.random.normal(next(keys), (dim,), jnp.float32)
        beta = nrm((dim,), 0.1)
        mean = nrm((dim,), 0.1)
        var = 1.0 + 0.5 * jax.random.uniform(next(keys), (dim,), jnp.float32)
        return bn_fold(gamma, beta, mean, var)

    p = {
        'embed_w': nrm((ps * ps * 3, D)),
        'embed_b': nrm((D,), 0.1),
        'embed_bn': bn(D),
        'wq': nrm((D, D)),
        'wk': nrm((D, D)),                     # to_kv, chunk(2) -> k
        'wv': nrm((D, D)),                     #                 -> v
        'ln_g': jnp.ones((D,), jnp.float32),
        'ln_b': jnp.zeros((D,), jnp.float32),
        'logit_w': nrm((D, cfg['num_classes'])),
        'logit_b': nrm((cfg['num_classes'],), 0.1),
        'latent': jax.random.normal(next(keys), (1, D), jnp.float32),
    }
    p['layers'] = []
    for _ in range(cfg['num_layers']):
        p['layers'].append({
            'w1': nrm((D, D)), 'b1': nrm((D,), 0.1), 'bn1': bn(D),
            'wk': nrm((ks * ks, D, D)), 'bn2': bn(D),    # [ky*k+kx, cin, cout]
            'w3': nrm((D, D)), 'b3': nrm((D,), 0.1), 'bn3': bn(D),
        })
    return p


def conformer3_forward(params, x_nchw, cfg):
    D, ps, ks = cfg['hidden_dim'], cfg['patch_size'], cfg['kernel_size']
    B = x_nchw.shape[0]
    attn_scale = float(D) ** -0.5             # heads=1, dim_head=hidden_dim

    x, Hp, Wp = embed(x_nchw, params['embed_w'], params['embed_b'],
                      *params['embed_bn'], ps, D)         # (B, N, D)
    N = Hp * Wp
    M = 1 + N
    Mp = ((M + 7) // 8) * 8                               # sublane-aligned rows
    pad_rows = Mp - M

    def build_latent(token, inp):
        parts = [token, inp]
        if pad_rows:
            parts.append(jnp.zeros((B, pad_rows, D), inp.dtype))
        return jnp.concatenate(parts, axis=1)

    def attend(latent, inp):
        return attn_residual_layernorm(latent, inp, params['wq'], params['wk'],
                                       params['wv'], params['ln_g'],
                                       params['ln_b'], attn_scale)

    token = jnp.broadcast_to(params['latent'][None], (B, 1, D)).astype(x.dtype)
    latent = attend(build_latent(token, x), x)

    for lyr in params['layers']:
        s1, t1 = fold_bias(*lyr['bn1'], lyr['b1'])
        s2, t2 = lyr['bn2']                                 # kxk conv has no bias
        s3, t3 = fold_bias(*lyr['bn3'], lyr['b3'])
        x = convlayer3_fused(x, lyr['w1'], s1, t1, lyr['wk'], s2, t2,
                             lyr['w3'], s3, t3, Hp, Wp, ks)
        latent = attend(build_latent(latent[:, :1], x), x)

    pooled = jnp.mean(latent[:, :M].astype(jnp.float32), axis=1)   # 'b n d -> b d'
    # Tiny (B, num_classes) projection: plain JAX on purpose (a masked 10-lane
    # store inside a kernel would cost more than the launch).
    return pooled @ params['logit_w'] + params['logit_b']


# TODO(synk): BatchNorm is eval-mode (running stats folded into an affine);
# training-mode batch statistics and Dropout (p=0) are not reproduced.

if __name__ == "__main__":
    cfg = dict(num_layers=2, hidden_dim=32, kernel_size=5, patch_size=2,
               num_classes=10)
    key = jax.random.PRNGKey(0)
    pkey, xkey = jax.random.split(key)
    params = init_params(pkey, cfg)
    x = jax.random.normal(xkey, (2, 3, 16, 16), jnp.float32)   # NCHW input

    fwd = jax.jit(functools.partial(conformer3_forward, cfg=cfg))
    logits = fwd(params, x)
    jax.block_until_ready(logits)
    assert logits.shape == (2, cfg['num_classes'])
    assert bool(jnp.all(jnp.isfinite(logits)))
    print("KERNEL_OK")
</pallas_src>

<mosaic_0001>
module attributes {stable_mosaic.version = 11 : i64} {
  func.func @_matmul_affine_kernel(%arg0: i32, %arg1: memref<64x12xf32, #tpu.memory_space<vmem>>, %arg2: memref<12x32xbf16, #tpu.memory_space<vmem>>, %arg3: memref<1x32xf32, #tpu.memory_space<vmem>>, %arg4: memref<1x32xf32, #tpu.memory_space<vmem>>, %arg5: memref<64x32xbf16, #tpu.memory_space<vmem>>) attributes {dimension_semantics = [#tpu.dimension_semantics<parallel>], iteration_bounds = array<i64: 2>, scalar_prefetch = 0 : i64, scratch_operands = 0 : i64, tpu.core_type = #tpu.core_type<tc>, window_params = [{transform_indices = @transform_0, window_bounds = array<i64: 64, 12>}, {pipeline_mode = #tpu.pipeline_mode<synchronous>, transform_indices = @transform_1, window_bounds = array<i64: 12, 32>}, {pipeline_mode = #tpu.pipeline_mode<synchronous>, transform_indices = @transform_2, window_bounds = array<i64: 1, 32>}, {pipeline_mode = #tpu.pipeline_mode<synchronous>, transform_indices = @transform_3, window_bounds = array<i64: 1, 32>}, {transform_indices = @transform_4, window_bounds = array<i64: 64, 32>}]} {
    %c0 = arith.constant 0 : index
    %c0_0 = arith.constant 0 : index
    %0 = vector.load %arg1[%c0, %c0_0] : memref<64x12xf32, #tpu.memory_space<vmem>>, vector<64x12xf32>
    %1 = arith.truncf %0 : vector<64x12xf32> to vector<64x12xbf16>
    %c0_1 = arith.constant 0 : index
    %c0_2 = arith.constant 0 : index
    %2 = vector.load %arg2[%c0_1, %c0_2] : memref<12x32xbf16, #tpu.memory_space<vmem>>, vector<12x32xbf16>
    %cst = arith.constant dense<0.000000e+00> : vector<64x32xf32>
    %3 = tpu.matmul %1, %2, %cst {dimension_numbers = #tpu.dot_dimension_numbers<[1], [0], [0], [1], [0, 0, 1, 1], [], []>} : vector<64x12xbf16>, vector<12x32xbf16>, vector<64x32xf32> -> vector<64x32xf32>
    %c0_3 = arith.constant 0 : index
    %c0_4 = arith.constant 0 : index
    %4 = vector.load %arg3[%c0_3, %c0_4] : memref<1x32xf32, #tpu.memory_space<vmem>>, vector<1x32xf32>
    %5 = vector.broadcast %4 : vector<1x32xf32> to vector<64x32xf32>
    %6 = arith.mulf %3, %5 : vector<64x32xf32>
    %c0_5 = arith.constant 0 : index
    %c0_6 = arith.constant 0 : index
    %7 = vector.load %arg4[%c0_5, %c0_6] : memref<1x32xf32, #tpu.memory_space<vmem>>, vector<1x32xf32>
    %8 = vector.broadcast %7 : vector<1x32xf32> to vector<64x32xf32>
    %9 = arith.addf %6, %8 : vector<64x32xf32>
    %cst_7 = arith.constant 5.000000e-01 : f32
    %10 = vector.broadcast %cst_7 : f32 to vector<64x32xf32>
    %11 = arith.mulf %10, %9 : vector<64x32xf32>
    %cst_8 = arith.constant 4.471500e-02 : f32
    %12 = vector.broadcast %cst_8 : f32 to vector<64x32xf32>
    %13 = arith.mulf %12, %9 : vector<64x32xf32>
    %14 = arith.mulf %13, %9 : vector<64x32xf32>
    %15 = arith.mulf %14, %9 : vector<64x32xf32>
    %16 = arith.addf %9, %15 : vector<64x32xf32>
    %cst_9 = arith.constant 0.797884583 : f32
    %17 = vector.broadcast %cst_9 : f32 to vector<64x32xf32>
    %18 = arith.mulf %17, %16 : vector<64x32xf32>
    %19 = math.tanh %18 : vector<64x32xf32>
    %cst_10 = arith.constant 1.000000e+00 : f32
    %20 = vector.broadcast %cst_10 : f32 to vector<64x32xf32>
    %21 = arith.addf %20, %19 : vector<64x32xf32>
    %22 = arith.mulf %11, %21 : vector<64x32xf32>
    %23 = arith.truncf %22 : vector<64x32xf32> to vector<64x32xbf16>
    %c0_11 = arith.constant 0 : index
    %c0_12 = arith.constant 0 : index
    %24 = vector.load %arg5[%c0_11, %c0_12] : memref<64x32xbf16, #tpu.memory_space<vmem>>, vector<64x32xbf16>
    tpu.vector_store %arg5[%c0_11, %c0_12], %23 {strides = array<i32>} : memref<64x32xbf16, #tpu.memory_space<vmem>>, vector<64x32xbf16>,
    return
  }
  func.func @transform_0(%arg0: i32) -> (i32, i32) {
    %c0_i32 = arith.constant 0 : i32
    %c0_i32_0 = arith.constant 0 : i32
    return %arg0, %c0_i32 : i32, i32
  }
  func.func @transform_1(%arg0: i32) -> (i32, i32) {
    %c0_i32 = arith.constant 0 : i32
    %c0_i32_0 = arith.constant 0 : i32
    %c0_i32_1 = arith.constant 0 : i32
    return %c0_i32, %c0_i32_0 : i32, i32
  }
  func.func @transform_2(%arg0: i32) -> (i32, i32) {
    %c0_i32 = arith.constant 0 : i32
    %c0_i32_0 = arith.constant 0 : i32
    %c0_i32_1 = arith.constant 0 : i32
    return %c0_i32, %c0_i32_0 : i32, i32
  }
  func.func @transform_3(%arg0: i32) -> (i32, i32) {
    %c0_i32 = arith.constant 0 : i32
    %c0_i32_0 = arith.constant 0 : i32
    %c0_i32_1 = arith.constant 0 : i32
    return %c0_i32, %c0_i32_0 : i32, i32
  }
  func.func @transform_4(%arg0: i32) -> (i32, i32) {
    %c0_i32 = arith.constant 0 : i32
    %c0_i32_0 = arith.constant 0 : i32
    return %arg0, %c0_i32 : i32, i32
  }
}

module attributes {stable_mosaic.version = 11 : i64} {
  func.func @_attn_ln_kernel(%arg0: i32, %arg1: i32, %arg2: memref<1x72x32xbf16, #tpu.memory_space<vmem>>, %arg3: memref<1x64x32xbf16, #tpu.memory_space<vmem>>, %arg4: memref<32x32xbf16, #tpu.memory_space<vmem>>, %arg5: memref<32x32xbf16, #tpu.memory_space<vmem>>, %arg6: memref<32x32xbf16, #tpu.memory_space<vmem>>, %arg7: memref<1x32xf32, #tpu.memory_space<vmem>>, %arg8: memref<1x32xf32, #tpu.memory_space<vmem>>, %arg9: memref<1x72x32xbf16, #tpu.memory_space<vmem>>, %arg10: memref<72x32xbf16, #tpu.memory_space<vmem>>, %arg11: memref<72x1xf32, #tpu.memory_space<vmem>>, %arg12: memref<72x1xf32, #tpu.memory_space<vmem>>, %arg13: memref<72x32xf32, #tpu.memory_space<vmem>>) attributes {dimension_semantics = [#tpu.dimension_semantics<parallel>, #tpu.dimension_semantics<arbitrary>], iteration_bounds = array<i64: 2, 1>, scalar_prefetch = 0 : i64, scratch_operands = 4 : i64, tpu.core_type = #tpu.core_type<tc>, window_params = [{transform_indices = @transform_0, window_bounds = array<i64: 1, 72, 32>}, {transform_indices = @transform_1, window_bounds = array<i64: 1, 64, 32>}, {pipeline_mode = #tpu.pipeline_mode<synchronous>, transform_indices = @transform_2, window_bounds = array<i64: 32, 32>}, {pipeline_mode = #tpu.pipeline_mode<synchronous>, transform_indices = @transform_3, window_bounds = array<i64: 32, 32>}, {pipeline_mode = #tpu.pipeline_mode<synchronous>, transform_indices = @transform_4, window_bounds = array<i64: 32, 32>}, {pipeline_mode = #tpu.pipeline_mode<synchronous>, transform_indices = @transform_5, window_bounds = array<i64: 1, 32>}, {pipeline_mode = #tpu.pipeline_mode<synchronous>, transform_indices = @transform_6, window_bounds = array<i64: 1, 32>}, {transform_indices = @transform_7, window_bounds = array<i64: 1, 72, 32>}]} {
    %c0_i32 = arith.constant 0 : i32
    %0 = arith.cmpi eq, %arg1, %c0_i32 : i32
    %1 = arith.extui %0 : i1 to i32
    %c0_i32_0 = arith.constant 0 : i32
    %2 = arith.cmpi ne, %1, %c0_i32_0 : i32
    scf.if %2 {
      %c0_30 = arith.constant 0 : index
      %c0_31 = arith.constant 0 : index
      %c0_32 = arith.constant 0 : index
      %40 = vector.load %arg2[%c0_30, %c0_31, %c0_32] : memref<1x72x32xbf16, #tpu.memory_space<vmem>>, vector<1x72x32xbf16>
      %41 = vector.shape_cast %40 : vector<1x72x32xbf16> to vector<72x32xbf16>
      %c0_33 = arith.constant 0 : index
      %c0_34 = arith.constant 0 : index
      %42 = vector.load %arg4[%c0_33, %c0_34] : memref<32x32xbf16, #tpu.memory_space<vmem>>, vector<32x32xbf16>
      %cst_35 = arith.constant dense<0.000000e+00> : vector<72x32xf32>
      %43 = tpu.matmul %41, %42, %cst_35 {dimension_numbers = #tpu.dot_dimension_numbers<[1], [0], [0], [1], [0, 0, 1, 1], [], []>} : vector<72x32xbf16>, vector<32x32xbf16>, vector<72x32xf32> -> vector<72x32xf32>
      %cst_36 = arith.constant 0.176776692 : f32
      %44 = vector.broadcast %cst_36 : f32 to vector<72x32xf32>
      %45 = arith.mulf %43, %44 : vector<72x32xf32>
      %46 = arith.truncf %45 : vector<72x32xf32> to vector<72x32xbf16>
      %c0_37 = arith.constant 0 : index
      %c0_38 = arith.constant 0 : index
      %47 = vector.load %arg10[%c0_37, %c0_38] : memref<72x32xbf16, #tpu.memory_space<vmem>>, vector<72x32xbf16>
      tpu.vector_store %arg10[%c0_37, %c0_38], %46 {strides = array<i32>} : memref<72x32xbf16, #tpu.memory_space<vmem>>, vector<72x32xbf16>,
      %cst_39 = arith.constant -1.000000e+30 : f32
      %48 = vector.broadcast %cst_39 : f32 to vector<72x1xf32>
      %c0_40 = arith.constant 0 : index
      %c0_41 = arith.constant 0 : index
      %49 = vector.load %arg11[%c0_40, %c0_41] : memref<72x1xf32, #tpu.memory_space<vmem>>, vector<72x1xf32>
      tpu.vector_store %arg11[%c0_40, %c0_41], %48 {strides = array<i32>} : memref<72x1xf32, #tpu.memory_space<vmem>>, vector<72x1xf32>,
      %cst_42 = arith.constant 0.000000e+00 : f32
      %50 = vector.broadcast %cst_42 : f32 to vector<72x1xf32>
      %c0_43 = arith.constant 0 : index
      %c0_44 = arith.constant 0 : index
      %51 = vector.load %arg12[%c0_43, %c0_44] : memref<72x1xf32, #tpu.memory_space<vmem>>, vector<72x1xf32>
      tpu.vector_store %arg12[%c0_43, %c0_44], %50 {strides = array<i32>} : memref<72x1xf32, #tpu.memory_space<vmem>>, vector<72x1xf32>,
      %cst_45 = arith.constant 0.000000e+00 : f32
      %52 = vector.broadcast %cst_45 : f32 to vector<72x32xf32>
      %c0_46 = arith.constant 0 : index
      %c0_47 = arith.constant 0 : index
      %53 = vector.load %arg13[%c0_46, %c0_47] : memref<72x32xf32, #tpu.memory_space<vmem>>, vector<72x32xf32>
      tpu.vector_store %arg13[%c0_46, %c0_47], %52 {strides = array<i32>} : memref<72x32xf32, #tpu.memory_space<vmem>>, vector<72x32xf32>,
    } else {
    }
    %c0 = arith.constant 0 : index
    %c0_1 = arith.constant 0 : index
    %c0_2 = arith.constant 0 : index
    %3 = vector.load %arg3[%c0, %c0_1, %c0_2] : memref<1x64x32xbf16, #tpu.memory_space<vmem>>, vector<1x64x32xbf16>
    %4 = vector.shape_cast %3 : vector<1x64x32xbf16> to vector<64x32xbf16>
    %c0_3 = arith.constant 0 : index
    %c0_4 = arith.constant 0 : index
    %5 = vector.load %arg5[%c0_3, %c0_4] : memref<32x32xbf16, #tpu.memory_space<vmem>>, vector<32x32xbf16>
    %cst = arith.constant dense<0.000000e+00> : vector<64x32xf32>
    %6 = tpu.matmul %4, %5, %cst {dimension_numbers = #tpu.dot_dimension_numbers<[1], [0], [0], [1], [0, 0, 1, 1], [], []>} : vector<64x32xbf16>, vector<32x32xbf16>, vector<64x32xf32> -> vector<64x32xf32>
    %c0_5 = arith.constant 0 : index
    %c0_6 = arith.constant 0 : index
    %7 = vector.load %arg6[%c0_5, %c0_6] : memref<32x32xbf16, #tpu.memory_space<vmem>>, vector<32x32xbf16>
    %cst_7 = arith.constant dense<0.000000e+00> : vector<64x32xf32>
    %8 = tpu.matmul %4, %7, %cst_7 {dimension_numbers = #tpu.dot_dimension_numbers<[1], [0], [0], [1], [0, 0, 1, 1], [], []>} : vector<64x32xbf16>, vector<32x32xbf16>, vector<64x32xf32> -> vector<64x32xf32>
    %c0_8 = arith.constant 0 : index
    %c0_9 = arith.constant 0 : index
    %9 = vector.load %arg10[%c0_8, %c0_9] : memref<72x32xbf16, #tpu.memory_space<vmem>>, vector<72x32xbf16>
    %10 = arith.truncf %6 : vector<64x32xf32> to vector<64x32xbf16>
    %cst_10 = arith.constant dense<0.000000e+00> : vector<72x64xf32>
    %11 = tpu.matmul %9, %10, %cst_10 {dimension_numbers = #tpu.dot_dimension_numbers<[1], [1], [0], [0], [0, 0, 1, 0], [], []>} : vector<72x32xbf16>, vector<64x32xbf16>, vector<72x64xf32> -> vector<72x64xf32>
    %c0_11 = arith.constant 0 : index
    %c0_12 = arith.constant 0 : index
    %12 = vector.load %arg11[%c0_11, %c0_12] : memref<72x1xf32, #tpu.memory_space<vmem>>, vector<72x1xf32>
    %cst_13 = arith.constant dense<0xFF800000> : vector<72xf32>
    %13 = vector.multi_reduction <maximumf>, %11, %cst_13 [1] : vector<72x64xf32> to vector<72xf32>
    %14 = vector.shape_cast %13 : vector<72xf32> to vector<72x1xf32>
    %15 = arith.maximumf %12, %14 : vector<72x1xf32>
    %c0_14 = arith.constant 0 : index
    %c0_15 = arith.constant 0 : index
    %16 = vector.load %arg11[%c0_14, %c0_15] : memref<72x1xf32, #tpu.memory_space<vmem>>, vector<72x1xf32>
    %17 = arith.subf %16, %15 : vector<72x1xf32>
    %18 = math.exp %17 : vector<72x1xf32>
    %19 = vector.broadcast %15 : vector<72x1xf32> to vector<72x64xf32>
    %20 = arith.subf %11, %19 : vector<72x64xf32>
    %21 = math.exp %20 : vector<72x64xf32>
    %c0_16 = arith.constant 0 : index
    %c0_17 = arith.constant 0 : index
    %22 = vector.load %arg12[%c0_16, %c0_17] : memref<72x1xf32, #tpu.memory_space<vmem>>, vector<72x1xf32>
    %23 = arith.mulf %18, %22 : vector<72x1xf32>
    %cst_18 = arith.constant dense<0.000000e+00> : vector<72xf32>
    %24 = vector.multi_reduction <add>, %21, %cst_18 [1] : vector<72x64xf32> to vector<72xf32>
    %25 = vector.shape_cast %24 : vector<72xf32> to vector<72x1xf32>
    %26 = arith.addf %23, %25 : vector<72x1xf32>
    %c0_19 = arith.constant 0 : index
    %c0_20 = arith.constant 0 : index
    %27 = vector.load %arg12[%c0_19, %c0_20] : memref<72x1xf32, #tpu.memory_space<vmem>>, vector<72x1xf32>
    tpu.vector_store %arg12[%c0_19, %c0_20], %26 {strides = array<i32>} : memref<72x1xf32, #tpu.memory_space<vmem>>, vector<72x1xf32>,
    %c0_21 = arith.constant 0 : index
    %c0_22 = arith.constant 0 : index
    %28 = vector.load %arg13[%c0_21, %c0_22] : memref<72x32xf32, #tpu.memory_space<vmem>>, vector<72x32xf32>
    %29 = vector.broadcast %18 : vector<72x1xf32> to vector<72x32xf32>
    %30 = arith.mulf %29, %28 : vector<72x32xf32>
    %31 = arith.truncf %21 : vector<72x64xf32> to vector<72x64xbf16>
    %32 = arith.truncf %8 : vector<64x32xf32> to vector<64x32xbf16>
    %cst_23 = arith.constant dense<0.000000e+00> : vector<72x32xf32>
    %33 = tpu.matmul %31, %32, %cst_23 {dimension_numbers = #tpu.dot_dimension_numbers<[1], [0], [0], [1], [0, 0, 1, 1], [], []>} : vector<72x64xbf16>, vector<64x32xbf16>, vector<72x32xf32> -> vector<72x32xf32>
    %34 = arith.addf %30, %33 : vector<72x32xf32>
    %c0_24 = arith.constant 0 : index
    %c0_25 = arith.constant 0 : index
    %35 = vector.load %arg13[%c0_24, %c0_25] : memref<72x32xf32, #tpu.memory_space<vmem>>, vector<72x32xf32>
    tpu.vector_store %arg13[%c0_24, %c0_25], %34 {strides = array<i32>} : memref<72x32xf32, #tpu.memory_space<vmem>>, vector<72x32xf32>,
    %c0_26 = arith.constant 0 : index
    %c0_27 = arith.constant 0 : index
    %36 = vector.load %arg11[%c0_26, %c0_27] : memref<72x1xf32, #tpu.memory_space<vmem>>, vector<72x1xf32>
    tpu.vector_store %arg11[%c0_26, %c0_27], %15 {strides = array<i32>} : memref<72x1xf32, #tpu.memory_space<vmem>>, vector<72x1xf32>,
    %c0_i32_28 = arith.constant 0 : i32
    %37 = arith.cmpi eq, %arg1, %c0_i32_28 : i32
    %38 = arith.extui %37 : i1 to i32
    %c0_i32_29 = arith.constant 0 : i32
    %39 = arith.cmpi ne, %38, %c0_i32_29 : i32
    scf.if %39 {
      %c0_30 = arith.constant 0 : index
      %c0_31 = arith.constant 0 : index
      %40 = vector.load %arg13[%c0_30, %c0_31] : memref<72x32xf32, #tpu.memory_space<vmem>>, vector<72x32xf32>
      %c0_32 = arith.constant 0 : index
      %c0_33 = arith.constant 0 : index
      %41 = vector.load %arg12[%c0_32, %c0_33] : memref<72x1xf32, #tpu.memory_space<vmem>>, vector<72x1xf32>
      %42 = tpu.reciprocal %41 {approx = true} : vector<72x1xf32> -> vector<72x1xf32>
      %43 = vector.broadcast %42 : vector<72x1xf32> to vector<72x32xf32>
      %44 = arith.mulf %40, %43 : vector<72x32xf32>
      %c0_34 = arith.constant 0 : index
      %c0_35 = arith.constant 0 : index
      %c0_36 = arith.constant 0 : index
      %45 = vector.load %arg2[%c0_34, %c0_35, %c0_36] : memref<1x72x32xbf16, #tpu.memory_space<vmem>>, vector<1x72x32xbf16>
      %46 = vector.shape_cast %45 : vector<1x72x32xbf16> to vector<72x32xbf16>
      %47 = arith.extf %46 : vector<72x32xbf16> to vector<72x32xf32>
      %48 = arith.addf %47, %44 : vector<72x32xf32>
      %cst_37 = arith.constant dense<0.000000e+00> : vector<72xf32>
      %49 = vector.multi_reduction <add>, %48, %cst_37 [1] : vector<72x32xf32> to vector<72xf32>
      %50 = vector.shape_cast %49 : vector<72xf32> to vector<72x1xf32>
      %cst_38 = arith.constant 3.200000e+01 : f32
      %51 = vector.broadcast %cst_38 : f32 to vector<72x1xf32>
      %52 = arith.divf %50, %51 : vector<72x1xf32>
      %53 = vector.broadcast %52 : vector<72x1xf32> to vector<72x32xf32>
      %54 = arith.subf %48, %53 : vector<72x32xf32>
      %55 = arith.mulf %54, %54 : vector<72x32xf32>
      %cst_39 = arith.constant dense<0.000000e+00> : vector<72xf32>
      %56 = vector.multi_reduction <add>, %55, %cst_39 [1] : vector<72x32xf32> to vector<72xf32>
      %57 = vector.shape_cast %56 : vector<72xf32> to vector<72x1xf32>
      %cst_40 = arith.constant 3.200000e+01 : f32
      %58 = vector.broadcast %cst_40 : f32 to vector<72x1xf32>
      %59 = arith.divf %57, %58 : vector<72x1xf32>
      %cst_41 = arith.constant 9.99999974E-6 : f32
      %60 = vector.broadcast %cst_41 : f32 to vector<72x1xf32>
      %61 = arith.addf %59, %60 : vector<72x1xf32>
      %62 = math.rsqrt %61 : vector<72x1xf32>
      %63 = vector.broadcast %62 : vector<72x1xf32> to vector<72x32xf32>
      %64 = arith.mulf %54, %63 : vector<72x32xf32>
      %c0_42 = arith.constant 0 : index
      %c0_43 = arith.constant 0 : index
      %65 = vector.load %arg7[%c0_42, %c0_43] : memref<1x32xf32, #tpu.memory_space<vmem>>, vector<1x32xf32>
      %66 = vector.broadcast %65 : vector<1x32xf32> to vector<72x32xf32>
      %67 = arith.mulf %64, %66 : vector<72x32xf32>
      %c0_44 = arith.constant 0 : index
      %c0_45 = arith.constant 0 : index
      %68 = vector.load %arg8[%c0_44, %c0_45] : memref<1x32xf32, #tpu.memory_space<vmem>>, vector<1x32xf32>
      %69 = vector.broadcast %68 : vector<1x32xf32> to vector<72x32xf32>
      %70 = arith.addf %67, %69 : vector<72x32xf32>
      %71 = arith.truncf %70 : vector<72x32xf32> to vector<72x32xbf16>
      %c0_46 = arith.constant 0 : index
      %c0_47 = arith.constant 0 : index
      %c0_48 = arith.constant 0 : index
      %72 = vector.load %arg9[%c0_46, %c0_47, %c0_48] : memref<1x72x32xbf16, #tpu.memory_space<vmem>>, vector<1x72x32xbf16>
      %73 = vector.shape_cast %72 : vector<1x72x32xbf16> to vector<72x32xbf16>
      %74 = vector.shape_cast %71 : vector<72x32xbf16> to vector<1x72x32xbf16>
      tpu.vector_store %arg9[%c0_46, %c0_47, %c0_48], %74 {strides = array<i32>} : memref<1x72x32xbf16, #tpu.memory_space<vmem>>, vector<1x72x32xbf16>,
    } else {
    }
    return
  }
  func.func @transform_0(%arg0: i32, %arg1: i32) -> (i32, i32, i32) {
    %c0_i32 = arith.constant 0 : i32
    %c0_i32_0 = arith.constant 0 : i32
    %c0_i32_1 = arith.constant 0 : i32
    return %arg0, %c0_i32, %c0_i32_0 : i32, i32, i32
  }
  func.func @transform_1(%arg0: i32, %arg1: i32) -> (i32, i32, i32) {
    %c0_i32 = arith.constant 0 : i32
    %c0_i32_0 = arith.constant 0 : i32
    return %arg0, %arg1, %c0_i32 : i32, i32, i32
  }
  func.func @transform_2(%arg0: i32, %arg1: i32) -> (i32, i32) {
    %c0_i32 = arith.constant 0 : i32
    %c0_i32_0 = arith.constant 0 : i32
    %c0_i32_1 = arith.constant 0 : i32
    return %c0_i32, %c0_i32_0 : i32, i32
  }
  func.func @transform_3(%arg0: i32, %arg1: i32) -> (i32, i32) {
    %c0_i32 = arith.constant 0 : i32
    %c0_i32_0 = arith.constant 0 : i32
    %c0_i32_1 = arith.constant 0 : i32
    return %c0_i32, %c0_i32_0 : i32, i32
  }
  func.func @transform_4(%arg0: i32, %arg1: i32) -> (i32, i32) {
    %c0_i32 = arith.constant 0 : i32
    %c0_i32_0 = arith.constant 0 : i32
    %c0_i32_1 = arith.constant 0 : i32
    return %c0_i32, %c0_i32_0 : i32, i32
  }
  func.func @transform_5(%arg0: i32, %arg1: i32) -> (i32, i32) {
    %c0_i32 = arith.constant 0 : i32
    %c0_i32_0 = arith.constant 0 : i32
    %c0_i32_1 = arith.constant 0 : i32
    return %c0_i32, %c0_i32_0 : i32, i32
  }
  func.func @transform_6(%arg0: i32, %arg1: i32) -> (i32, i32) {
    %c0_i32 = arith.constant 0 : i32
    %c0_i32_0 = arith.constant 0 : i32
    %c0_i32_1 = arith.constant 0 : i32
    return %c0_i32, %c0_i32_0 : i32, i32
  }
  func.func @transform_7(%arg0: i32, %arg1: i32) -> (i32, i32, i32) {
    %c0_i32 = arith.constant 0 : i32
    %c0_i32_0 = arith.constant 0 : i32
    %c0_i32_1 = arith.constant 0 : i32
    return %arg0, %c0_i32, %c0_i32_0 : i32, i32, i32
  }
}

module attributes {stable_mosaic.version = 11 : i64} {
  func.func @_convlayer3_kernel(%arg0: i32, %arg1: memref<1x64x32xbf16, #tpu.memory_space<vmem>>, %arg2: memref<32x32xbf16, #tpu.memory_space<vmem>>, %arg3: memref<1x32xf32, #tpu.memory_space<vmem>>, %arg4: memref<1x32xf32, #tpu.memory_space<vmem>>, %arg5: memref<800x32xbf16, #tpu.memory_space<vmem>>, %arg6: memref<1x32xf32, #tpu.memory_space<vmem>>, %arg7: memref<1x32xf32, #tpu.memory_space<vmem>>, %arg8: memref<32x32xbf16, #tpu.memory_space<vmem>>, %arg9: memref<1x32xf32, #tpu.memory_space<vmem>>, %arg10: memref<1x32xf32, #tpu.memory_space<vmem>>, %arg11: memref<1x64x32xbf16, #tpu.memory_space<vmem>>, %arg12: memref<12x12x32xf32, #tpu.memory_space<vmem>>, %arg13: memref<64x800xbf16, #tpu.memory_space<vmem>>) attributes {dimension_semantics = [#tpu.dimension_semantics<parallel>], iteration_bounds = array<i64: 2>, scalar_prefetch = 0 : i64, scratch_operands = 2 : i64, tpu.core_type = #tpu.core_type<tc>, window_params = [{transform_indices = @transform_0, window_bounds = array<i64: 1, 64, 32>}, {pipeline_mode = #tpu.pipeline_mode<synchronous>, transform_indices = @transform_1, window_bounds = array<i64: 32, 32>}, {pipeline_mode = #tpu.pipeline_mode<synchronous>, transform_indices = @transform_2, window_bounds = array<i64: 1, 32>}, {pipeline_mode = #tpu.pipeline_mode<synchronous>, transform_indices = @transform_3, window_bounds = array<i64: 1, 32>}, {pipeline_mode = #tpu.pipeline_mode<synchronous>, transform_indices = @transform_4, window_bounds = array<i64: 800, 32>}, {pipeline_mode = #tpu.pipeline_mode<synchronous>, transform_indices = @transform_5, window_bounds = array<i64: 1, 32>}, {pipeline_mode = #tpu.pipeline_mode<synchronous>, transform_indices = @transform_6, window_bounds = array<i64: 1, 32>}, {pipeline_mode = #tpu.pipeline_mode<synchronous>, transform_indices = @transform_7, window_bounds = array<i64: 32, 32>}, {pipeline_mode = #tpu.pipeline_mode<synchronous>, transform_indices = @transform_8, window_bounds = array<i64: 1, 32>}, {pipeline_mode = #tpu.pipeline_mode<synchronous>, transform_indices = @transform_9, window_bounds = array<i64: 1, 32>}, {transform_indices = @transform_10, window_bounds = array<i64: 1, 64, 32>}]} {
    %c0 = arith.constant 0 : index
    %c0_0 = arith.constant 0 : index
    %c0_1 = arith.constant 0 : index
    %0 = vector.load %arg1[%c0, %c0_0, %c0_1] : memref<1x64x32xbf16, #tpu.memory_space<vmem>>, vector<1x64x32xbf16>
    %1 = vector.shape_cast %0 : vector<1x64x32xbf16> to vector<64x32xbf16>
    %c0_2 = arith.constant 0 : index
    %c0_3 = arith.constant 0 : index
    %2 = vector.load %arg2[%c0_2, %c0_3] : memref<32x32xbf16, #tpu.memory_space<vmem>>, vector<32x32xbf16>
    %cst = arith.constant dense<0.000000e+00> : vector<64x32xf32>
    %3 = tpu.matmul %1, %2, %cst {dimension_numbers = #tpu.dot_dimension_numbers<[1], [0], [0], [1], [0, 0, 1, 1], [], []>} : vector<64x32xbf16>, vector<32x32xbf16>, vector<64x32xf32> -> vector<64x32xf32>
    %c0_4 = arith.constant 0 : index
    %c0_5 = arith.constant 0 : index
    %4 = vector.load %arg3[%c0_4, %c0_5] : memref<1x32xf32, #tpu.memory_space<vmem>>, vector<1x32xf32>
    %5 = vector.broadcast %4 : vector<1x32xf32> to vector<64x32xf32>
    %6 = arith.mulf %3, %5 : vector<64x32xf32>
    %c0_6 = arith.constant 0 : index
    %c0_7 = arith.constant 0 : index
    %7 = vector.load %arg4[%c0_6, %c0_7] : memref<1x32xf32, #tpu.memory_space<vmem>>, vector<1x32xf32>
    %8 = vector.broadcast %7 : vector<1x32xf32> to vector<64x32xf32>
    %9 = arith.addf %6, %8 : vector<64x32xf32>
    %cst_8 = arith.constant 5.000000e-01 : f32
    %10 = vector.broadcast %cst_8 : f32 to vector<64x32xf32>
    %11 = arith.mulf %10, %9 : vector<64x32xf32>
    %cst_9 = arith.constant 4.471500e-02 : f32
    %12 = vector.broadcast %cst_9 : f32 to vector<64x32xf32>
    %13 = arith.mulf %12, %9 : vector<64x32xf32>
    %14 = arith.mulf %13, %9 : vector<64x32xf32>
    %15 = arith.mulf %14, %9 : vector<64x32xf32>
    %16 = arith.addf %9, %15 : vector<64x32xf32>
    %cst_10 = arith.constant 0.797884583 : f32
    %17 = vector.broadcast %cst_10 : f32 to vector<64x32xf32>
    %18 = arith.mulf %17, %16 : vector<64x32xf32>
    %19 = math.tanh %18 : vector<64x32xf32>
    %cst_11 = arith.constant 1.000000e+00 : f32
    %20 = vector.broadcast %cst_11 : f32 to vector<64x32xf32>
    %21 = arith.addf %20, %19 : vector<64x32xf32>
    %22 = arith.mulf %11, %21 : vector<64x32xf32>
    %cst_12 = arith.constant 0.000000e+00 : f32
    %23 = vector.broadcast %cst_12 : f32 to vector<12x12x32xf32>
    %c0_13 = arith.constant 0 : index
    %c0_14 = arith.constant 0 : index
    %c0_15 = arith.constant 0 : index
    %24 = vector.load %arg12[%c0_13, %c0_14, %c0_15] : memref<12x12x32xf32, #tpu.memory_space<vmem>>, vector<12x12x32xf32>
    tpu.vector_store %arg12[%c0_13, %c0_14, %c0_15], %23 {strides = array<i32>} : memref<12x12x32xf32, #tpu.memory_space<vmem>>, vector<12x12x32xf32>,
    %25 = vector.extract_strided_slice %22 {offsets = [0, 0], sizes = [8, 32], strides = [1, 1]} : vector<64x32xf32> to vector<8x32xf32>
    %c2 = arith.constant 2 : index
    %c2_16 = arith.constant 2 : index
    %c0_17 = arith.constant 0 : index
    %26 = vector.load %arg12[%c2, %c2_16, %c0_17] : memref<12x12x32xf32, #tpu.memory_space<vmem>>, vector<1x8x32xf32>
    %27 = vector.shape_cast %26 : vector<1x8x32xf32> to vector<8x32xf32>
    %28 = vector.shape_cast %25 : vector<8x32xf32> to vector<1x8x32xf32>
    tpu.vector_store %arg12[%c2, %c2_16, %c0_17], %28 {strides = array<i32>} : memref<12x12x32xf32, #tpu.memory_space<vmem>>, vector<1x8x32xf32>,
    %29 = vector.extract_strided_slice %22 {offsets = [8, 0], sizes = [8, 32], strides = [1, 1]} : vector<64x32xf32> to vector<8x32xf32>
    %c3 = arith.constant 3 : index
    %c2_18 = arith.constant 2 : index
    %c0_19 = arith.constant 0 : index
    %30 = vector.load %arg12[%c3, %c2_18, %c0_19] : memref<12x12x32xf32, #tpu.memory_space<vmem>>, vector<1x8x32xf32>
    %31 = vector.shape_cast %30 : vector<1x8x32xf32> to vector<8x32xf32>
    %32 = vector.shape_cast %29 : vector<8x32xf32> to vector<1x8x32xf32>
    tpu.vector_store %arg12[%c3, %c2_18, %c0_19], %32 {strides = array<i32>} : memref<12x12x32xf32, #tpu.memory_space<vmem>>, vector<1x8x32xf32>,
    %33 = vector.extract_strided_slice %22 {offsets = [16, 0], sizes = [8, 32], strides = [1, 1]} : vector<64x32xf32> to vector<8x32xf32>
    %c4 = arith.constant 4 : index
    %c2_20 = arith.constant 2 : index
    %c0_21 = arith.constant 0 : index
    %34 = vector.load %arg12[%c4, %c2_20, %c0_21] : memref<12x12x32xf32, #tpu.memory_space<vmem>>, vector<1x8x32xf32>
    %35 = vector.shape_cast %34 : vector<1x8x32xf32> to vector<8x32xf32>
    %36 = vector.shape_cast %33 : vector<8x32xf32> to vector<1x8x32xf32>
    tpu.vector_store %arg12[%c4, %c2_20, %c0_21], %36 {strides = array<i32>} : memref<12x12x32xf32, #tpu.memory_space<vmem>>, vector<1x8x32xf32>,
    %37 = vector.extract_strided_slice %22 {offsets = [24, 0], sizes = [8, 32], strides = [1, 1]} : vector<64x32xf32> to vector<8x32xf32>
    %c5 = arith.constant 5 : index
    %c2_22 = arith.constant 2 : index
    %c0_23 = arith.constant 0 : index
    %38 = vector.load %arg12[%c5, %c2_22, %c0_23] : memref<12x12x32xf32, #tpu.memory_space<vmem>>, vector<1x8x32xf32>
    %39 = vector.shape_cast %38 : vector<1x8x32xf32> to vector<8x32xf32>
    %40 = vector.shape_cast %37 : vector<8x32xf32> to vector<1x8x32xf32>
    tpu.vector_store %arg12[%c5, %c2_22, %c0_23], %40 {strides = array<i32>} : memref<12x12x32xf32, #tpu.memory_space<vmem>>, vector<1x8x32xf32>,
    %41 = vector.extract_strided_slice %22 {offsets = [32, 0], sizes = [8, 32], strides = [1, 1]} : vector<64x32xf32> to vector<8x32xf32>
    %c6 = arith.constant 6 : index
    %c2_24 = arith.constant 2 : index
    %c0_25 = arith.constant 0 : index
    %42 = vector.load %arg12[%c6, %c2_24, %c0_25] : memref<12x12x32xf32, #tpu.memory_space<vmem>>, vector<1x8x32xf32>
    %43 = vector.shape_cast %42 : vector<1x8x32xf32> to vector<8x32xf32>
    %44 = vector.shape_cast %41 : vector<8x32xf32> to vector<1x8x32xf32>
    tpu.vector_store %arg12[%c6, %c2_24, %c0_25], %44 {strides = array<i32>} : memref<12x12x32xf32, #tpu.memory_space<vmem>>, vector<1x8x32xf32>,
    %45 = vector.extract_strided_slice %22 {offsets = [40, 0], sizes = [8, 32], strides = [1, 1]} : vector<64x32xf32> to vector<8x32xf32>
    %c7 = arith.constant 7 : index
    %c2_26 = arith.constant 2 : index
    %c0_27 = arith.constant 0 : index
    %46 = vector.load %arg12[%c7, %c2_26, %c0_27] : memref<12x12x32xf32, #tpu.memory_space<vmem>>, vector<1x8x32xf32>
    %47 = vector.shape_cast %46 : vector<1x8x32xf32> to vector<8x32xf32>
    %48 = vector.shape_cast %45 : vector<8x32xf32> to vector<1x8x32xf32>
    tpu.vector_store %arg12[%c7, %c2_26, %c0_27], %48 {strides = array<i32>} : memref<12x12x32xf32, #tpu.memory_space<vmem>>, vector<1x8x32xf32>,
    %49 = vector.extract_strided_slice %22 {offsets = [48, 0], sizes = [8, 32], strides = [1, 1]} : vector<64x32xf32> to vector<8x32xf32>
    %c8 = arith.constant 8 : index
    %c2_28 = arith.constant 2 : index
    %c0_29 = arith.constant 0 : index
    %50 = vector.load %arg12[%c8, %c2_28, %c0_29] : memref<12x12x32xf32, #tpu.memory_space<vmem>>, vector<1x8x32xf32>
    %51 = vector.shape_cast %50 : vector<1x8x32xf32> to vector<8x32xf32>
    %52 = vector.shape_cast %49 : vector<8x32xf32> to vector<1x8x32xf32>
    tpu.vector_store %arg12[%c8, %c2_28, %c0_29], %52 {strides = array<i32>} : memref<12x12x32xf32, #tpu.memory_space<vmem>>, vector<1x8x32xf32>,
    %53 = vector.extract_strided_slice %22 {offsets = [56, 0], sizes = [8, 32], strides = [1, 1]} : vector<64x32xf32> to vector<8x32xf32>
    %c9 = arith.constant 9 : index
    %c2_30 = arith.constant 2 : index
    %c0_31 = arith.constant 0 : index
    %54 = vector.load %arg12[%c9, %c2_30, %c0_31] : memref<12x12x32xf32, #tpu.memory_space<vmem>>, vector<1x8x32xf32>
    %55 = vector.shape_cast %54 : vector<1x8x32xf32> to vector<8x32xf32>
    %56 = vector.shape_cast %53 : vector<8x32xf32> to vector<1x8x32xf32>
    tpu.vector_store %arg12[%c9, %c2_30, %c0_31], %56 {strides = array<i32>} : memref<12x12x32xf32, #tpu.memory_space<vmem>>, vector<1x8x32xf32>,
    %c0_32 = arith.constant 0 : index
    %c0_33 = arith.constant 0 : index
    %c0_34 = arith.constant 0 : index
    %57 = vector.load %arg12[%c0_32, %c0_33, %c0_34] : memref<12x12x32xf32, #tpu.memory_space<vmem>>, vector<8x8x32xf32>
    %58 = vector.shape_cast %57 : vector<8x8x32xf32> to vector<64x32xf32>
    %59 = arith.truncf %58 : vector<64x32xf32> to vector<64x32xbf16>
    %c0_35 = arith.constant 0 : index
    %c0_36 = arith.constant 0 : index
    %60 = vector.load %arg13[%c0_35, %c0_36] : memref<64x800xbf16, #tpu.memory_space<vmem>>, vector<64x32xbf16>
    tpu.vector_store %arg13[%c0_35, %c0_36], %59 {strides = array<i32>} : memref<64x800xbf16, #tpu.memory_space<vmem>>, vector<64x32xbf16>,
    %c0_37 = arith.constant 0 : index
    %c1 = arith.constant 1 : index
    %c0_38 = arith.constant 0 : index
    %61 = vector.load %arg12[%c0_37, %c1, %c0_38] : memref<12x12x32xf32, #tpu.memory_space<vmem>>, vector<8x8x32xf32>
    %62 = vector.shape_cast %61 : vector<8x8x32xf32> to vector<64x32xf32>
    %63 = arith.truncf %62 : vector<64x32xf32> to vector<64x32xbf16>
    %c0_39 = arith.constant 0 : index
    %c32 = arith.constant 32 : index
    %64 = vector.load %arg13[%c0_39, %c32] : memref<64x800xbf16, #tpu.memory_space<vmem>>, vector<64x32xbf16>
    tpu.vector_store %arg13[%c0_39, %c32], %63 {strides = array<i32>} : memref<64x800xbf16, #tpu.memory_space<vmem>>, vector<64x32xbf16>,
    %c0_40 = arith.constant 0 : index
    %c2_41 = arith.constant 2 : index
    %c0_42 = arith.constant 0 : index
    %65 = vector.load %arg12[%c0_40, %c2_41, %c0_42] : memref<12x12x32xf32, #tpu.memory_space<vmem>>, vector<8x8x32xf32>
    %66 = vector.shape_cast %65 : vector<8x8x32xf32> to vector<64x32xf32>
    %67 = arith.truncf %66 : vector<64x32xf32> to vector<64x32xbf16>
    %c0_43 = arith.constant 0 : index
    %c64 = arith.constant 64 : index
    %68 = vector.load %arg13[%c0_43, %c64] : memref<64x800xbf16, #tpu.memory_space<vmem>>, vector<64x32xbf16>
    tpu.vector_store %arg13[%c0_43, %c64], %67 {strides = array<i32>} : memref<64x800xbf16, #tpu.memory_space<vmem>>, vector<64x32xbf16>,
    %c0_44 = arith.constant 0 : index
    %c3_45 = arith.constant 3 : index
    %c0_46 = arith.constant 0 : index
    %69 = vector.load %arg12[%c0_44, %c3_45, %c0_46] : memref<12x12x32xf32, #tpu.memory_space<vmem>>, vector<8x8x32xf32>
    %70 = vector.shape_cast %69 : vector<8x8x32xf32> to vector<64x32xf32>
    %71 = arith.truncf %70 : vector<64x32xf32> to vector<64x32xbf16>
    %c0_47 = arith.constant 0 : index
    %c96 = arith.constant 96 : index
    %72 = vector.load %arg13[%c0_47, %c96] : memref<64x800xbf16, #tpu.memory_space<vmem>>, vector<64x32xbf16>
    tpu.vector_store %arg13[%c0_47, %c96], %71 {strides = array<i32>} : memref<64x800xbf16, #tpu.memory_space<vmem>>, vector<64x32xbf16>,
    %c0_48 = arith.constant 0 : index
    %c4_49 = arith.constant 4 : index
    %c0_50 = arith.constant 0 : index
    %73 = vector.load %arg12[%c0_48, %c4_49, %c0_50] : memref<12x12x32xf32, #tpu.memory_space<vmem>>, vector<8x8x32xf32>
    %74 = vector.shape_cast %73 : vector<8x8x32xf32> to vector<64x32xf32>
    %75 = arith.truncf %74 : vector<64x32xf32> to vector<64x32xbf16>
    %c0_51 = arith.constant 0 : index
    %c128 = arith.constant 128 : index
    %76 = vector.load %arg13[%c0_51, %c128] : memref<64x800xbf16, #tpu.memory_space<vmem>>, vector<64x32xbf16>
    tpu.vector_store %arg13[%c0_51, %c128], %75 {strides = array<i32>} : memref<64x800xbf16, #tpu.memory_space<vmem>>, vector<64x32xbf16>,
    %c1_52 = arith.constant 1 : index
    %c0_53 = arith.constant 0 : index
    %c0_54 = arith.constant 0 : index
    %77 = vector.load %arg12[%c1_52, %c0_53, %c0_54] : memref<12x12x32xf32, #tpu.memory_space<vmem>>, vector<8x8x32xf32>
    %78 = vector.shape_cast %77 : vector<8x8x32xf32> to vector<64x32xf32>
    %79 = arith.truncf %78 : vector<64x32xf32> to vector<64x32xbf16>
    %c0_55 = arith.constant 0 : index
    %c160 = arith.constant 160 : index
    %80 = vector.load %arg13[%c0_55, %c160] : memref<64x800xbf16, #tpu.memory_space<vmem>>, vector<64x32xbf16>
    tpu.vector_store %arg13[%c0_55, %c160], %79 {strides = array<i32>} : memref<64x800xbf16, #tpu.memory_space<vmem>>, vector<64x32xbf16>,
    %c1_56 = arith.constant 1 : index
    %c1_57 = arith.constant 1 : index
    %c0_58 = arith.constant 0 : index
    %81 = vector.load %arg12[%c1_56, %c1_57, %c0_58] : memref<12x12x32xf32, #tpu.memory_space<vmem>>, vector<8x8x32xf32>
    %82 = vector.shape_cast %81 : vector<8x8x32xf32> to vector<64x32xf32>
    %83 = arith.truncf %82 : vector<64x32xf32> to vector<64x32xbf16>
    %c0_59 = arith.constant 0 : index
    %c192 = arith.constant 192 : index
    %84 = vector.load %arg13[%c0_59, %c192] : memref<64x800xbf16, #tpu.memory_space<vmem>>, vector<64x32xbf16>
    tpu.vector_store %arg13[%c0_59, %c192], %83 {strides = array<i32>} : memref<64x800xbf16, #tpu.memory_space<vmem>>, vector<64x32xbf16>,
    %c1_60 = arith.constant 1 : index
    %c2_61 = arith.constant 2 : index
    %c0_62 = arith.constant 0 : index
    %85 = vector.load %arg12[%c1_60, %c2_61, %c0_62] : memref<12x12x32xf32, #tpu.memory_space<vmem>>, vector<8x8x32xf32>
    %86 = vector.shape_cast %85 : vector<8x8x32xf32> to vector<64x32xf32>
    %87 = arith.truncf %86 : vector<64x32xf32> to vector<64x32xbf16>
    %c0_63 = arith.constant 0 : index
    %c224 = arith.constant 224 : index
    %88 = vector.load %arg13[%c0_63, %c224] : memref<64x800xbf16, #tpu.memory_space<vmem>>, vector<64x32xbf16>
    tpu.vector_store %arg13[%c0_63, %c224], %87 {strides = array<i32>} : memref<64x800xbf16, #tpu.memory_space<vmem>>, vector<64x32xbf16>,
    %c1_64 = arith.constant 1 : index
    %c3_65 = arith.constant 3 : index
    %c0_66 = arith.constant 0 : index
    %89 = vector.load %arg12[%c1_64, %c3_65, %c0_66] : memref<12x12x32xf32, #tpu.memory_space<vmem>>, vector<8x8x32xf32>
    %90 = vector.shape_cast %89 : vector<8x8x32xf32> to vector<64x32xf32>
    %91 = arith.truncf %90 : vector<64x32xf32> to vector<64x32xbf16>
    %c0_67 = arith.constant 0 : index
    %c256 = arith.constant 256 : index
    %92 = vector.load %arg13[%c0_67, %c256] : memref<64x800xbf16, #tpu.memory_space<vmem>>, vector<64x32xbf16>
    tpu.vector_store %arg13[%c0_67, %c256], %91 {strides = array<i32>} : memref<64x800xbf16, #tpu.memory_space<vmem>>, vector<64x32xbf16>,
    %c1_68 = arith.constant 1 : index
    %c4_69 = arith.constant 4 : index
    %c0_70 = arith.constant 0 : index
    %93 = vector.load %arg12[%c1_68, %c4_69, %c0_70] : memref<12x12x32xf32, #tpu.memory_space<vmem>>, vector<8x8x32xf32>
    %94 = vector.shape_cast %93 : vector<8x8x32xf32> to vector<64x32xf32>
    %95 = arith.truncf %94 : vector<64x32xf32> to vector<64x32xbf16>
    %c0_71 = arith.constant 0 : index
    %c288 = arith.constant 288 : index
    %96 = vector.load %arg13[%c0_71, %c288] : memref<64x800xbf16, #tpu.memory_space<vmem>>, vector<64x32xbf16>
    tpu.vector_store %arg13[%c0_71, %c288], %95 {strides = array<i32>} : memref<64x800xbf16, #tpu.memory_space<vmem>>, vector<64x32xbf16>,
    %c2_72 = arith.constant 2 : index
    %c0_73 = arith.constant 0 : index
    %c0_74 = arith.constant 0 : index
    %97 = vector.load %arg12[%c2_72, %c0_73, %c0_74] : memref<12x12x32xf32, #tpu.memory_space<vmem>>, vector<8x8x32xf32>
    %98 = vector.shape_cast %97 : vector<8x8x32xf32> to vector<64x32xf32>
    %99 = arith.truncf %98 : vector<64x32xf32> to vector<64x32xbf16>
    %c0_75 = arith.constant 0 : index
    %c320 = arith.constant 320 : index
    %100 = vector.load %arg13[%c0_75, %c320] : memref<64x800xbf16, #tpu.memory_space<vmem>>, vector<64x32xbf16>
    tpu.vector_store %arg13[%c0_75, %c320], %99 {strides = array<i32>} : memref<64x800xbf16, #tpu.memory_space<vmem>>, vector<64x32xbf16>,
    %c2_76 = arith.constant 2 : index
    %c1_77 = arith.constant 1 : index
    %c0_78 = arith.constant 0 : index
    %101 = vector.load %arg12[%c2_76, %c1_77, %c0_78] : memref<12x12x32xf32, #tpu.memory_space<vmem>>, vector<8x8x32xf32>
    %102 = vector.shape_cast %101 : vector<8x8x32xf32> to vector<64x32xf32>
    %103 = arith.truncf %102 : vector<64x32xf32> to vector<64x32xbf16>
    %c0_79 = arith.constant 0 : index
    %c352 = arith.constant 352 : index
    %104 = vector.load %arg13[%c0_79, %c352] : memref<64x800xbf16, #tpu.memory_space<vmem>>, vector<64x32xbf16>
    tpu.vector_store %arg13[%c0_79, %c352], %103 {strides = array<i32>} : memref<64x800xbf16, #tpu.memory_space<vmem>>, vector<64x32xbf16>,
    %c2_80 = arith.constant 2 : index
    %c2_81 = arith.constant 2 : index
    %c0_82 = arith.constant 0 : index
    %105 = vector.load %arg12[%c2_80, %c2_81, %c0_82] : memref<12x12x32xf32, #tpu.memory_space<vmem>>, vector<8x8x32xf32>
    %106 = vector.shape_cast %105 : vector<8x8x32xf32> to vector<64x32xf32>
    %107 = arith.truncf %106 : vector<64x32xf32> to vector<64x32xbf16>
    %c0_83 = arith.constant 0 : index
    %c384 = arith.constant 384 : index
    %108 = vector.load %arg13[%c0_83, %c384] : memref<64x800xbf16, #tpu.memory_space<vmem>>, vector<64x32xbf16>
    tpu.vector_store %arg13[%c0_83, %c384], %107 {strides = array<i32>} : memref<64x800xbf16, #tpu.memory_space<vmem>>, vector<64x32xbf16>,
    %c2_84 = arith.constant 2 : index
    %c3_85 = arith.constant 3 : index
    %c0_86 = arith.constant 0 : index
    %109 = vector.load %arg12[%c2_84, %c3_85, %c0_86] : memref<12x12x32xf32, #tpu.memory_space<vmem>>, vector<8x8x32xf32>
    %110 = vector.shape_cast %109 : vector<8x8x32xf32> to vector<64x32xf32>
    %111 = arith.truncf %110 : vector<64x32xf32> to vector<64x32xbf16>
    %c0_87 = arith.constant 0 : index
    %c416 = arith.constant 416 : index
    %112 = vector.load %arg13[%c0_87, %c416] : memref<64x800xbf16, #tpu.memory_space<vmem>>, vector<64x32xbf16>
    tpu.vector_store %arg13[%c0_87, %c416], %111 {strides = array<i32>} : memref<64x800xbf16, #tpu.memory_space<vmem>>, vector<64x32xbf16>,
    %c2_88 = arith.constant 2 : index
    %c4_89 = arith.constant 4 : index
    %c0_90 = arith.constant 0 : index
    %113 = vector.load %arg12[%c2_88, %c4_89, %c0_90] : memref<12x12x32xf32, #tpu.memory_space<vmem>>, vector<8x8x32xf32>
    %114 = vector.shape_cast %113 : vector<8x8x32xf32> to vector<64x32xf32>
    %115 = arith.truncf %114 : vector<64x32xf32> to vector<64x32xbf16>
    %c0_91 = arith.constant 0 : index
    %c448 = arith.constant 448 : index
    %116 = vector.load %arg13[%c0_91, %c448] : memref<64x800xbf16, #tpu.memory_space<vmem>>, vector<64x32xbf16>
    tpu.vector_store %arg13[%c0_91, %c448], %115 {strides = array<i32>} : memref<64x800xbf16, #tpu.memory_space<vmem>>, vector<64x32xbf16>,
    %c3_92 = arith.constant 3 : index
    %c0_93 = arith.constant 0 : index
    %c0_94 = arith.constant 0 : index
    %117 = vector.load %arg12[%c3_92, %c0_93, %c0_94] : memref<12x12x32xf32, #tpu.memory_space<vmem>>, vector<8x8x32xf32>
    %118 = vector.shape_cast %117 : vector<8x8x32xf32> to vector<64x32xf32>
    %119 = arith.truncf %118 : vector<64x32xf32> to vector<64x32xbf16>
    %c0_95 = arith.constant 0 : index
    %c480 = arith.constant 480 : index
    %120 = vector.load %arg13[%c0_95, %c480] : memref<64x800xbf16, #tpu.memory_space<vmem>>, vector<64x32xbf16>
    tpu.vector_store %arg13[%c0_95, %c480], %119 {strides = array<i32>} : memref<64x800xbf16, #tpu.memory_space<vmem>>, vector<64x32xbf16>,
    %c3_96 = arith.constant 3 : index
    %c1_97 = arith.constant 1 : index
    %c0_98 = arith.constant 0 : index
    %121 = vector.load %arg12[%c3_96, %c1_97, %c0_98] : memref<12x12x32xf32, #tpu.memory_space<vmem>>, vector<8x8x32xf32>
    %122 = vector.shape_cast %121 : vector<8x8x32xf32> to vector<64x32xf32>
    %123 = arith.truncf %122 : vector<64x32xf32> to vector<64x32xbf16>
    %c0_99 = arith.constant 0 : index
    %c512 = arith.constant 512 : index
    %124 = vector.load %arg13[%c0_99, %c512] : memref<64x800xbf16, #tpu.memory_space<vmem>>, vector<64x32xbf16>
    tpu.vector_store %arg13[%c0_99, %c512], %123 {strides = array<i32>} : memref<64x800xbf16, #tpu.memory_space<vmem>>, vector<64x32xbf16>,
    %c3_100 = arith.constant 3 : index
    %c2_101 = arith.constant 2 : index
    %c0_102 = arith.constant 0 : index
    %125 = vector.load %arg12[%c3_100, %c2_101, %c0_102] : memref<12x12x32xf32, #tpu.memory_space<vmem>>, vector<8x8x32xf32>
    %126 = vector.shape_cast %125 : vector<8x8x32xf32> to vector<64x32xf32>
    %127 = arith.truncf %126 : vector<64x32xf32> to vector<64x32xbf16>
    %c0_103 = arith.constant 0 : index
    %c544 = arith.constant 544 : index
    %128 = vector.load %arg13[%c0_103, %c544] : memref<64x800xbf16, #tpu.memory_space<vmem>>, vector<64x32xbf16>
    tpu.vector_store %arg13[%c0_103, %c544], %127 {strides = array<i32>} : memref<64x800xbf16, #tpu.memory_space<vmem>>, vector<64x32xbf16>,
    %c3_104 = arith.constant 3 : index
    %c3_105 = arith.constant 3 : index
    %c0_106 = arith.constant 0 : index
    %129 = vector.load %arg12[%c3_104, %c3_105, %c0_106] : memref<12x12x32xf32, #tpu.memory_space<vmem>>, vector<8x8x32xf32>
    %130 = vector.shape_cast %129 : vector<8x8x32xf32> to vector<64x32xf32>
    %131 = arith.truncf %130 : vector<64x32xf32> to vector<64x32xbf16>
    %c0_107 = arith.constant 0 : index
    %c576 = arith.constant 576 : index
    %132 = vector.load %arg13[%c0_107, %c576] : memref<64x800xbf16, #tpu.memory_space<vmem>>, vector<64x32xbf16>
    tpu.vector_store %arg13[%c0_107, %c576], %131 {strides = array<i32>} : memref<64x800xbf16, #tpu.memory_space<vmem>>, vector<64x32xbf16>,
    %c3_108 = arith.constant 3 : index
    %c4_109 = arith.constant 4 : index
    %c0_110 = arith.constant 0 : index
    %133 = vector.load %arg12[%c3_108, %c4_109, %c0_110] : memref<12x12x32xf32, #tpu.memory_space<vmem>>, vector<8x8x32xf32>
    %134 = vector.shape_cast %133 : vector<8x8x32xf32> to vector<64x32xf32>
    %135 = arith.truncf %134 : vector<64x32xf32> to vector<64x32xbf16>
    %c0_111 = arith.constant 0 : index
    %c608 = arith.constant 608 : index
    %136 = vector.load %arg13[%c0_111, %c608] : memref<64x800xbf16, #tpu.memory_space<vmem>>, vector<64x32xbf16>
    tpu.vector_store %arg13[%c0_111, %c608], %135 {strides = array<i32>} : memref<64x800xbf16, #tpu.memory_space<vmem>>, vector<64x32xbf16>,
    %c4_112 = arith.constant 4 : index
    %c0_113 = arith.constant 0 : index
    %c0_114 = arith.constant 0 : index
    %137 = vector.load %arg12[%c4_112, %c0_113, %c0_114] : memref<12x12x32xf32, #tpu.memory_space<vmem>>, vector<8x8x32xf32>
    %138 = vector.shape_cast %137 : vector<8x8x32xf32> to vector<64x32xf32>
    %139 = arith.truncf %138 : vector<64x32xf32> to vector<64x32xbf16>
    %c0_115 = arith.constant 0 : index
    %c640 = arith.constant 640 : index
    %140 = vector.load %arg13[%c0_115, %c640] : memref<64x800xbf16, #tpu.memory_space<vmem>>, vector<64x32xbf16>
    tpu.vector_store %arg13[%c0_115, %c640], %139 {strides = array<i32>} : memref<64x800xbf16, #tpu.memory_space<vmem>>, vector<64x32xbf16>,
    %c4_116 = arith.constant 4 : index
    %c1_117 = arith.constant 1 : index
    %c0_118 = arith.constant 0 : index
    %141 = vector.load %arg12[%c4_116, %c1_117, %c0_118] : memref<12x12x32xf32, #tpu.memory_space<vmem>>, vector<8x8x32xf32>
    %142 = vector.shape_cast %141 : vector<8x8x32xf32> to vector<64x32xf32>
    %143 = arith.truncf %142 : vector<64x32xf32> to vector<64x32xbf16>
    %c0_119 = arith.constant 0 : index
    %c672 = arith.constant 672 : index
    %144 = vector.load %arg13[%c0_119, %c672] : memref<64x800xbf16, #tpu.memory_space<vmem>>, vector<64x32xbf16>
    tpu.vector_store %arg13[%c0_119, %c672], %143 {strides = array<i32>} : memref<64x800xbf16, #tpu.memory_space<vmem>>, vector<64x32xbf16>,
    %c4_120 = arith.constant 4 : index
    %c2_121 = arith.constant 2 : index
    %c0_122 = arith.constant 0 : index
    %145 = vector.load %arg12[%c4_120, %c2_121, %c0_122] : memref<12x12x32xf32, #tpu.memory_space<vmem>>, vector<8x8x32xf32>
    %146 = vector.shape_cast %145 : vector<8x8x32xf32> to vector<64x32xf32>
    %147 = arith.truncf %146 : vector<64x32xf32> to vector<64x32xbf16>
    %c0_123 = arith.constant 0 : index
    %c704 = arith.constant 704 : index
    %148 = vector.load %arg13[%c0_123, %c704] : memref<64x800xbf16, #tpu.memory_space<vmem>>, vector<64x32xbf16>
    tpu.vector_store %arg13[%c0_123, %c704], %147 {strides = array<i32>} : memref<64x800xbf16, #tpu.memory_space<vmem>>, vector<64x32xbf16>,
    %c4_124 = arith.constant 4 : index
    %c3_125 = arith.constant 3 : index
    %c0_126 = arith.constant 0 : index
    %149 = vector.load %arg12[%c4_124, %c3_125, %c0_126] : memref<12x12x32xf32, #tpu.memory_space<vmem>>, vector<8x8x32xf32>
    %150 = vector.shape_cast %149 : vector<8x8x32xf32> to vector<64x32xf32>
    %151 = arith.truncf %150 : vector<64x32xf32> to vector<64x32xbf16>
    %c0_127 = arith.constant 0 : index
    %c736 = arith.constant 736 : index
    %152 = vector.load %arg13[%c0_127, %c736] : memref<64x800xbf16, #tpu.memory_space<vmem>>, vector<64x32xbf16>
    tpu.vector_store %arg13[%c0_127, %c736], %151 {strides = array<i32>} : memref<64x800xbf16, #tpu.memory_space<vmem>>, vector<64x32xbf16>,
    %c4_128 = arith.constant 4 : index
    %c4_129 = arith.constant 4 : index
    %c0_130 = arith.constant 0 : index
    %153 = vector.load %arg12[%c4_128, %c4_129, %c0_130] : memref<12x12x32xf32, #tpu.memory_space<vmem>>, vector<8x8x32xf32>
    %154 = vector.shape_cast %153 : vector<8x8x32xf32> to vector<64x32xf32>
    %155 = arith.truncf %154 : vector<64x32xf32> to vector<64x32xbf16>
    %c0_131 = arith.constant 0 : index
    %c768 = arith.constant 768 : index
    %156 = vector.load %arg13[%c0_131, %c768] : memref<64x800xbf16, #tpu.memory_space<vmem>>, vector<64x32xbf16>
    tpu.vector_store %arg13[%c0_131, %c768], %155 {strides = array<i32>} : memref<64x800xbf16, #tpu.memory_space<vmem>>, vector<64x32xbf16>,
    %c0_132 = arith.constant 0 : index
    %c0_133 = arith.constant 0 : index
    %157 = vector.load %arg13[%c0_132, %c0_133] : memref<64x800xbf16, #tpu.memory_space<vmem>>, vector<64x800xbf16>
    %c0_134 = arith.constant 0 : index
    %c0_135 = arith.constant 0 : index
    %158 = vector.load %arg5[%c0_134, %c0_135] : memref<800x32xbf16, #tpu.memory_space<vmem>>, vector<800x32xbf16>
    %cst_136 = arith.constant dense<0.000000e+00> : vector<64x32xf32>
    %159 = tpu.matmul %157, %158, %cst_136 {dimension_numbers = #tpu.dot_dimension_numbers<[1], [0], [0], [1], [0, 0, 1, 1], [], []>} : vector<64x800xbf16>, vector<800x32xbf16>, vector<64x32xf32> -> vector<64x32xf32>
    %c0_137 = arith.constant 0 : index
    %c0_138 = arith.constant 0 : index
    %160 = vector.load %arg6[%c0_137, %c0_138] : memref<1x32xf32, #tpu.memory_space<vmem>>, vector<1x32xf32>
    %161 = vector.broadcast %160 : vector<1x32xf32> to vector<64x32xf32>
    %162 = arith.mulf %159, %161 : vector<64x32xf32>
    %c0_139 = arith.constant 0 : index
    %c0_140 = arith.constant 0 : index
    %163 = vector.load %arg7[%c0_139, %c0_140] : memref<1x32xf32, #tpu.memory_space<vmem>>, vector<1x32xf32>
    %164 = vector.broadcast %163 : vector<1x32xf32> to vector<64x32xf32>
    %165 = arith.addf %162, %164 : vector<64x32xf32>
    %cst_141 = arith.constant 5.000000e-01 : f32
    %166 = vector.broadcast %cst_141 : f32 to vector<64x32xf32>
    %167 = arith.mulf %166, %165 : vector<64x32xf32>
    %cst_142 = arith.constant 4.471500e-02 : f32
    %168 = vector.broadcast %cst_142 : f32 to vector<64x32xf32>
    %169 = arith.mulf %168, %165 : vector<64x32xf32>
    %170 = arith.mulf %169, %165 : vector<64x32xf32>
    %171 = arith.mulf %170, %165 : vector<64x32xf32>
    %172 = arith.addf %165, %171 : vector<64x32xf32>
    %cst_143 = arith.constant 0.797884583 : f32
    %173 = vector.broadcast %cst_143 : f32 to vector<64x32xf32>
    %174 = arith.mulf %173, %172 : vector<64x32xf32>
    %175 = math.tanh %174 : vector<64x32xf32>
    %cst_144 = arith.constant 1.000000e+00 : f32
    %176 = vector.broadcast %cst_144 : f32 to vector<64x32xf32>
    %177 = arith.addf %176, %175 : vector<64x32xf32>
    %178 = arith.mulf %167, %177 : vector<64x32xf32>
    %179 = arith.truncf %178 : vector<64x32xf32> to vector<64x32xbf16>
    %c0_145 = arith.constant 0 : index
    %c0_146 = arith.constant 0 : index
    %180 = vector.load %arg8[%c0_145, %c0_146] : memref<32x32xbf16, #tpu.memory_space<vmem>>, vector<32x32xbf16>
    %cst_147 = arith.constant dense<0.000000e+00> : vector<64x32xf32>
    %181 = tpu.matmul %179, %180, %cst_147 {dimension_numbers = #tpu.dot_dimension_numbers<[1], [0], [0], [1], [0, 0, 1, 1], [], []>} : vector<64x32xbf16>, vector<32x32xbf16>, vector<64x32xf32> -> vector<64x32xf32>
    %c0_148 = arith.constant 0 : index
    %c0_149 = arith.constant 0 : index
    %182 = vector.load %arg9[%c0_148, %c0_149] : memref<1x32xf32, #tpu.memory_space<vmem>>, vector<1x32xf32>
    %183 = vector.broadcast %182 : vector<1x32xf32> to vector<64x32xf32>
    %184 = arith.mulf %181, %183 : vector<64x32xf32>
    %c0_150 = arith.constant 0 : index
    %c0_151 = arith.constant 0 : index
    %185 = vector.load %arg10[%c0_150, %c0_151] : memref<1x32xf32, #tpu.memory_space<vmem>>, vector<1x32xf32>
    %186 = vector.broadcast %185 : vector<1x32xf32> to vector<64x32xf32>
    %187 = arith.addf %184, %186 : vector<64x32xf32>
    %cst_152 = arith.constant 5.000000e-01 : f32
    %188 = vector.broadcast %cst_152 : f32 to vector<64x32xf32>
    %189 = arith.mulf %188, %187 : vector<64x32xf32>
    %cst_153 = arith.constant 4.471500e-02 : f32
    %190 = vector.broadcast %cst_153 : f32 to vector<64x32xf32>
    %191 = arith.mulf %190, %187 : vector<64x32xf32>
    %192 = arith.mulf %191, %187 : vector<64x32xf32>
    %193 = arith.mulf %192, %187 : vector<64x32xf32>
    %194 = arith.addf %187, %193 : vector<64x32xf32>
    %cst_154 = arith.constant 0.797884583 : f32
    %195 = vector.broadcast %cst_154 : f32 to vector<64x32xf32>
    %196 = arith.mulf %195, %194 : vector<64x32xf32>
    %197 = math.tanh %196 : vector<64x32xf32>
    %cst_155 = arith.constant 1.000000e+00 : f32
    %198 = vector.broadcast %cst_155 : f32 to vector<64x32xf32>
    %199 = arith.addf %198, %197 : vector<64x32xf32>
    %200 = arith.mulf %189, %199 : vector<64x32xf32>
    %201 = arith.addf %22, %200 : vector<64x32xf32>
    %202 = arith.truncf %201 : vector<64x32xf32> to vector<64x32xbf16>
    %c0_156 = arith.constant 0 : index
    %c0_157 = arith.constant 0 : index
    %c0_158 = arith.constant 0 : index
    %203 = vector.load %arg11[%c0_156, %c0_157, %c0_158] : memref<1x64x32xbf16, #tpu.memory_space<vmem>>, vector<1x64x32xbf16>
    %204 = vector.shape_cast %203 : vector<1x64x32xbf16> to vector<64x32xbf16>
    %205 = vector.shape_cast %202 : vector<64x32xbf16> to vector<1x64x32xbf16>
    tpu.vector_store %arg11[%c0_156, %c0_157, %c0_158], %205 {strides = array<i32>} : memref<1x64x32xbf16, #tpu.memory_space<vmem>>, vector<1x64x32xbf16>,
    return
  }
  func.func @transform_0(%arg0: i32) -> (i32, i32, i32) {
    %c0_i32 = arith.constant 0 : i32
    %c0_i32_0 = arith.constant 0 : i32
    %c0_i32_1 = arith.constant 0 : i32
    return %arg0, %c0_i32, %c0_i32_0 : i32, i32, i32
  }
  func.func @transform_1(%arg0: i32) -> (i32, i32) {
    %c0_i32 = arith.constant 0 : i32
    %c0_i32_0 = arith.constant 0 : i32
    %c0_i32_1 = arith.constant 0 : i32
    return %c0_i32, %c0_i32_0 : i32, i32
  }
  func.func @transform_2(%arg0: i32) -> (i32, i32) {
    %c0_i32 = arith.constant 0 : i32
    %c0_i32_0 = arith.constant 0 : i32
    %c0_i32_1 = arith.constant 0 : i32
    return %c0_i32, %c0_i32_0 : i32, i32
  }
  func.func @transform_3(%arg0: i32) -> (i32, i32) {
    %c0_i32 = arith.constant 0 : i32
    %c0_i32_0 = arith.constant 0 : i32
    %c0_i32_1 = arith.constant 0 : i32
    return %c0_i32, %c0_i32_0 : i32, i32
  }
  func.func @transform_4(%arg0: i32) -> (i32, i32) {
    %c0_i32 = arith.constant 0 : i32
    %c0_i32_0 = arith.constant 0 : i32
    %c0_i32_1 = arith.constant 0 : i32
    return %c0_i32, %c0_i32_0 : i32, i32
  }
  func.func @transform_5(%arg0: i32) -> (i32, i32) {
    %c0_i32 = arith.constant 0 : i32
    %c0_i32_0 = arith.constant 0 : i32
    %c0_i32_1 = arith.constant 0 : i32
    return %c0_i32, %c0_i32_0 : i32, i32
  }
  func.func @transform_6(%arg0: i32) -> (i32, i32) {
    %c0_i32 = arith.constant 0 : i32
    %c0_i32_0 = arith.constant 0 : i32
    %c0_i32_1 = arith.constant 0 : i32
    return %c0_i32, %c0_i32_0 : i32, i32
  }
  func.func @transform_7(%arg0: i32) -> (i32, i32) {
    %c0_i32 = arith.constant 0 : i32
    %c0_i32_0 = arith.constant 0 : i32
    %c0_i32_1 = arith.constant 0 : i32
    return %c0_i32, %c0_i32_0 : i32, i32
  }
  func.func @transform_8(%arg0: i32) -> (i32, i32) {
    %c0_i32 = arith.constant 0 : i32
    %c0_i32_0 = arith.constant 0 : i32
    %c0_i32_1 = arith.constant 0 : i32
    return %c0_i32, %c0_i32_0 : i32, i32
  }
  func.func @transform_9(%arg0: i32) -> (i32, i32) {
    %c0_i32 = arith.constant 0 : i32
    %c0_i32_0 = arith.constant 0 : i32
    %c0_i32_1 = arith.constant 0 : i32
    return %c0_i32, %c0_i32_0 : i32, i32
  }
  func.func @transform_10(%arg0: i32) -> (i32, i32, i32) {
    %c0_i32 = arith.constant 0 : i32
    %c0_i32_0 = arith.constant 0 : i32
    %c0_i32_1 = arith.constant 0 : i32
    return %arg0, %c0_i32, %c0_i32_0 : i32, i32, i32
  }
}

</mosaic_0001>

<bundles_post_ra>
// kernel: conformer3_forward.6
= control target key start
LH: loop header
LB: loop body
LE: loop exit
PB: predicated region body
PF: predicated region fallthrough
CT: control target
= control target key end

     0   :  { %s518_s15 = smov 0   ;;  %s611_s0 = inlined_call_operand.vmem [shape: f32[128,12], index: 0, kind: input, shape index: {}]   ;;  %s612_s1 = inlined_call_operand.vmem [shape: bf16[12,32], index: 1, kind: input, shape index: {}]   ;;  %s613_s2 = inlined_call_operand.vmem [shape: f32[1,32], index: 2, kind: input, shape index: {}]   ;;  %s614_s3 = inlined_call_operand.vmem [shape: f32[1,32], index: 3, kind: input, shape index: {}]   ;;  %s615_s4 = inlined_call_operand.vmem [shape: bf16[128,32], index: 4, kind: output, shape index: {}]  }
   0x1 LB: > { %s436_s16 = sadd.s32 4294967295, %s491_s15   ;;  %p440_p0 = scmp.ge.s32.totalorder %s491_s15, 1  ;;  %s491_s15 = sphi %s518_s15, %s14_s15  }
   0x2   : > { %p163_p1 = scmp.lt.s32.totalorder %s491_s15, 3 }
   0x4   : > { %p164_p2 = pnand %p440_p0, %p163_p1 }
   0x5   : > { %s441_s21 = sshll.u32 (!%p164_p2), %s436_s16, 3 }
   0x6   : > { %167 = sbr.rel (%p164_p2) target bundleno = 188 (0xbc), region = 36  ;;  %p190_p3 = scmp.lt.s32.totalorder (!%p164_p2), %s441_s21, 15 }
   0xb   : > { %v447_v0 = vld [vmem:[%s612_s1] sm:$0xf]  ;;  %v455_v1 = vld [vmem:[%s612_s1] sm:$0x30]  ;;  %vm234_vm0 = vcmask 1045504   ;;  %s617_s21 = smov (!%p190_p3, %s441_s21), 15 }
   0xc   : > { %v448_v2 = vor.u32 %v455_v1, %v447_v0  ;;  %s442_s22 = sshll.u32 %s617_s21, 3  ;;  %vm221_vm1 = vcmask 97280   ;;  %v467_v16 = vld [vmem:[%s613_s2] ss:$0 sm:$0xff]  ;;  %s444_s30 = sshll.u32 %s617_s21, 2  ;;  %vm371_vm2 = vcmask 257024  }
   0xd   : > { %s193_s25 = scalar_lea.vmem %s611_s0, %s442_s22  ;;  %v468_v17 = vld [vmem:[%s614_s3] ss:$0 sm:$0xff]  ;;  %s581_s7 = scalar_lea.vmem %s615_s4, %s444_s30 }
   0xe   : > { %v236_v3 = vsel %vm234_vm0, %v448_v2, 0  ;;  %v202_v4 = vld [vmem:[%s193_s25] sm:$0xff]  ;;  %v203_v5 = vld [vmem:[%s193_s25 + $0x8] sm:$0xff]  ;;  %v204_v6 = vld [vmem:[%s193_s25 + $0x10] sm:$0xff] }
   0xf   : > { %245 = vmatpush.bf16.msra.mxu0 %v236_v3  ;;  %456 = vmatpush.bf16.msra.mxu1 %v236_v3  ;;  %v210_v7 = vpack.c.bf16 %v203_v5, %v202_v4  ;;  %v205_v8 = vld [vmem:[%s193_s25 + $0x18] sm:$0xff]  ;;  %v206_v9 = vld [vmem:[%s193_s25 + $0x20] sm:$0xff]  ;;  %v207_v10 = vld [vmem:[%s193_s25 + $0x28] sm:$0xff] }
  0x10   : > { %457 = vmatpush.bf16.msra.mxu2 %v236_v3  ;;  %458 = vmatpush.bf16.msra.mxu3 %v236_v3  ;;  %v211_v11 = vpack.c.bf16 %v205_v8, %v204_v6  ;;  %v212_v12 = vpack.c.bf16 %v207_v10, %v206_v9  ;;  %v208_v13 = vld [vmem:[%s193_s25 + $0x30] sm:$0xff]  ;;  %v209_v14 = vld [vmem:[%s193_s25 + $0x38] sm:$0xff] }
  0x11   : > { %v213_v15 = vpack.c.bf16 %v209_v14, %v208_v13 }
  0x12   : > { %449 = vmatmul.msk.bf16.vlgmr.msra.gmra.mxu0 %vm221_vm1, %v210_v7  ;;  %450 = vmatmul.msk.bf16.vlgmr.msra.gmra.mxu1 %vm221_vm1, %v211_v11 }
  0x13   : > { %451 = vmatmul.msk.bf16.vlgmr.msra.gmra.mxu2 %vm221_vm1, %v212_v12  ;;  %452 = vmatmul.msk.bf16.vlgmr.msra.gmra.mxu3 %vm221_vm1, %v213_v15 }
  0x8f   : > { %v247_v18 = vpop.f32.mrf.mxu0  ;;  %v252_v20 = vpop.f32.mrf.mxu1 }
  0x90   : > { %v271_v19 = vmul.f32 %v467_v16, %v247_v18  ;;  %v273_v21 = vmul.f32 %v467_v16, %v252_v20 }
  0x92   : > { %v283_v22 = vadd.f32 %v468_v17, %v271_v19  ;;  %v285_v23 = vadd.f32 %v468_v17, %v273_v21 }
  0x94   : > { %v299_v24 = vmul.f32 0.044715, %v283_v22  ;;  %v301_v25 = vmul.f32 0.044715, %v285_v23  ;;  %v291_v2 = vmul.f32 0.5, %v283_v22  ;;  %v293_v7 = vmul.f32 0.5, %v285_v23 }
  0x96   : > { %v307_v26 = vmul.f32 %v299_v24, %v283_v22  ;;  %v257_v27 = vpop.f32.mrf.mxu2  ;;  %v309_v28 = vmul.f32 %v301_v25, %v285_v23  ;;  %v262_v30 = vpop.f32.mrf.mxu3 }
  0x97   : > { %v275_v29 = vmul.f32 %v467_v16, %v257_v27  ;;  %v249_v31 = vpop.f32.mrf.mxu0  ;;  %v277_v33 = vmul.f32 %v467_v16, %v262_v30  ;;  %v254_v35 = vpop.f32.mrf.mxu1 }
  0x98   : > { %v315_v32 = vmul.f32 %v307_v26, %v283_v22  ;;  %v272_v34 = vmul.f32 %v467_v16, %v249_v31  ;;  %v317_v36 = vmul.f32 %v309_v28, %v285_v23  ;;  %v274_v38 = vmul.f32 %v467_v16, %v254_v35 }
  0x99   : > { %v544_v37 = vadd.f32 %v468_v17, %v275_v29  ;;  %v546_v40 = vadd.f32 %v468_v17, %v277_v33 }
  0x9a   : > { %v323_v39 = vadd.f32 %v315_v32, %v283_v22  ;;  %v548_v41 = vadd.f32 %v468_v17, %v272_v34  ;;  %v325_v42 = vadd.f32 %v317_v36, %v285_v23  ;;  %v551_v44 = vadd.f32 %v468_v17, %v274_v38 }
  0x9b   : > { %v303_v43 = vmul.f32 0.044715, %v544_v37  ;;  %v305_v46 = vmul.f32 0.044715, %v546_v40  ;;  %v295_v29 = vmul.f32 0.5, %v544_v37  ;;  %v297_v33 = vmul.f32 0.5, %v546_v40 }
  0x9c   : > { %v331_v45 = vmul.f32 0.7978846, %v323_v39  ;;  %v333_v47 = vmul.f32 0.7978846, %v325_v42  ;;  %v300_v49 = vmul.f32 0.044715, %v548_v41 }
  0x9d   : > { %v311_v48 = vmul.f32 %v303_v43, %v544_v37  ;;  %v313_v50 = vmul.f32 %v305_v46, %v546_v40  ;;  %v302_v51 = vmul.f32 0.044715, %v551_v44  ;;  %v292_v38 = vmul.f32 0.5, %v548_v41 }
  0x9e   : > { %469 = vtanh.f32 %v331_v45  ;;  %v259_v52 = vpop.f32.mrf.mxu2  ;;  %v308_v54 = vmul.f32 %v300_v49, %v548_v41  ;;  %v264_v56 = vpop.f32.mrf.mxu3 }
  0x9f   : > { %471 = vtanh.f32 %v333_v47  ;;  %v319_v53 = vmul.f32 %v311_v48, %v544_v37  ;;  %v276_v55 = vmul.f32 %v467_v16, %v259_v52  ;;  %v321_v57 = vmul.f32 %v313_v50, %v546_v40 }
  0xa0   : > { %v310_v58 = vmul.f32 %v302_v51, %v551_v44  ;;  %v278_v59 = vmul.f32 %v467_v16, %v264_v56  ;;  %v316_v61 = vmul.f32 %v308_v54, %v548_v41 }
  0xa1   : > { %v327_v60 = vadd.f32 %v319_v53, %v544_v37  ;;  %v564_v62 = vadd.f32 %v468_v17, %v276_v55  ;;  %v329_v63 = vadd.f32 %v321_v57, %v546_v40  ;;  %v294_v37 = vmul.f32 0.5, %v551_v44 }
  0xa2   : > { %v318_v0 = vmul.f32 %v310_v58, %v551_v44  ;;  %v568_v1 = vadd.f32 %v468_v17, %v278_v59  ;;  %v324_v4 = vadd.f32 %v316_v61, %v548_v41 }
  0xa3   : > { %v335_v3 = vmul.f32 0.7978846, %v327_v60  ;;  %v304_v5 = vmul.f32 0.044715, %v564_v62  ;;  %v337_v8 = vmul.f32 0.7978846, %v329_v63 }
  0xa4   : > { %v470_v6 = vpop.eup %469  ;;  %v326_v9 = vadd.f32 %v318_v0, %v551_v44  ;;  %v306_v10 = vmul.f32 0.044715, %v568_v1  ;;  %v332_v13 = vmul.f32 0.7978846, %v324_v4  ;;  %v296_v51 = vmul.f32 0.5, %v564_v62 }
  0xa5   : > { %v472_v11 = vpop.eup %471  ;;  %v347_v12 = vadd.f32 1.0, %v470_v6  ;;  %473 = vtanh.f32 %v335_v3  ;;  %v312_v14 = vmul.f32 %v304_v5, %v564_v62  ;;  %v298_v52 = vmul.f32 0.5, %v568_v1 }
  0xa6   : > { %v349_v15 = vadd.f32 1.0, %v472_v11  ;;  %475 = vtanh.f32 %v337_v8  ;;  %v334_v16 = vmul.f32 0.7978846, %v326_v9  ;;  %v314_v17 = vmul.f32 %v306_v10, %v568_v1 }
  0xa7   : > { %v355_v18 = vmul.f32 %v347_v12, %v291_v2  ;;  %477 = vtanh.f32 %v332_v13  ;;  %v320_v19 = vmul.f32 %v312_v14, %v564_v62 }
  0xa8   : > { %v357_v20 = vmul.f32 %v349_v15, %v293_v7  ;;  %479 = vtanh.f32 %v334_v16  ;;  %v322_v21 = vmul.f32 %v314_v17, %v568_v1 }
  0xa9   : > { %v363_v22 = vpack.c.bf16 %v355_v18, %v355_v18  ;;  %v328_v23 = vadd.f32 %v320_v19, %v564_v62 }
  0xaa   : > { %v365_v24 = vpack.c.bf16 %v357_v20, %v357_v20  ;;  %v330_v25 = vadd.f32 %v322_v21, %v568_v1 }
  0xab   : > { %v474_v26 = vpop.eup %473  ;;  %372 = vst.msk [vmem:[%s581_s7] sm:$0xf] %vm371_vm2, %v363_v22  ;;  %v336_v27 = vmul.f32 0.7978846, %v328_v23 }
  0xac   : > { %v476_v28 = vpop.eup %475  ;;  %374 = vst.msk [vmem:[%s581_s7 + $0x8] sm:$0xf] %vm371_vm2, %v365_v24  ;;  %v351_v30 = vadd.f32 1.0, %v474_v26  ;;  %v338_v31 = vmul.f32 0.7978846, %v330_v25 }
  0xad   : > { %v478_v32 = vpop.eup %477  ;;  %v353_v34 = vadd.f32 1.0, %v476_v28  ;;  %481 = vtanh.f32 %v336_v27 }
  0xae   : > { %v480_v35 = vpop.eup %479  ;;  %v359_v36 = vmul.f32 %v351_v30, %v295_v29  ;;  %v348_v39 = vadd.f32 1.0, %v478_v32  ;;  %483 = vtanh.f32 %v338_v31 }
  0xaf   : > { %v361_v42 = vmul.f32 %v353_v34, %v297_v33  ;;  %v350_v43 = vadd.f32 1.0, %v480_v35 }
  0xb0   : > { %v367_v45 = vpack.c.bf16 %v359_v36, %v359_v36  ;;  %v356_v46 = vmul.f32 %v348_v39, %v292_v38 }
  0xb1   : > { %v369_v47 = vpack.c.bf16 %v361_v42, %v361_v42  ;;  %v358_v48 = vmul.f32 %v350_v43, %v294_v37 }
  0xb2   : > { %376 = vst.msk [vmem:[%s581_s7 + $0x10] sm:$0xf] %vm371_vm2, %v367_v45  ;;  %v364_v40 = vpack.c.bf16 %v356_v46, %v356_v46 }
  0xb3   : > { %v482_v49 = vpop.eup %481  ;;  %378 = vst.msk [vmem:[%s581_s7 + $0x18] sm:$0xf] %vm371_vm2, %v369_v47  ;;  %v366_v41 = vpack.c.bf16 %v358_v48, %v358_v48 }
  0xb4   : > { %v484_v50 = vpop.eup %483  ;;  %373 = vst.msk [vmem:[%s581_s7 + $0x4] sm:$0xf] %vm371_vm2, %v364_v40  ;;  %v352_v44 = vadd.f32 1.0, %v482_v49 }
  0xb5   : > { %375 = vst.msk [vmem:[%s581_s7 + $0xc] sm:$0xf] %vm371_vm2, %v366_v41  ;;  %v354_v53 = vadd.f32 1.0, %v484_v50 }
  0xb6   : > { %v360_v54 = vmul.f32 %v352_v44, %v296_v51 }
  0xb7   : > { %v362_v55 = vmul.f32 %v354_v53, %v298_v52 }
  0xb8   : > { %v368_v56 = vpack.c.bf16 %v360_v54, %v360_v54 }
  0xb9   : > { %v370_v57 = vpack.c.bf16 %v362_v55, %v362_v55 }
  0xba   : > { %377 = vst.msk [vmem:[%s581_s7 + $0x14] sm:$0xf] %vm371_vm2, %v368_v56 }
  0xbb   : > { %379 = vst.msk [vmem:[%s581_s7 + $0x1c] sm:$0xf] %vm371_vm2, %v370_v57 }
  0xbc PF: > { %s14_s15 = sadd.s32 1, %s491_s15  }
  0xbd   : > { %p11_p4 = scmp.ge.s32.totalorder %s14_s15, 4  }
  0xbf   :  { %13 = sbr.rel (!%p11_p4) target bundleno = 1 (0x1), region = 66 }

// kernel: conformer3_forward.7
= control target key start
LH: loop header
LB: loop body
LE: loop exit
PB: predicated region body
PF: predicated region fallthrough
CT: control target
= control target key end

     0   :  { %s1832_s24 = smov 0   ;;  %s1834_s25 = smov 0   ;;  %s2330_s0 = inlined_call_operand.vmem [shape: bf16[2,72,32], index: 0, kind: input, shape index: {}]   ;;  %s2331_s1 = inlined_call_operand.vmem [shape: bf16[2,64,32], index: 1, kind: input, shape index: {}]   ;;  %s2332_s2 = inlined_call_operand.vmem [shape: bf16[32,32], index: 2, kind: input, shape index: {}]   ;;  %s2333_s3 = inlined_call_operand.vmem [shape: bf16[32,32], index: 3, kind: input, shape index: {}]   ;;  %s2334_s4 = inlined_call_operand.vmem [shape: bf16[32,32], index: 4, kind: input, shape index: {}]   ;;  %s2335_s5 = inlined_call_operand.vmem [shape: f32[1,32], index: 5, kind: input, shape index: {}]   ;;  %s2336_s6 = inlined_call_operand.vmem [shape: f32[1,32], index: 6, kind: input, shape index: {}]   ;;  %s2337_s7 = inlined_call_operand.vmem [shape: bf16[2,72,32], index: 7, kind: output, shape index: {}]  }
   0x1   :  { %s1836_s26 = smov 0  }
   0x2 LB: > { %s29_s27 = sadd.s32 1, %s1782_s25  ;;  %p1514_p0 = scmp.ge.s32.totalorder %s1786_s26, 1  ;;  %s1786_s26 = sphi %s1836_s26, %s17_s26   ;;  %s1782_s25 = sphi %s1834_s25, %s2339_s25   ;;  %s1778_s24 = sphi %s1832_s24, %s2338_s24  }
   0x3   : > { %p31_p1 = scmp.ge.s32.totalorder %s29_s27, 2  ;;  %p266_p2 = scmp.lt.s32.totalorder %s1786_s26, 3 }
   0x5   : > { %s2341_s27 = smov (%p31_p1, %s29_s27), 0  ;;  %p267_p3 = pnand %p1514_p0, %p266_p2 }
   0x6   : > { %p307_p4 = scmp.lt.s32.totalorder (!%p267_p3), %s1778_s24, 1 }
   0x7   : > { %270 = sbr.rel (%p267_p3) target bundleno = 1287 (0x507), region = 48 }
   0xc   : > { %v1628_v0 = vld [vmem:[%s2333_s3 + $0x8] sm:$0xff]  ;;  %v1627_v1 = vld [vmem:[%s2333_s3] sm:$0xff]  ;;  %s2343_s24 = smov (!%p307_p4, %s1778_s24), 1  ;;  %vm380_vm0 = vcmask 261120   ;;  %vm447_vm1 = vcmask 257024   ;;  %vm721_vm2 = vcmask 523264  }
   0xd   : > { %1654 = vmatpush.bf16.msra.mxu2 %v1628_v0  ;;  %548 = vmatpush.bf16.msra.mxu1 %v1628_v0  ;;  %s1616_s9 = sshll.u32 %s2343_s24, 5  ;;  %s1656_s13 = smul.u32 36, %s2343_s24  ;;  %v1622_v3 = vld [vmem:[%s2332_s2 + $0x8] sm:$0xff]  ;;  %v1621_v5 = vld [vmem:[%s2332_s2] sm:$0xff]  ;;  %vm457_vm3 = vcmask 7168  }
   0xe   : > { %s320_s12 = scalar_lea.vmem %s2331_s1, %s1616_s9  ;;  %402 = vmatpush.bf16.msra.mxu0 %v1622_v3 }
   0xf   : > { %v1862_v2 = vld [vmem:[%s320_s12 + $0x8] sm:$0xff]  ;;  %v1870_v4 = vld [vmem:[%s320_s12] sm:$0xff]  ;;  %s1877_s18 = scalar_lea.vmem %s2330_s0, %s1656_s13  ;;  %v1886_v7 = vld [vmem:[%s320_s12 + $0x10] sm:$0xff] }
  0x10   : > { %v1617_v6 = vld [vmem:[%s1877_s18] sm:$0xff]  ;;  %v1618_v8 = vld [vmem:[%s1877_s18 + $0x8] sm:$0xff]  ;;  %v1892_v9 = vld [vmem:[%s320_s12 + $0x18] sm:$0xff]  ;;  %s2266_s12 = scalar_lea.vmem %s2337_s7, %s1656_s13 }
  0x11   : > { %1655 = vmatpush.bf16.msra.mxu2 %v1627_v1  ;;  %549 = vmatpush.bf16.msra.mxu1 %v1627_v1  ;;  %v1619_v10 = vld [vmem:[%s1877_s18 + $0x10] sm:$0xff]  ;;  %v1620_v11 = vld [vmem:[%s1877_s18 + $0x18] sm:$0xff]  ;;  %v340_v49 = vld [vmem:[%s1877_s18 + $0x20] sm:$0xf] }
  0x12   : > { %403 = vmatpush.bf16.msra.mxu0 %v1621_v5  ;;  %v362_v51 = vunpack.c.l.b16 %v340_v49 }
  0x14   : > { %1573 = vmatmul.msk.bf16.vlgmr.msra.gmra.mxu2 %vm380_vm0, %v1862_v2  ;;  %1572 = vmatmul.msk.bf16.vlgmr.msra.gmra.mxu1 %vm380_vm0, %v1870_v4  ;;  %v367_v53 = vpack.c.b16 %v362_v51, %v362_v51 }
  0x15   : > { %1543 = vmatmul.msk.bf16.vlgmr.msra.gmra.mxu0 %vm380_vm0, %v1617_v6 }
  0x24   : > { %1574 = vmatmul.msk.bf16.gmra.mxu2 %vm380_vm0, %v1886_v7 }
  0x25   : > { %1544 = vmatmul.msk.bf16.gmra.mxu0 %vm380_vm0, %v1618_v8  ;;  %v1630_v8 = vld [vmem:[%s2334_s4 + $0x8] sm:$0xff] }
  0x26   : > { %593 = vmatpush.bf16.msrb.mxu2 %v1630_v8 }
  0x34   : > { %1575 = vmatmul.msk.bf16.gmra.mxu2 %vm380_vm0, %v1892_v9 }
  0x35   : > { %1545 = vmatmul.msk.bf16.gmra.mxu0 %vm380_vm0, %v1619_v10 }
  0x45   : > { %1546 = vmatmul.msk.bf16.gmra.mxu0 %vm380_vm0, %v1620_v11  ;;  %v1629_v11 = vld [vmem:[%s2334_s4] sm:$0xff] }
  0x46   : > { %594 = vmatpush.bf16.msrb.mxu2 %v1629_v11 }
  0x49   : > { %1584 = vmatmul.msk.bf16.vlgmr.msrb.gmra.mxu2 %vm380_vm0, %v1870_v4 }
  0x55   : > { %1547 = vmatmul.msk.bf16.gmra.mxu0 %vm380_vm0, %v367_v53 }
  0x59   : > { %1585 = vmatmul.msk.bf16.gmra.mxu2 %vm380_vm0, %v1862_v2 }
  0x69   : > { %1586 = vmatmul.msk.bf16.gmra.mxu2 %vm380_vm0, %v1886_v7 }
  0x79   : > { %1587 = vmatmul.msk.bf16.gmra.mxu2 %vm380_vm0, %v1892_v9 }
  0x91   : > { %v551_v36 = vpop.f32.mrf.mxu1 }
  0x92   : > { %v405_v14 = vpop.f32.mrf.mxu0 }
  0x93   : > { %v429_v15 = vmul.f32 0.17677669, %v405_v14 }
  0x95   : > { %v438_v16 = vpack.c.bf16 %v429_v15, %v429_v15 }
  0x97   : > { %v556_v12 = vpop.f32.mrf.mxu2  ;;  %448 = vst.msk [vmem:[#allocation2] sm:$0xf] %vm447_vm1, %v438_v16 }
  0x99   : > { %v553_v41 = vpop.f32.mrf.mxu1 }
  0x9a   : > { %v407_v18 = vpop.f32.mrf.mxu0  ;;  %v625_v44 = vpack.c.bf16 %v553_v41, %v551_v36 }
  0x9b   : > { %v430_v19 = vmul.f32 0.17677669, %v407_v18  ;;  %v1788_v18 = vmov -1e+30  }
  0x9c   : > { %v668_v45 = vsel %vm380_vm0, %v625_v44, 0  ;;  %458 = vst.msk [vmem:[#allocation3] sm:$0xff] %vm457_vm3, %v1788_v18 }
  0x9d   : > { %v439_v20 = vpack.c.bf16 %v430_v19, %v430_v19  ;;  %459 = vst.msk [vmem:[#allocation3 + $0x8] sm:$0xff] %vm457_vm3, %v1788_v18 }
  0x9e   : > { %460 = vst.msk [vmem:[#allocation3 + $0x10] sm:$0xff] %vm457_vm3, %v1788_v18 }
  0x9f   : > { %v558_v13 = vpop.f32.mrf.mxu2  ;;  %449 = vst.msk [vmem:[#allocation2 + $0x4] sm:$0xf] %vm447_vm1, %v439_v20 }
  0xa0   : > { %v626_v38 = vpack.c.bf16 %v558_v13, %v556_v12  ;;  %461 = vst.msk [vmem:[#allocation3 + $0x18] sm:$0xff] %vm457_vm3, %v1788_v18 }
  0xa1   : > { %462 = vst.msk [vmem:[#allocation3 + $0x20] sm:$0xff] %vm457_vm3, %v1788_v18 }
  0xa2   : > { %v410_v22 = vpop.f32.mrf.mxu0  ;;  %v671_v39 = vsel %vm380_vm0, %v626_v38, 0  ;;  %463 = vst.msk [vmem:[#allocation3 + $0x28] sm:$0xff] %vm457_vm3, %v1788_v18 }
  0xa3   : > { %v431_v23 = vmul.f32 0.17677669, %v410_v22  ;;  %464 = vst.msk [vmem:[#allocation3 + $0x30] sm:$0xff] %vm457_vm3, %v1788_v18  ;;  %v1993_v7 = vld [vmem:[#allocation3] sm:$0xff] }
  0xa4   : > { %465 = vst.msk [vmem:[#allocation3 + $0x38] sm:$0xff] %vm457_vm3, %v1788_v18 }
  0xa5   : > { %v440_v24 = vpack.c.bf16 %v431_v23, %v431_v23  ;;  %466 = vst.msk [vmem:[#allocation3 + $0x40] sm:$0xff] %vm457_vm3, %v1788_v18  ;;  %v1789_v23 = vmov 0  }
  0xa6   : > { %v1631_v50 = vld [vmem:[#allocation2] sm:$0xff]  ;;  %1685 = vset.pattern.permute.xlu0 %v1789_v23  ;;  %1686 = vset.pattern.permute.xlu1 %v1789_v23 }
  0xa7   : > { %v561_v17 = vpop.f32.mrf.mxu2  ;;  %450 = vst.msk [vmem:[#allocation2 + $0x8] sm:$0xf] %vm447_vm1, %v440_v24  ;;  %1687 = vset.pattern.permute.xlu2 %v1789_v23  ;;  %v1790_v24 = vmov 0.0  }
  0xa8   : > { %477 = vst.msk [vmem:[#allocation5 + $0x8] sm:$0xff] %vm380_vm0, %v1790_v24 }
  0xa9   : > { %467 = vst.msk [vmem:[#allocation4] sm:$0xff] %vm457_vm3, %v1790_v24 }
  0xaa   : > { %v412_v26 = vpop.f32.mrf.mxu0  ;;  %468 = vst.msk [vmem:[#allocation4 + $0x8] sm:$0xff] %vm457_vm3, %v1790_v24  ;;  %v718_v49 = vld [vmem:[#allocation3 + $0x30] sm:$0xff] }
  0xab   : > { %v432_v27 = vmul.f32 0.17677669, %v412_v26  ;;  %469 = vst.msk [vmem:[#allocation4 + $0x10] sm:$0xff] %vm457_vm3, %v1790_v24 }
  0xac   : > { %470 = vst.msk [vmem:[#allocation4 + $0x18] sm:$0xff] %vm457_vm3, %v1790_v24 }
  0xad   : > { %v441_v28 = vpack.c.bf16 %v432_v27, %v432_v27  ;;  %471 = vst.msk [vmem:[#allocation4 + $0x20] sm:$0xff] %vm457_vm3, %v1790_v24  ;;  %v713_v27 = vld [vmem:[#allocation3 + $0x8] sm:$0xff] }
  0xae   : > { %472 = vst.msk [vmem:[#allocation4 + $0x28] sm:$0xff] %vm457_vm3, %v1790_v24 }
  0xaf   : > { %v563_v21 = vpop.f32.mrf.mxu2  ;;  %451 = vst.msk [vmem:[#allocation2 + $0xc] sm:$0xf] %vm447_vm1, %v441_v28 }
  0xb0   : > { %v627_v35 = vpack.c.bf16 %v563_v21, %v561_v17  ;;  %473 = vst.msk [vmem:[#allocation4 + $0x30] sm:$0xff] %vm457_vm3, %v1790_v24 }
  0xb1   : > { %474 = vst.msk [vmem:[#allocation4 + $0x38] sm:$0xff] %vm457_vm3, %v1790_v24 }
  0xb2   : > { %v415_v32 = vpop.f32.mrf.mxu0  ;;  %v674_v37 = vsel %vm380_vm0, %v627_v35, 0  ;;  %475 = vst.msk [vmem:[#allocation4 + $0x40] sm:$0xff] %vm457_vm3, %v1790_v24 }
  0xb3   : > { %v433_v33 = vmul.f32 0.17677669, %v415_v32  ;;  %476 = vst.msk [vmem:[#allocation5] sm:$0xff] %vm380_vm0, %v1790_v24 }
  0xb4   : > { %478 = vst.msk [vmem:[#allocation5 + $0x10] sm:$0xff] %vm380_vm0, %v1790_v24 }
  0xb5   : > { %v442_v34 = vpack.c.bf16 %v433_v33, %v433_v33  ;;  %479 = vst.msk [vmem:[#allocation5 + $0x18] sm:$0xff] %vm380_vm0, %v1790_v24 }
  0xb6   : > { %v1632_v56 = vld [vmem:[#allocation2 + $0x8] sm:$0xff]  ;;  %480 = vst.msk [vmem:[#allocation5 + $0x20] sm:$0xff] %vm380_vm0, %v1790_v24 }
  0xb7   : > { %v566_v25 = vpop.f32.mrf.mxu2  ;;  %452 = vst.msk [vmem:[#allocation2 + $0x10] sm:$0xf] %vm447_vm1, %v442_v34  ;;  %v715_v34 = vld [vmem:[#allocation3 + $0x18] sm:$0xff] }
  0xb8   : > { %481 = vst.msk [vmem:[#allocation5 + $0x28] sm:$0xff] %vm380_vm0, %v1790_v24 }
  0xb9   : > { %482 = vst.msk [vmem:[#allocation5 + $0x30] sm:$0xff] %vm380_vm0, %v1790_v24 }
  0xba   : > { %v417_v40 = vpop.f32.mrf.mxu0  ;;  %483 = vst.msk [vmem:[#allocation5 + $0x38] sm:$0xff] %vm380_vm0, %v1790_v24 }
  0xbb   : > { %v434_v42 = vmul.f32 0.17677669, %v417_v40  ;;  %484 = vst.msk [vmem:[#allocation5 + $0x40] sm:$0xff] %vm380_vm0, %v1790_v24 }
  0xbd   : > { %v443_v43 = vpack.c.bf16 %v434_v42, %v434_v42 }
  0xbf   : > { %v568_v29 = vpop.f32.mrf.mxu2  ;;  %453 = vst.msk [vmem:[#allocation2 + $0x14] sm:$0xf] %vm447_vm1, %v443_v43 }
  0xc0   : > { %v628_v30 = vpack.c.bf16 %v568_v29, %v566_v25 }
  0xc2   : > { %v677_v31 = vsel %vm380_vm0, %v628_v30, 0  ;;  %v420_v46 = vpop.f32.mrf.mxu0  ;;  %v2004_v30 = vld [vmem:[#allocation3 + $0x10] sm:$0xff] }
  0xc3   : > { %683 = vmatpush.bf16.xpose.msra.mxu3 %v677_v31  ;;  %v435_v47 = vmul.f32 0.17677669, %v420_v46 }
  0xc5   : > { %v444_v48 = vpack.c.bf16 %v435_v47, %v435_v47 }
  0xc6   : > { %v1633_v57 = vld [vmem:[#allocation2 + $0x10] sm:$0xff] }
  0xc7   : > { %454 = vst.msk [vmem:[#allocation2 + $0x18] sm:$0xf] %vm447_vm1, %v444_v48 }
  0xca   : > { %v422_v52 = vpop.f32.mrf.mxu0 }
  0xcb   : > { %684 = vmatpush.bf16.xpose.msra.mxu3 %v674_v37  ;;  %v436_v54 = vmul.f32 0.17677669, %v422_v52 }
  0xcc   : > { %v596_v42 = vpop.f32.mrf.mxu2 }
  0xcd   : > { %v445_v55 = vpack.c.bf16 %v436_v54, %v436_v54  ;;  %v2029_v54 = vld [vmem:[#allocation3 + $0x38] sm:$0xff] }
  0xcf   : > { %455 = vst.msk [vmem:[#allocation2 + $0x1c] sm:$0xf] %vm447_vm1, %v445_v55 }
  0xd2   : > { %v425_v59 = vpop.f32.mrf.mxu0 }
  0xd3   : > { %685 = vmatpush.bf16.xpose.msra.mxu3 %v671_v39  ;;  %v437_v60 = vmul.f32 0.17677669, %v425_v59  ;;  %v2017_v39 = vld [vmem:[#allocation3 + $0x20] sm:$0xff] }
  0xd4   : > { %v598_v48 = vpop.f32.mrf.mxu2 }
  0xd5   : > { %v446_v61 = vpack.c.bf16 %v437_v60, %v437_v60  ;;  %v989_v23 = vpack.c.bf16 %v598_v48, %v596_v42 }
  0xd6   : > { %v1634_v58 = vld [vmem:[#allocation2 + $0x18] sm:$0xff] }
  0xd7   : > { %456 = vst.msk [vmem:[#allocation2 + $0x20] sm:$0xf] %vm447_vm1, %v446_v61 }
  0xda   : > { %v427_v0 = vpop.f32.mrf.mxu0 }
  0xdb   : > { %686 = vmatpush.bf16.xpose.msra.mxu3 %v668_v45  ;;  %v717_v45 = vld [vmem:[#allocation3 + $0x28] sm:$0xff] }
  0xdc   : > { %v601_v52 = vpop.f32.mrf.mxu2 }
  0xde   : > { %v624_v3 = vld [vmem:[#allocation2 + $0x20] sm:$0xf] }
  0xdf   : > { %v646_v6 = vunpack.c.l.b16 %v624_v3 }
  0xe1   : > { %v651_v10 = vpack.c.b16 %v646_v6, %v646_v6 }
  0xe2   : > { %1604 = vmatmul.msk.bf16.vlgmr.msra.gmra.mxu3 %vm380_vm0, %v1631_v50 }
  0xf2   : > { %1605 = vmatmul.msk.bf16.gmra.mxu3 %vm380_vm0, %v1632_v56 }
 0x102   : > { %1606 = vmatmul.msk.bf16.gmra.mxu3 %vm380_vm0, %v1633_v57 }
 0x112   : > { %1607 = vmatmul.msk.bf16.gmra.mxu3 %vm380_vm0, %v1634_v58  ;;  %v603_v58 = vpop.f32.mrf.mxu2 }
 0x122   : > { %1608 = vmatmul.msk.bf16.gmra.mxu3 %vm380_vm0, %v651_v10 }
 0x165   : > { %v1918_v62 = vpop.f32.mrf.mxu3 }
 0x166   : > { %v722_v63 = vsel %vm721_vm2, %v1918_v62, -inf }
 0x167   : > { %723 = vmax.xlane.f32.xlu0 %v722_v63  ;;  %v606_v63 = vpop.f32.mrf.mxu2 }
 0x16d   : > { %v1923_v1 = vpop.f32.mrf.mxu3 }
 0x16e   : > { %v725_v5 = vsel %vm721_vm2, %v1923_v1, -inf }
 0x16f   : > { %726 = vmax.xlane.f32.xlu0 %v725_v5  ;;  %v608_v6 = vpop.f32.mrf.mxu2 }
 0x175   : > { %v1934_v12 = vpop.f32.mrf.mxu3 }
 0x176   : > { %v728_v13 = vsel %vm721_vm2, %v1934_v12, -inf }
 0x177   : > { %729 = vmax.xlane.f32.xlu1 %v728_v13  ;;  %v611_v8 = vpop.f32.mrf.mxu2 }
 0x17d   : > { %v1940_v14 = vpop.f32.mrf.mxu3 }
 0x17e   : > { %v731_v15 = vsel %vm721_vm2, %v1940_v14, -inf }
 0x17f   : > { %732 = vmax.xlane.f32.xlu1 %v731_v15  ;;  %v613_v11 = vpop.f32.mrf.mxu2 }
 0x180   : > { %v992_v13 = vpack.c.bf16 %v613_v11, %v611_v8 }
 0x182   : > { %1012 = vmatpush.bf16.msrb.mxu1 %v992_v13 }
 0x185   : > { %v1944_v16 = vpop.f32.mrf.mxu3 }
 0x186   : > { %v734_v17 = vsel %vm721_vm2, %v1944_v16, -inf }
 0x187   : > { %735 = vmax.xlane.f32.xlu2 %v734_v17  ;;  %v991_v17 = vpack.c.bf16 %v608_v6, %v606_v63 }
 0x189   : > { %1013 = vmatpush.bf16.msrb.mxu1 %v991_v17 }
 0x18d   : > { %v1954_v4 = vpop.f32.mrf.mxu3 }
 0x18e   : > { %v737_v19 = vsel %vm721_vm2, %v1954_v4, -inf }
 0x18f   : > { %738 = vmax.xlane.f32.xlu2 %v737_v19 }
 0x195   : > { %v1963_v2 = vpop.f32.mrf.mxu3 }
 0x196   : > { %v740_v20 = vsel %vm721_vm2, %v1963_v2, -inf }
 0x197   : > { %741 = vmax.xlane.f32.xlu2 %v740_v20  ;;  %v990_v20 = vpack.c.bf16 %v603_v58, %v601_v52 }
 0x199   : > { %1014 = vmatpush.bf16.msrb.mxu1 %v990_v20 }
 0x19d   : > { %v1969_v21 = vpop.f32.mrf.mxu3  ;;  %1015 = vmatpush.bf16.msrb.mxu1 %v989_v23 }
 0x19e   : > { %v743_v22 = vsel %vm721_vm2, %v1969_v21, -inf }
 0x19f   : > { %744 = vmax.xlane.f32.xlu2 %v743_v22 }
 0x1a5   : > { %v2015_v38 = vpop.f32.mrf.mxu3 }
 0x1a6   : > { %v746_v3 = vsel %vm721_vm2, %v2015_v38, -inf }
 0x1ad   : > { %v710_v44 = vpop.f32.mrf.mxu3 }
 0x1da   : > { %v724_v9 = vpop.xlane.xlu0 %723 }
 0x1db   : > { %v1996_v25 = vmax.f32 %v1993_v7, %v724_v9 }
 0x1dd   : > { %v758_v26 = vsub.f32 %v1993_v7, %v1996_v25  ;;  %1059 = vst.msk [vmem:[#allocation3] sm:$0xff] %vm457_vm3, %v1996_v25  ;;  %787 = vperm.xlu0 %1685, %v1996_v25  }
 0x1df   : > { %v767_v10 = vmul.f32 1.442695, %v758_v26 }
 0x1e2   : > { %v727_v28 = vpop.xlane.xlu0 %726 }
 0x1e3   : > { %v750_v29 = vmax.f32 %v713_v27, %v727_v28 }
 0x1e5   : > { %1060 = vst.msk [vmem:[#allocation3 + $0x8] sm:$0xff] %vm457_vm3, %v750_v29  ;;  %792 = vperm.xlu1 %1686, %v750_v29   ;;  %v759_v53 = vsub.f32 %v713_v27, %v750_v29 }
 0x1e7   : > { %v769_v55 = vmul.f32 1.442695, %v759_v53 }
 0x1e9   : > { %1690 = vpow2.f32 %v769_v55 }
 0x1ea   : > { %v730_v31 = vpop.xlane.xlu1 %729 }
 0x1eb   : > { %v2007_v32 = vmax.f32 %v2004_v30, %v730_v31 }
 0x1ed   : > { %v760_v33 = vsub.f32 %v2004_v30, %v2007_v32  ;;  %1061 = vst.msk [vmem:[#allocation3 + $0x10] sm:$0xff] %vm457_vm3, %v2007_v32  ;;  %797 = vperm.xlu2 %1687, %v2007_v32  }
 0x1ef   : > { %v2039_v0 = vpop.eup %1690  ;;  %v771_v11 = vmul.f32 1.442695, %v760_v33 }
 0x1f2   : > { %v733_v35 = vpop.xlane.xlu1 %732 }
 0x1f3   : > { %v752_v36 = vmax.f32 %v715_v34, %v733_v35 }
 0x1f5   : > { %v761_v37 = vsub.f32 %v715_v34, %v752_v36  ;;  %1062 = vst.msk [vmem:[#allocation3 + $0x18] sm:$0xff] %vm457_vm3, %v752_v36  ;;  %802 = vperm.xlu1 %1686, %v752_v36  }
 0x1f7   : > { %v773_v15 = vmul.f32 1.442695, %v761_v37 }
 0x1fa   : > { %v736_v40 = vpop.xlane.xlu2 %735 }
 0x1fb   : > { %v2020_v41 = vmax.f32 %v2017_v39, %v736_v40 }
 0x1fd   : > { %v762_v43 = vsub.f32 %v2017_v39, %v2020_v41  ;;  %1063 = vst.msk [vmem:[#allocation3 + $0x20] sm:$0xff] %vm457_vm3, %v2020_v41  ;;  %807 = vperm.xlu0 %1685, %v2020_v41  }
 0x1ff   : > { %v775_v20 = vmul.f32 1.442695, %v762_v43 }
 0x202   : > { %v739_v46 = vpop.xlane.xlu2 %738 }
 0x203   : > { %v754_v47 = vmax.f32 %v717_v45, %v739_v46 }
 0x205   : > { %1064 = vst.msk [vmem:[#allocation3 + $0x28] sm:$0xff] %vm457_vm3, %v754_v47  ;;  %812 = vperm.xlu2 %1687, %v754_v47   ;;  %v763_v59 = vsub.f32 %v717_v45, %v754_v47 }
 0x207   : > { %v777_v61 = vmul.f32 1.442695, %v763_v59 }
 0x209   : > { %1692 = vpow2.f32 %v777_v61 }
 0x20a   : > { %v742_v50 = vpop.xlane.xlu2 %741  ;;  %1694 = vpow2.f32 %v767_v10  ;;  %v720_v10 = vld [vmem:[#allocation3 + $0x40] sm:$0xff] }
 0x20b   : > { %v755_v51 = vmax.f32 %v718_v49, %v742_v50  ;;  %1696 = vpow2.f32 %v773_v15 }
 0x20d   : > { %1065 = vst.msk [vmem:[#allocation3 + $0x30] sm:$0xff] %vm457_vm3, %v755_v51  ;;  %817 = vperm.xlu0 %1685, %v755_v51   ;;  %v764_v19 = vsub.f32 %v718_v49, %v755_v51 }
 0x20f   : > { %v2044_v5 = vpop.eup %1692  ;;  %v779_v22 = vmul.f32 1.442695, %v764_v19 }
 0x210   : > { %v2047_v18 = vpop.eup %1694 }
 0x211   : > { %v2050_v24 = vpop.eup %1696  ;;  %1698 = vpow2.f32 %v779_v22 }
 0x212   : > { %v745_v56 = vpop.xlane.xlu2 %744 }
 0x213   : > { %v2032_v57 = vmax.f32 %v2029_v54, %v745_v56 }
 0x215   : > { %v765_v60 = vsub.f32 %v2029_v54, %v2032_v57  ;;  %1066 = vst.msk [vmem:[#allocation3 + $0x38] sm:$0xff] %vm457_vm3, %v2032_v57  ;;  %822 = vperm.xlu2 %1687, %v2032_v57  }
 0x217   : > { %v2053_v7 = vpop.eup %1698  ;;  %v781_v32 = vmul.f32 1.442695, %v765_v60 }
 0x21d   : > { %937 = vperm.xlu2 %1687, %v2039_v0  }
 0x21f   : > { %747 = vmax.xlane.f32.xlu1 %v746_v3 }
 0x225   : > { %957 = vperm.xlu2 %1687, %v2044_v5  }
 0x238   : > { %932 = vperm.xlu1 %1686, %v2047_v18  }
 0x240   : > { %947 = vperm.xlu1 %1686, %v2050_v24  }
 0x247   : > { %v798_v31 = vpop.permute.xlu2 %797 }
 0x248   : > { %962 = vperm.xlu1 %1686, %v2053_v7   ;;  %v832_v34 = vsub.f32 %v1934_v12, %v798_v31 }
 0x24a   : > { %v843_v40 = vmul.f32 1.442695, %v832_v34 }
 0x24f   : > { %v788_v9 = vpop.permute.xlu0 %787 }
 0x250   : > { %v830_v25 = vsub.f32 %v1918_v62, %v788_v9 }
 0x252   : > { %v839_v26 = vmul.f32 1.442695, %v830_v25  ;;  %v921_v25 = vld [vmem:[#allocation5] sm:$0xff] }
 0x254   : > { %1700 = vpow2.f32 %v839_v26 }
 0x257   : > { %v793_v27 = vpop.permute.xlu1 %792 }
 0x258   : > { %v831_v28 = vsub.f32 %v1923_v1, %v793_v27  ;;  %v859_v27 = vld [vmem:[#allocation4 + $0x10] sm:$0xff] }
 0x25a   : > { %v841_v29 = vmul.f32 1.442695, %v831_v28  ;;  %v2059_v35 = vpop.eup %1700 }
 0x25b   : > { %v875_v39 = vsel %vm721_vm2, %v2059_v35, 0.0 }
 0x25c   : > { %1702 = vpow2.f32 %v841_v29 }
 0x25d   : > { %1704 = vpow2.f32 %v843_v40 }
 0x25f   : > { %v813_v46 = vpop.permute.xlu2 %812 }
 0x260   : > { %v835_v50 = vsub.f32 %v1954_v4, %v813_v46 }
 0x262   : > { %v2061_v36 = vpop.eup %1702  ;;  %v849_v52 = vmul.f32 1.442695, %v835_v50 }
 0x263   : > { %v984_v37 = vpack.c.bf16 %v2061_v36, %v2059_v35  ;;  %v1705_v44 = vpop.eup %1704  ;;  %v878_v54 = vsel %vm721_vm2, %v2061_v36, 0.0  ;;  %v922_v35 = vld [vmem:[#allocation5 + $0x8] sm:$0xff] }
 0x264   : > { %v881_v47 = vsel %vm721_vm2, %v1705_v44, 0.0 }
 0x265   : > { %1609 = vmatmul.msk.bf16.vlgmr.msrb.gmra.mxu1 %vm721_vm2, %v984_v37 }
 0x267   : > { %v803_v62 = vpop.permute.xlu1 %802 }
 0x268   : > { %v833_v1 = vsub.f32 %v1940_v14, %v803_v62  ;;  %v860_v62 = vld [vmem:[#allocation4 + $0x18] sm:$0xff] }
 0x26a   : > { %v845_v42 = vmul.f32 1.442695, %v833_v1 }
 0x26c   : > { %1706 = vpow2.f32 %v845_v42 }
 0x26f   : > { %v808_v45 = vpop.permute.xlu0 %807  ;;  %v823_v56 = vpop.permute.xlu2 %822 }
 0x270   : > { %v834_v12 = vsub.f32 %v1944_v16, %v808_v45  ;;  %v837_v63 = vsub.f32 %v1969_v21, %v823_v56 }
 0x272   : > { %v1707_v48 = vpop.eup %1706  ;;  %882 = vadd.xlane.f32.xlu1 %v881_v47  ;;  %v847_v51 = vmul.f32 1.442695, %v834_v12  ;;  %v853_v3 = vmul.f32 1.442695, %v837_v63  ;;  %v861_v47 = vld [vmem:[#allocation4 + $0x20] sm:$0xff] }
 0x273   : > { %v985_v49 = vpack.c.bf16 %v1707_v48, %v1705_v44  ;;  %v884_v14 = vsel %vm721_vm2, %v1707_v48, 0.0  ;;  %v869_v44 = vmul.f32 %v2050_v24, %v860_v62  ;;  %v858_v62 = vld [vmem:[#allocation4 + $0x8] sm:$0xff] }
 0x274   : > { %1708 = vpow2.f32 %v847_v51 }
 0x275   : > { %1610 = vmatmul.msk.bf16.gmra.mxu1 %vm721_vm2, %v985_v49  ;;  %1710 = vpow2.f32 %v849_v52  ;;  %v924_v52 = vld [vmem:[#allocation5 + $0x18] sm:$0xff] }
 0x277   : > { %v938_v37 = vpop.permute.xlu2 %937 }
 0x278   : > { %v976_v36 = vmul.f32 %v938_v37, %v922_v35  ;;  %v862_v35 = vld [vmem:[#allocation4 + $0x28] sm:$0xff] }
 0x279   : > { %v871_v37 = vmul.f32 %v2044_v5, %v862_v35 }
 0x27a   : > { %885 = vadd.xlane.f32.xlu1 %v884_v14  ;;  %v1709_v53 = vpop.eup %1708 }
 0x27b   : > { %v887_v58 = vsel %vm721_vm2, %v1709_v53, 0.0  ;;  %v1711_v59 = vpop.eup %1710 }
 0x27c   : > { %v986_v4 = vpack.c.bf16 %v1711_v59, %v1709_v53  ;;  %v890_v43 = vsel %vm721_vm2, %v1711_v59, 0.0 }
 0x27f   : > { %v818_v55 = vpop.permute.xlu0 %817  ;;  %v958_v63 = vpop.permute.xlu2 %957 }
 0x280   : > { %v836_v16 = vsub.f32 %v1963_v2, %v818_v55 }
 0x282   : > { %v851_v61 = vmul.f32 1.442695, %v836_v16  ;;  %888 = vadd.xlane.f32.xlu1 %v887_v58  ;;  %v863_v16 = vld [vmem:[#allocation4 + $0x30] sm:$0xff] }
 0x283   : > { %v872_v56 = vmul.f32 %v2053_v7, %v863_v16 }
 0x284   : > { %1712 = vpow2.f32 %v851_v61 }
 0x285   : > { %1611 = vmatmul.msk.bf16.gmra.mxu1 %vm721_vm2, %v986_v4  ;;  %1714 = vpow2.f32 %v853_v3  ;;  %v926_v4 = vld [vmem:[#allocation5 + $0x28] sm:$0xff] }
 0x286   : > { %1716 = vpow2.f32 %v771_v11 }
 0x28a   : > { %v1713_v6 = vpop.eup %1712 }
 0x28b   : > { %v893_v8 = vsel %vm721_vm2, %v1713_v6, 0.0  ;;  %v1715_v2 = vpop.eup %1714 }
 0x28c   : > { %894 = vadd.xlane.f32.xlu1 %v893_v8  ;;  %v987_v17 = vpack.c.bf16 %v1715_v2, %v1713_v6  ;;  %v1717_v22 = vpop.eup %1716  ;;  %v896_v57 = vsel %vm721_vm2, %v1715_v2, 0.0  ;;  %v980_v8 = vmul.f32 %v958_v63, %v926_v4  ;;  %v929_v4 = vld [vmem:[#allocation5 + $0x40] sm:$0xff] }
 0x28d   : > { %v868_v31 = vmul.f32 %v1717_v22, %v859_v27 }
 0x292   : > { %v748_v13 = vpop.xlane.xlu1 %747 }
 0x293   : > { %v757_v15 = vmax.f32 %v720_v10, %v748_v13  ;;  %v923_v13 = vld [vmem:[#allocation5 + $0x10] sm:$0xff] }
 0x295   : > { %v766_v19 = vsub.f32 %v720_v10, %v757_v15  ;;  %1067 = vst.msk [vmem:[#allocation3 + $0x40] sm:$0xff] %vm457_vm3, %v757_v15  ;;  %1612 = vmatmul.msk.bf16.gmra.mxu1 %vm721_vm2, %v987_v17  ;;  %827 = vperm.xlu0 %1685, %v757_v15   ;;  %v927_v15 = vld [vmem:[#allocation5 + $0x30] sm:$0xff] }
 0x297   : > { %v783_v21 = vmul.f32 1.442695, %v766_v19 }
 0x299   : > { %1718 = vpow2.f32 %v783_v21 }
 0x29a   : > { %1720 = vpow2.f32 %v775_v20 }
 0x29b   : > { %1722 = vpow2.f32 %v781_v32 }
 0x29d   : > { %942 = vperm.xlu0 %1685, %v1717_v22  }
 0x29f   : > { %v2085_v30 = vpop.eup %1718 }
 0x2a0   : > { %972 = vperm.xlu2 %1687, %v2085_v30   ;;  %v1721_v33 = vpop.eup %1720 }
 0x2a1   : > { %v2091_v23 = vpop.eup %1722  ;;  %v870_v49 = vmul.f32 %v1721_v33, %v861_v47 }
 0x2a5   : > { %952 = vperm.xlu0 %1685, %v1721_v33  }
 0x2aa   : > { %v933_v41 = vpop.permute.xlu1 %932 }
 0x2ab   : > { %v975_v26 = vmul.f32 %v933_v41, %v921_v25 }
 0x2ad   : > { %967 = vperm.xlu0 %1685, %v2091_v23  }
 0x2b2   : > { %v948_v9 = vpop.permute.xlu1 %947 }
 0x2b3   : > { %v978_v53 = vmul.f32 %v948_v9, %v924_v52 }
 0x2ba   : > { %v963_v60 = vpop.permute.xlu1 %962 }
 0x2bb   : > { %v981_v19 = vmul.f32 %v963_v60, %v927_v15 }
 0x2c9   : > { %876 = vadd.xlane.f32.xlu2 %v875_v39 }
 0x2d1   : > { %891 = vadd.xlane.f32.xlu2 %v890_v43 }
 0x2d7   : > { %879 = vadd.xlane.f32.xlu0 %v878_v54  ;;  %v928_v54 = vld [vmem:[#allocation5 + $0x38] sm:$0xff] }
 0x2d9   : > { %897 = vadd.xlane.f32.xlu2 %v896_v57 }
 0x2e2   : > { %v1017_v28 = vpop.f32.mrf.mxu1 }
 0x2e3   : > { %v1041_v29 = vadd.f32 %v1017_v28, %v975_v26  ;;  %v857_v28 = vld [vmem:[#allocation4] sm:$0xff] }
 0x2e5   : > { %1050 = vst.msk [vmem:[#allocation5] sm:$0xff] %vm380_vm0, %v1041_v29  ;;  %v883_v34 = vpop.xlane.xlu1 %882  ;;  %v866_v29 = vmul.f32 %v2047_v18, %v857_v28 }
 0x2e6   : > { %v904_v40 = vadd.f32 %v883_v34, %v868_v31 }
 0x2e8   : > { %914 = vst.msk [vmem:[#allocation4 + $0x10] sm:$0xff] %vm457_vm3, %v904_v40 }
 0x2ea   : > { %v1019_v1 = vpop.f32.mrf.mxu1 }
 0x2eb   : > { %v1042_v42 = vadd.f32 %v1019_v1, %v976_v36 }
 0x2ed   : > { %1051 = vst.msk [vmem:[#allocation5 + $0x8] sm:$0xff] %vm380_vm0, %v1042_v42  ;;  %v886_v45 = vpop.xlane.xlu1 %885  ;;  %v864_v42 = vld [vmem:[#allocation4 + $0x38] sm:$0xff] }
 0x2ee   : > { %v905_v12 = vadd.f32 %v886_v45, %v869_v44  ;;  %v867_v44 = vmul.f32 %v2039_v0, %v858_v62  ;;  %v873_v18 = vmul.f32 %v2091_v23, %v864_v42 }
 0x2ef   : > { %v1082_v46 = vld [vmem:[#allocation4 + $0x10] sm:$0xff] }
 0x2f0   : > { %915 = vst.msk [vmem:[#allocation4 + $0x18] sm:$0xff] %vm457_vm3, %v905_v12  ;;  %1724 = vrcp.f32 %v1082_v46 }
 0x2f2   : > { %v1022_v48 = vpop.f32.mrf.mxu1 }
 0x2f5   : > { %v889_v50 = vpop.xlane.xlu1 %888 }
 0x2f6   : > { %v1725_v51 = vpop.eup %1724  ;;  %v906_v14 = vadd.f32 %v889_v50, %v870_v49 }
 0x2f7   : > { %1110 = vperm.xlu2 %1687, %v1725_v51   ;;  %v1083_v46 = vld [vmem:[#allocation4 + $0x18] sm:$0xff] }
 0x2f8   : > { %916 = vst.msk [vmem:[#allocation4 + $0x20] sm:$0xff] %vm457_vm3, %v906_v14 }
 0x2fa   : > { %v1024_v24 = vpop.f32.mrf.mxu1  ;;  %v973_v27 = vpop.permute.xlu2 %972 }
 0x2fb   : > { %v1044_v55 = vadd.f32 %v1024_v24, %v978_v53  ;;  %v983_v63 = vmul.f32 %v973_v27, %v929_v4 }
 0x2fd   : > { %1053 = vst.msk [vmem:[#allocation5 + $0x18] sm:$0xff] %vm380_vm0, %v1044_v55 }
 0x2ff   : > { %v895_v58 = vpop.xlane.xlu1 %894  ;;  %v1084_v23 = vld [vmem:[#allocation4 + $0x20] sm:$0xff] }
 0x300   : > { %v908_v59 = vadd.f32 %v895_v58, %v872_v56  ;;  %v865_v56 = vld [vmem:[#allocation4 + $0x40] sm:$0xff] }
 0x301   : > { %v874_v58 = vmul.f32 %v2085_v30, %v865_v56 }
 0x302   : > { %918 = vst.msk [vmem:[#allocation4 + $0x30] sm:$0xff] %vm457_vm3, %v908_v59  ;;  %v1027_v61 = vpop.f32.mrf.mxu1 }
 0x307   : > { %v828_v3 = vpop.permute.xlu0 %827 }
 0x308   : > { %v838_v6 = vsub.f32 %v2015_v38, %v828_v3  ;;  %v925_v38 = vld [vmem:[#allocation5 + $0x20] sm:$0xff] }
 0x309   : > { %v1086_v52 = vld [vmem:[#allocation4 + $0x30] sm:$0xff] }
 0x30a   : > { %v855_v10 = vmul.f32 1.442695, %v838_v6  ;;  %v1029_v2 = vpop.f32.mrf.mxu1 }
 0x30b   : > { %v1046_v11 = vadd.f32 %v1029_v2, %v980_v8 }
 0x30c   : > { %1726 = vpow2.f32 %v855_v10 }
 0x30d   : > { %1055 = vst.msk [vmem:[#allocation5 + $0x28] sm:$0xff] %vm380_vm0, %v1046_v11 }
 0x30f   : > { %v943_v7 = vpop.permute.xlu0 %942 }
 0x310   : > { %v977_v17 = vmul.f32 %v943_v7, %v923_v13  ;;  %v1651_v13 = vld [vmem:[%s1877_s18 + $0x8] sm:$0xff]  }
 0x311   : > { %v1641_v7 = vunpack.c.l.bf16 %v1651_v13 }
 0x312   : > { %v1727_v21 = vpop.eup %1726  ;;  %v1043_v20 = vadd.f32 %v1022_v48, %v977_v17  ;;  %v1032_v22 = vpop.f32.mrf.mxu1  ;;  %v1636_v17 = vld [vmem:[%s1877_s18] sm:$0xff]  }
 0x313   : > { %v1047_v32 = vadd.f32 %v1032_v22, %v981_v19  ;;  %v899_v33 = vsel %vm721_vm2, %v1727_v21, 0.0  ;;  %v988_v39 = vpack.c.bf16 %v1727_v21, %v1727_v21  ;;  %v1637_v22 = vunpack.c.l.bf16 %v1636_v17 }
 0x314   : > { %1052 = vst.msk [vmem:[#allocation5 + $0x10] sm:$0xff] %vm380_vm0, %v1043_v20  ;;  %900 = vadd.xlane.f32.xlu0 %v899_v33  ;;  %v1652_v20 = vld [vmem:[%s1877_s18 + $0x10] sm:$0xff]  }
 0x315   : > { %1056 = vst.msk [vmem:[#allocation5 + $0x30] sm:$0xff] %vm380_vm0, %v1047_v32  ;;  %1613 = vmatmul.msk.bf16.gmra.mxu1 %vm721_vm2, %v988_v39  ;;  %v1076_v32 = vld [vmem:[#allocation5 + $0x28] sm:$0xff]  ;;  %v1071_v33 = vld [vmem:[#allocation5] sm:$0xff] }
 0x317   : > { %v953_v41 = vpop.permute.xlu0 %952 }
 0x318   : > { %v979_v43 = vmul.f32 %v953_v41, %v925_v38 }
 0x31a   : > { %v1045_v9 = vadd.f32 %v1027_v61, %v979_v43  ;;  %v1034_v25 = vpop.f32.mrf.mxu1 }
 0x31b   : > { %v1073_v30 = vld [vmem:[#allocation5 + $0x10] sm:$0xff] }
 0x31c   : > { %1054 = vst.msk [vmem:[#allocation5 + $0x20] sm:$0xff] %vm380_vm0, %v1045_v9  ;;  %v1646_v9 = vunpack.c.h.bf16 %v1652_v20  ;;  %v1077_v42 = vld [vmem:[#allocation5 + $0x30] sm:$0xff] }
 0x31f   : > { %v968_v57 = vpop.permute.xlu0 %967 }
 0x320   : > { %v982_v60 = vmul.f32 %v968_v57, %v928_v54 }
 0x322   : > { %v1048_v26 = vadd.f32 %v1034_v25, %v982_v60  ;;  %v1642_v25 = vunpack.c.h.bf16 %v1651_v13 }
 0x324   : > { %1057 = vst.msk [vmem:[#allocation5 + $0x38] sm:$0xff] %vm380_vm0, %v1048_v26  ;;  %v1074_v26 = vld [vmem:[#allocation5 + $0x18] sm:$0xff] }
 0x33c   : > { %v877_v31 = vpop.xlane.xlu2 %876 }
 0x33d   : > { %v902_v34 = vadd.f32 %v877_v31, %v866_v29 }
 0x33f   : > { %912 = vst.msk [vmem:[#allocation4] sm:$0xff] %vm457_vm3, %v902_v34  ;;  %v1653_v34 = vld [vmem:[%s1877_s18 + $0x18] sm:$0xff]  }
 0x344   : > { %v892_v40 = vpop.xlane.xlu2 %891 }
 0x345   : > { %v907_v36 = vadd.f32 %v892_v40, %v871_v37  ;;  %v1638_v37 = vunpack.c.h.bf16 %v1636_v17  ;;  %v1072_v40 = vld [vmem:[#allocation5 + $0x8] sm:$0xff] }
 0x346   : > { %v1080_v1 = vld [vmem:[#allocation4] sm:$0xff] }
 0x347   : > { %917 = vst.msk [vmem:[#allocation4 + $0x28] sm:$0xff] %vm457_vm3, %v907_v36  ;;  %1728 = vrcp.f32 %v1080_v1  ;;  %v1649_v1 = vunpack.c.l.bf16 %v1653_v34 }
 0x348   : > { %1730 = vrcp.f32 %v1083_v46 }
 0x34a   : > { %v880_v45 = vpop.xlane.xlu0 %879 }
 0x34b   : > { %v903_v12 = vadd.f32 %v880_v45, %v867_v44 }
 0x34c   : > { %v898_v47 = vpop.xlane.xlu2 %897 }
 0x34d   : > { %v1729_v48 = vpop.eup %1728  ;;  %913 = vst.msk [vmem:[#allocation4 + $0x8] sm:$0xff] %vm457_vm3, %v903_v12  ;;  %v909_v5 = vadd.f32 %v898_v47, %v873_v18 }
 0x34e   : > { %1100 = vperm.xlu1 %1686, %v1729_v48   ;;  %v1085_v49 = vld [vmem:[#allocation4 + $0x28] sm:$0xff]  ;;  %v1731_v50 = vpop.eup %1730  ;;  %v1645_v48 = vunpack.c.l.bf16 %v1652_v20 }
 0x34f   : > { %919 = vst.msk [vmem:[#allocation4 + $0x38] sm:$0xff] %vm457_vm3, %v909_v5  ;;  %1732 = vrcp.f32 %v1085_v49  ;;  %v1075_v5 = vld [vmem:[#allocation5 + $0x20] sm:$0xff] }
 0x354   : > { %v1081_v51 = vld [vmem:[#allocation4 + $0x8] sm:$0xff]  ;;  %v1111_v11 = vpop.permute.xlu2 %1110 }
 0x355   : > { %v1733_v0 = vpop.eup %1732  ;;  %1734 = vrcp.f32 %v1081_v51  ;;  %v1145_v15 = vmul.f32 %v1111_v11, %v1073_v30 }
 0x356   : > { %1125 = vperm.xlu2 %1687, %v1733_v0   ;;  %1115 = vperm.xlu1 %1686, %v1731_v50   ;;  %1736 = vrcp.f32 %v1086_v52  ;;  %v1087_v24 = vld [vmem:[#allocation4 + $0x38] sm:$0xff]  ;;  %v1650_v0 = vunpack.c.h.bf16 %v1653_v34 }
 0x357   : > { %1738 = vrcp.f32 %v1084_v23  ;;  %v2130_v19 = vadd.f32 %v1641_v7, %v1145_v15  ;;  %v1078_v23 = vld [vmem:[#allocation5 + $0x38] sm:$0xff] }
 0x358   : > { %1740 = vrcp.f32 %v1087_v24 }
 0x359   : > { %v1185_v43 = vsel %vm380_vm0, %v2130_v19, 0.0 }
 0x35b   : > { %v1735_v14 = vpop.eup %1734 }
 0x35c   : > { %1105 = vperm.xlu0 %1685, %v1735_v14   ;;  %v1737_v53 = vpop.eup %1736 }
 0x35d   : > { %v1739_v55 = vpop.eup %1738 }
 0x35e   : > { %1130 = vperm.xlu1 %1686, %v1737_v53   ;;  %v1741_v16 = vpop.eup %1740 }
 0x364   : > { %1120 = vperm.xlu0 %1685, %v1739_v55  }
 0x36c   : > { %1135 = vperm.xlu0 %1685, %v1741_v16   ;;  %v1160_v16 = vld [vmem:[%s1877_s18 + $0x20] sm:$0xf] }
 0x36d   : > { %v1169_v56 = vunpack.c.l.bf16 %v1160_v16 }
 0x387   : > { %v901_v59 = vpop.xlane.xlu0 %900 }
 0x388   : > { %v910_v61 = vadd.f32 %v901_v59, %v874_v58 }
 0x38a   : > { %920 = vst.msk [vmem:[#allocation4 + $0x40] sm:$0xff] %vm457_vm3, %v910_v61 }
 0x391   : > { %v1088_v3 = vld [vmem:[#allocation4 + $0x40] sm:$0xff] }
 0x392   : > { %v1037_v6 = vpop.f32.mrf.mxu1  ;;  %1742 = vrcp.f32 %v1088_v3  ;;  %v1791_v3 = vmov 32.0  }
 0x393   : > { %v1049_v8 = vadd.f32 %v1037_v6, %v983_v63  ;;  %1744 = vrcp.f32 %v1791_v3 }
 0x395   : > { %1058 = vst.msk [vmem:[#allocation5 + $0x40] sm:$0xff] %vm380_vm0, %v1049_v8 }
 0x398   : > { %v1743_v10 = vpop.eup %1742 }
 0x399   : > { %1140 = vperm.xlu2 %1687, %v1743_v10   ;;  %v1745_v6 = vpop.eup %1744 }
 0x39a   : > { %v1039_v2 = vpop.f32.mrf.mxu1  ;;  %v1207_v8 = vmul.f32 32.0, %v1745_v6  ;;  %vm1211_vm4 = vweird.f32 %v1745_v6 }
 0x39c   : > { %v1079_v58 = vld [vmem:[#allocation5 + $0x40] sm:$0xff]  ;;  %v1208_v10 = vsub.f32 1.0, %v1207_v8 }
 0x39e   : > { %v1209_v2 = vmul.f32 %v1745_v6, %v1208_v10 }
 0x3a0   : > { %v1210_v11 = vadd.f32 %v1745_v6, %v1209_v2 }
 0x3a2   : > { %v2166_v13 = vsel %vm1211_vm4, %v1745_v6, %v1210_v11 }
 0x3b0   : > { %v1126_v21 = vpop.permute.xlu2 %1125 }
 0x3b1   : > { %v1148_v38 = vmul.f32 %v1126_v21, %v1076_v32 }
 0x3b3   : > { %v2139_v60 = vadd.f32 %v1646_v9, %v1148_v38 }
 0x3b5   : > { %v1194_v29 = vsel %vm380_vm0, %v2139_v60, 0.0 }
 0x3c0   : > { %v1101_v39 = vpop.permute.xlu1 %1100 }
 0x3c1   : > { %v1143_v41 = vmul.f32 %v1101_v39, %v1071_v33 }
 0x3c2   : > { %1186 = vadd.xlane.f32.xlu2 %v1185_v43 }
 0x3c3   : > { %v2135_v54 = vadd.f32 %v1637_v22, %v1143_v41 }
 0x3c5   : > { %v1179_v57 = vsel %vm380_vm0, %v2135_v54, 0.0 }
 0x3c6   : > { %1180 = vadd.xlane.f32.xlu1 %v1179_v57 }
 0x3c8   : > { %v1116_v27 = vpop.permute.xlu1 %1115 }
 0x3c9   : > { %v1146_v28 = vmul.f32 %v1116_v27, %v1074_v26 }
 0x3ca   : > { %1195 = vadd.xlane.f32.xlu2 %v1194_v29 }
 0x3cb   : > { %v2143_v31 = vadd.f32 %v1642_v25, %v1146_v28 }
 0x3cd   : > { %v1188_v35 = vsel %vm380_vm0, %v2143_v31, 0.0 }
 0x3ce   : > { %v1106_v36 = vpop.permute.xlu0 %1105  ;;  %1189 = vadd.xlane.f32.xlu1 %v1188_v35 }
 0x3cf   : > { %v1144_v62 = vmul.f32 %v1106_v36, %v1072_v40 }
 0x3d0   : > { %v1131_v44 = vpop.permute.xlu1 %1130 }
 0x3d1   : > { %v1149_v45 = vmul.f32 %v1131_v44, %v1077_v42  ;;  %v2148_v12 = vadd.f32 %v1638_v37, %v1144_v62 }
 0x3d3   : > { %v1182_v18 = vsel %vm380_vm0, %v2148_v12, 0.0  ;;  %v2152_v46 = vadd.f32 %v1649_v1, %v1149_v45 }
 0x3d4   : > { %1183 = vadd.xlane.f32.xlu0 %v1182_v18 }
 0x3d5   : > { %v1197_v47 = vsel %vm380_vm0, %v2152_v46, 0.0 }
 0x3d6   : > { %v1121_v49 = vpop.permute.xlu0 %1120  ;;  %1198 = vadd.xlane.f32.xlu1 %v1197_v47 }
 0x3d7   : > { %v1147_v50 = vmul.f32 %v1121_v49, %v1075_v5 }
 0x3d9   : > { %v2156_v51 = vadd.f32 %v1645_v48, %v1147_v50 }
 0x3db   : > { %v1191_v52 = vsel %vm380_vm0, %v2156_v51, 0.0 }
 0x3dc   : > { %1192 = vadd.xlane.f32.xlu0 %v1191_v52 }
 0x3de   : > { %v1136_v14 = vpop.permute.xlu0 %1135 }
 0x3df   : > { %v1150_v53 = vmul.f32 %v1136_v14, %v1078_v23 }
 0x3e1   : > { %v2160_v24 = vadd.f32 %v1650_v0, %v1150_v53 }
 0x3e3   : > { %v1200_v55 = vsel %vm380_vm0, %v2160_v24, 0.0 }
 0x3e4   : > { %1201 = vadd.xlane.f32.xlu0 %v1200_v55 }
 0x3f3   : > { %v1141_v59 = vpop.permute.xlu2 %1140 }
 0x3f4   : > { %v1151_v61 = vmul.f32 %v1141_v59, %v1079_v58 }
 0x3f6   : > { %v1178_v4 = vadd.f32 %v1169_v56, %v1151_v61 }
 0x3f8   : > { %v1203_v63 = vsel %vm380_vm0, %v1178_v4, 0.0 }
 0x3f9   : > { %1204 = vadd.xlane.f32.xlu2 %v1203_v63 }
 0x435   : > { %v1187_v30 = vpop.xlane.xlu2 %1186 }
 0x436   : > { %v1215_v15 = vmul.f32 %v2166_v13, %v1187_v30 }
 0x438   : > { %v2170_v7 = vsub.f32 %v2130_v19, %v1215_v15 }
 0x439   : > { %v1181_v17 = vpop.xlane.xlu1 %1180 }
 0x43a   : > { %v1213_v21 = vmul.f32 %v2166_v13, %v1181_v17  ;;  %v1233_v20 = vmul.f32 %v2170_v7, %v2170_v7 }
 0x43c   : > { %v2176_v22 = vsub.f32 %v2135_v54, %v1213_v21  ;;  %v1246_v32 = vsel %vm380_vm0, %v1233_v20, 0.0 }
 0x43d   : > { %1247 = vadd.xlane.f32.xlu2 %v1246_v32  ;;  %v1196_v33 = vpop.xlane.xlu2 %1195 }
 0x43e   : > { %v1218_v39 = vmul.f32 %v2166_v13, %v1196_v33  ;;  %v1231_v38 = vmul.f32 %v2176_v22, %v2176_v22 }
 0x440   : > { %v2183_v19 = vsub.f32 %v2139_v60, %v1218_v39  ;;  %v1240_v41 = vsel %vm380_vm0, %v1231_v38, 0.0 }
 0x441   : > { %1241 = vadd.xlane.f32.xlu1 %v1240_v41  ;;  %v1190_v43 = vpop.xlane.xlu1 %1189  ;;  %v2241_v41 = vld [vmem:[%s2335_s5] ss:$0 sm:$0xff] }
 0x442   : > { %v1216_v9 = vmul.f32 %v2166_v13, %v1190_v43  ;;  %v1236_v54 = vmul.f32 %v2183_v19, %v2183_v19 }
 0x444   : > { %v2190_v57 = vsub.f32 %v2143_v31, %v1216_v9  ;;  %v1255_v25 = vsel %vm380_vm0, %v1236_v54, 0.0 }
 0x445   : > { %1256 = vadd.xlane.f32.xlu2 %v1255_v25 }
 0x446   : > { %v1234_v26 = vmul.f32 %v2190_v57, %v2190_v57 }
 0x447   : > { %v1184_v60 = vpop.xlane.xlu0 %1183 }
 0x448   : > { %v1214_v27 = vmul.f32 %v2166_v13, %v1184_v60  ;;  %v1249_v28 = vsel %vm380_vm0, %v1234_v26, 0.0 }
 0x449   : > { %1250 = vadd.xlane.f32.xlu1 %v1249_v28  ;;  %v1199_v29 = vpop.xlane.xlu1 %1198 }
 0x44a   : > { %v2198_v34 = vsub.f32 %v2148_v12, %v1214_v27  ;;  %v1219_v35 = vmul.f32 %v2166_v13, %v1199_v29  ;;  %v2249_v27 = vld [vmem:[%s2336_s6] ss:$0 sm:$0xff] }
 0x44c   : > { %v2202_v31 = vsub.f32 %v2152_v46, %v1219_v35  ;;  %v1232_v37 = vmul.f32 %v2198_v34, %v2198_v34 }
 0x44e   : > { %v1243_v40 = vsel %vm380_vm0, %v1232_v37, 0.0  ;;  %v1237_v36 = vmul.f32 %v2202_v31, %v2202_v31 }
 0x44f   : > { %1244 = vadd.xlane.f32.xlu0 %v1243_v40  ;;  %v1193_v62 = vpop.xlane.xlu0 %1192 }
 0x450   : > { %v1217_v1 = vmul.f32 %v2166_v13, %v1193_v62  ;;  %v1258_v42 = vsel %vm380_vm0, %v1237_v36, 0.0 }
 0x451   : > { %1259 = vadd.xlane.f32.xlu1 %v1258_v42 }
 0x452   : > { %v2212_v44 = vsub.f32 %v2156_v51, %v1217_v1 }
 0x454   : > { %v1235_v45 = vmul.f32 %v2212_v44, %v2212_v44 }
 0x456   : > { %v1252_v12 = vsel %vm380_vm0, %v1235_v45, 0.0 }
 0x457   : > { %1253 = vadd.xlane.f32.xlu0 %v1252_v12  ;;  %v1202_v18 = vpop.xlane.xlu0 %1201 }
 0x458   : > { %v1220_v46 = vmul.f32 %v2166_v13, %v1202_v18 }
 0x45a   : > { %v2219_v47 = vsub.f32 %v2160_v24, %v1220_v46 }
 0x45c   : > { %v1238_v48 = vmul.f32 %v2219_v47, %v2219_v47 }
 0x45e   : > { %v1261_v5 = vsel %vm380_vm0, %v1238_v48, 0.0 }
 0x45f   : > { %1262 = vadd.xlane.f32.xlu0 %v1261_v5 }
 0x46c   : > { %v1205_v49 = vpop.xlane.xlu2 %1204 }
 0x46d   : > { %v1221_v50 = vmul.f32 %v2166_v13, %v1205_v49 }
 0x46f   : > { %v2225_v51 = vsub.f32 %v1178_v4, %v1221_v50 }
 0x471   : > { %v1239_v52 = vmul.f32 %v2225_v51, %v2225_v51 }
 0x473   : > { %v1264_v0 = vsel %vm380_vm0, %v1239_v52, 0.0 }
 0x474   : > { %1265 = vadd.xlane.f32.xlu2 %v1264_v0 }
 0x4b0   : > { %v1248_v23 = vpop.xlane.xlu2 %1247 }
 0x4b1   : > { %v1269_v14 = vmul.f32 %v1248_v23, %v2166_v13 }
 0x4b3   : > { %v1278_v53 = vadd.f32 1e-05, %v1269_v14 }
 0x4b4   : > { %v1242_v24 = vpop.xlane.xlu1 %1241 }
 0x4b5   : > { %1746 = vrsqrt.f32 %v1278_v53  ;;  %v1267_v55 = vmul.f32 %v1242_v24, %v2166_v13  ;;  %vm1311_vm6 = vweird.f32 %v1278_v53 }
 0x4b7   : > { %v1276_v16 = vadd.f32 1e-05, %v1267_v55 }
 0x4b8   : > { %v1257_v56 = vpop.xlane.xlu2 %1256 }
 0x4b9   : > { %1748 = vrsqrt.f32 %v1276_v16  ;;  %v1272_v58 = vmul.f32 %v1257_v56, %v2166_v13  ;;  %vm1291_vm9 = vweird.f32 %v1276_v16 }
 0x4bb   : > { %v1747_v59 = vpop.eup %1746  ;;  %v1281_v61 = vadd.f32 1e-05, %v1272_v58 }
 0x4bc   : > { %v1306_v4 = vmul.f32 %v1747_v59, %v1278_v53  ;;  %v1251_v63 = vpop.xlane.xlu1 %1250  ;;  %vm1312_vm5 = vweird.f32 %v1747_v59 }
 0x4bd   : > { %1750 = vrsqrt.f32 %v1281_v61  ;;  %v1270_v3 = vmul.f32 %v1251_v63, %v2166_v13  ;;  %vm1313_vm7 = vmor %vm1311_vm6, %vm1312_vm5  ;;  %vm1341_vm12 = vweird.f32 %v1281_v61 }
 0x4be   : > { %v1307_v6 = vmul.f32 %v1747_v59, %v1306_v4 }
 0x4bf   : > { %v1749_v8 = vpop.eup %1748  ;;  %v2234_v10 = vadd.f32 1e-05, %v1270_v3 }
 0x4c0   : > { %v1308_v2 = vmul.f32 0.5, %v1307_v6  ;;  %v1286_v11 = vmul.f32 %v1749_v8, %v1276_v16  ;;  %vm1292_vm8 = vweird.f32 %v1749_v8 }
 0x4c1   : > { %1752 = vrsqrt.f32 %v2234_v10  ;;  %vm1293_vm10 = vmor %vm1291_vm9, %vm1292_vm8  ;;  %vm1321_vm15 = vweird.f32 %v2234_v10 }
 0x4c2   : > { %v1309_v30 = vsub.f32 1.5, %v1308_v2  ;;  %v1287_v15 = vmul.f32 %v1749_v8, %v1286_v11  ;;  %v1245_v17 = vpop.xlane.xlu0 %1244 }
 0x4c3   : > { %v1751_v21 = vpop.eup %1750  ;;  %v1268_v20 = vmul.f32 %v1245_v17, %v2166_v13 }
 0x4c4   : > { %v1310_v32 = vmul.f32 %v1747_v59, %v1309_v30  ;;  %v1288_v33 = vmul.f32 0.5, %v1287_v15  ;;  %v1336_v39 = vmul.f32 %v1751_v21, %v1281_v61  ;;  %v1260_v38 = vpop.xlane.xlu1 %1259  ;;  %vm1342_vm11 = vweird.f32 %v1751_v21 }
 0x4c5   : > { %v2243_v43 = vadd.f32 1e-05, %v1268_v20  ;;  %v1273_v9 = vmul.f32 %v1260_v38, %v2166_v13  ;;  %vm1343_vm13 = vmor %vm1341_vm12, %vm1342_vm11 }
 0x4c6   : > { %v1314_v54 = vsel %vm1313_vm7, %v1747_v59, %v1310_v32  ;;  %v1289_v25 = vsub.f32 1.5, %v1288_v33  ;;  %v1337_v26 = vmul.f32 %v1751_v21, %v1336_v39 }
 0x4c7   : > { %v1753_v60 = vpop.eup %1752  ;;  %v1377_v28 = vmul.f32 %v1314_v54, %v2170_v7  ;;  %1754 = vrsqrt.f32 %v2243_v43  ;;  %v2253_v29 = vadd.f32 1e-05, %v1273_v9  ;;  %vm1301_vm3 = vweird.f32 %v2243_v43 }
 0x4c8   : > { %v1290_v35 = vmul.f32 %v1749_v8, %v1289_v25  ;;  %v1338_v37 = vmul.f32 0.5, %v1337_v26  ;;  %v1316_v40 = vmul.f32 %v1753_v60, %v2234_v10  ;;  %vm1322_vm14 = vweird.f32 %v1753_v60 }
 0x4c9   : > { %v1390_v36 = vmul.f32 %v2241_v41, %v1377_v28  ;;  %1756 = vrsqrt.f32 %v2253_v29  ;;  %vm1323_vm0 = vmor %vm1321_vm15, %vm1322_vm14  ;;  %vm1351_vm6 = vweird.f32 %v2253_v29 }
 0x4ca   : > { %v1294_v62 = vsel %vm1293_vm10, %v1749_v8, %v1290_v35  ;;  %v1339_v1 = vsub.f32 1.5, %v1338_v37  ;;  %v1317_v42 = vmul.f32 %v1753_v60, %v1316_v40  ;;  %v1254_v7 = vpop.xlane.xlu0 %1253 }
 0x4cb   : > { %v1403_v45 = vadd.f32 %v2249_v27, %v1390_v36  ;;  %v1375_v12 = vmul.f32 %v1294_v62, %v2176_v22  ;;  %v1271_v18 = vmul.f32 %v1254_v7, %v2166_v13 }
 0x4cc   : > { %v1340_v46 = vmul.f32 %v1751_v21, %v1339_v1  ;;  %v1318_v48 = vmul.f32 0.5, %v1317_v42 }
 0x4cd   : > { %v1755_v5 = vpop.eup %1754  ;;  %v1412_v49 = vpack.c.bf16 %v1403_v45, %v1403_v45  ;;  %v1388_v50 = vmul.f32 %v2241_v41, %v1375_v12  ;;  %v2269_v52 = vadd.f32 1e-05, %v1271_v18 }
 0x4ce   : > { %v1344_v22 = vsel %vm1343_vm13, %v1751_v21, %v1340_v46  ;;  %v1319_v0 = vsub.f32 1.5, %v1318_v48  ;;  %v1296_v23 = vmul.f32 %v1755_v5, %v2243_v43  ;;  %vm1302_vm2 = vweird.f32 %v1755_v5 }
 0x4cf   : > { %v1757_v14 = vpop.eup %1756  ;;  %1422 = vst.msk [vmem:[%s2266_s12 + $0x8] sm:$0xf] %vm447_vm1, %v1412_v49  ;;  %v1401_v53 = vadd.f32 %v2249_v27, %v1388_v50  ;;  %v1380_v24 = vmul.f32 %v1344_v22, %v2183_v19  ;;  %1758 = vrsqrt.f32 %v2269_v52  ;;  %vm1303_vm5 = vmor %vm1301_vm3, %vm1302_vm2  ;;  %vm1331_vm9 = vweird.f32 %v2269_v52 }
 0x4d0   : > { %v1320_v55 = vmul.f32 %v1753_v60, %v1319_v0  ;;  %v1297_v16 = vmul.f32 %v1755_v5, %v1296_v23  ;;  %v1346_v56 = vmul.f32 %v1757_v14, %v2253_v29  ;;  %vm1352_vm4 = vweird.f32 %v1757_v14 }
 0x4d1   : > { %v1410_v58 = vpack.c.bf16 %v1401_v53, %v1401_v53  ;;  %v1393_v59 = vmul.f32 %v2241_v41, %v1380_v24  ;;  %vm1353_vm7 = vmor %vm1351_vm6, %vm1352_vm4 }
 0x4d2   : > { %v1324_v61 = vsel %vm1323_vm0, %v1753_v60, %v1320_v55  ;;  %v1298_v4 = vmul.f32 0.5, %v1297_v16  ;;  %v1347_v63 = vmul.f32 %v1757_v14, %v1346_v56  ;;  %v1263_v3 = vpop.xlane.xlu0 %1262 }
 0x4d3   : > { %1420 = vst.msk [vmem:[%s2266_s12] sm:$0xf] %vm447_vm1, %v1410_v58  ;;  %v1406_v19 = vadd.f32 %v2249_v27, %v1393_v59  ;;  %v1378_v6 = vmul.f32 %v1324_v61, %v2190_v57  ;;  %v1274_v8 = vmul.f32 %v1263_v3, %v2166_v13 }
 0x4d4   : > { %v1299_v10 = vsub.f32 1.5, %v1298_v4  ;;  %v1348_v2 = vmul.f32 0.5, %v1347_v63 }
 0x4d5   : > { %v1759_v11 = vpop.eup %1758  ;;  %v1415_v30 = vpack.c.bf16 %v1406_v19, %v1406_v19  ;;  %v1391_v15 = vmul.f32 %v2241_v41, %v1378_v6  ;;  %v1283_v17 = vadd.f32 1e-05, %v1274_v8 }
 0x4d6   : > { %v1300_v21 = vmul.f32 %v1755_v5, %v1299_v10  ;;  %v1349_v20 = vsub.f32 1.5, %v1348_v2  ;;  %v1326_v32 = vmul.f32 %v1759_v11, %v2269_v52  ;;  %vm1332_vm8 = vweird.f32 %v1759_v11 }
 0x4d7   : > { %1425 = vst.msk [vmem:[%s2266_s12 + $0x14] sm:$0xf] %vm447_vm1, %v1415_v30  ;;  %v1404_v57 = vadd.f32 %v2249_v27, %v1391_v15  ;;  %1760 = vrsqrt.f32 %v1283_v17  ;;  %vm1333_vm10 = vmor %vm1331_vm9, %vm1332_vm8  ;;  %vm1361_vm12 = vweird.f32 %v1283_v17 }
 0x4d8   : > { %v1304_v33 = vsel %vm1303_vm5, %v1755_v5, %v1300_v21  ;;  %v1350_v39 = vmul.f32 %v1757_v14, %v1349_v20  ;;  %v1327_v38 = vmul.f32 %v1759_v11, %v1326_v32 }
 0x4d9   : > { %v1413_v9 = vpack.c.bf16 %v1404_v57, %v1404_v57  ;;  %v1376_v43 = vmul.f32 %v1304_v33, %v2198_v34 }
 0x4da   : > { %v1354_v54 = vsel %vm1353_vm7, %v1757_v14, %v1350_v39  ;;  %v1328_v25 = vmul.f32 0.5, %v1327_v38 }
 0x4db   : > { %1423 = vst.msk [vmem:[%s2266_s12 + $0xc] sm:$0xf] %vm447_vm1, %v1413_v9  ;;  %v1389_v26 = vmul.f32 %v2241_v41, %v1376_v43  ;;  %v1381_v60 = vmul.f32 %v1354_v54, %v2202_v31 }
 0x4dc   : > { %v1329_v28 = vsub.f32 1.5, %v1328_v25 }
 0x4dd   : > { %v1761_v35 = vpop.eup %1760  ;;  %v1402_v29 = vadd.f32 %v2249_v27, %v1389_v26  ;;  %v1394_v37 = vmul.f32 %v2241_v41, %v1381_v60 }
 0x4de   : > { %v1330_v40 = vmul.f32 %v1759_v11, %v1329_v28  ;;  %v1356_v34 = vmul.f32 %v1761_v35, %v1283_v17  ;;  %vm1362_vm11 = vweird.f32 %v1761_v35 }
 0x4df   : > { %v1411_v36 = vpack.c.bf16 %v1402_v29, %v1402_v29  ;;  %v1407_v62 = vadd.f32 %v2249_v27, %v1394_v37  ;;  %vm1363_vm13 = vmor %vm1361_vm12, %vm1362_vm11 }
 0x4e0   : > { %v1334_v1 = vsel %vm1333_vm10, %v1759_v11, %v1330_v40  ;;  %v1357_v42 = vmul.f32 %v1761_v35, %v1356_v34 }
 0x4e1   : > { %1421 = vst.msk [vmem:[%s2266_s12 + $0x4] sm:$0xf] %vm447_vm1, %v1411_v36  ;;  %v1416_v31 = vpack.c.bf16 %v1407_v62, %v1407_v62  ;;  %v1379_v7 = vmul.f32 %v1334_v1, %v2212_v44 }
 0x4e2   : > { %v1358_v45 = vmul.f32 0.5, %v1357_v42 }
 0x4e3   : > { %1426 = vst.msk [vmem:[%s2266_s12 + $0x18] sm:$0xf] %vm447_vm1, %v1416_v31  ;;  %v1392_v12 = vmul.f32 %v2241_v41, %v1379_v7 }
 0x4e4   : > { %v1359_v18 = vsub.f32 1.5, %v1358_v45 }
 0x4e5   : > { %v1405_v46 = vadd.f32 %v2249_v27, %v1392_v12 }
 0x4e6   : > { %v1360_v48 = vmul.f32 %v1761_v35, %v1359_v18 }
 0x4e7   : > { %v1414_v5 = vpack.c.bf16 %v1405_v46, %v1405_v46  ;;  %v1266_v49 = vpop.xlane.xlu2 %1265 }
 0x4e8   : > { %v1364_v50 = vsel %vm1363_vm13, %v1761_v35, %v1360_v48  ;;  %v1275_v52 = vmul.f32 %v1266_v49, %v2166_v13 }
 0x4e9   : > { %1424 = vst.msk [vmem:[%s2266_s12 + $0x10] sm:$0xf] %vm447_vm1, %v1414_v5  ;;  %v1382_v44 = vmul.f32 %v1364_v50, %v2219_v47 }
 0x4ea   : > { %v1284_v22 = vadd.f32 1e-05, %v1275_v52 }
 0x4eb   : > { %v1395_v0 = vmul.f32 %v2241_v41, %v1382_v44 }
 0x4ec   : > { %1762 = vrsqrt.f32 %v1284_v22  ;;  %vm1371_vm15 = vweird.f32 %v1284_v22 }
 0x4ed   : > { %v1408_v23 = vadd.f32 %v2249_v27, %v1395_v0 }
 0x4ef   : > { %v1417_v14 = vpack.c.bf16 %v1408_v23, %v1408_v23 }
 0x4f1   : > { %1427 = vst.msk [vmem:[%s2266_s12 + $0x1c] sm:$0xf] %vm447_vm1, %v1417_v14 }
 0x4f2   : > { %v1763_v53 = vpop.eup %1762 }
 0x4f3   : > { %v1366_v24 = vmul.f32 %v1763_v53, %v1284_v22  ;;  %vm1372_vm14 = vweird.f32 %v1763_v53 }
 0x4f4   : > { %vm1373_vm0 = vmor %vm1371_vm15, %vm1372_vm14 }
 0x4f5   : > { %v1367_v55 = vmul.f32 %v1763_v53, %v1366_v24 }
 0x4f7   : > { %v1368_v16 = vmul.f32 0.5, %v1367_v55 }
 0x4f9   : > { %v1369_v56 = vsub.f32 1.5, %v1368_v16 }
 0x4fb   : > { %v1370_v13 = vmul.f32 %v1763_v53, %v1369_v56 }
 0x4fd   : > { %v1374_v47 = vsel %vm1373_vm0, %v1763_v53, %v1370_v13 }
 0x4fe   : > { %v1383_v58 = vmul.f32 %v1374_v47, %v2225_v51 }
 0x500   : > { %v1396_v59 = vmul.f32 %v2241_v41, %v1383_v58 }
 0x502   : > { %v1409_v61 = vadd.f32 %v2249_v27, %v1396_v59 }
 0x504   : > { %v1418_v4 = vpack.c.bf16 %v1409_v61, %v1409_v61 }
 0x506   : > { %1428 = vst.msk [vmem:[%s2266_s12 + $0x20] sm:$0xf] %vm447_vm1, %v1418_v4 }
 0x507 PF: > { %s17_s26 = sadd.s32 1, %s1786_s26   ;;  %s2338_s24 = smov %s1782_s25 }
 0x508   : > { %p14_p5 = scmp.ge.s32.totalorder %s17_s26, 4   ;;  %s2339_s25 = smov %s2341_s27 }
 0x50a   :  { %16 = sbr.rel (!%p14_p5) target bundleno = 2 (0x2), region = 89 }

// kernel: conformer3_forward.8
= control target key start
LH: loop header
LB: loop body
LE: loop exit
PB: predicated region body
PF: predicated region fallthrough
CT: control target
= control target key end

     0   :  { %s3473_s13 = smov 0   ;;  %s4477_s0 = inlined_call_operand.vmem [shape: bf16[2,64,32], index: 0, kind: input, shape index: {}]   ;;  %s4478_s1 = inlined_call_operand.vmem [shape: bf16[32,32], index: 1, kind: input, shape index: {}]   ;;  %s4479_s2 = inlined_call_operand.vmem [shape: f32[1,32], index: 2, kind: input, shape index: {}]   ;;  %s4480_s3 = inlined_call_operand.vmem [shape: f32[1,32], index: 3, kind: input, shape index: {}]   ;;  %s4481_s4 = inlined_call_operand.vmem [shape: bf16[800,32], index: 4, kind: input, shape index: {}]   ;;  %s4482_s5 = inlined_call_operand.vmem [shape: f32[1,32], index: 5, kind: input, shape index: {}]   ;;  %s4483_s6 = inlined_call_operand.vmem [shape: f32[1,32], index: 6, kind: input, shape index: {}]   ;;  %s4484_s7 = inlined_call_operand.vmem [shape: bf16[32,32], index: 7, kind: input, shape index: {}]   ;;  %s4485_s8 = inlined_call_operand.vmem [shape: f32[1,32], index: 8, kind: input, shape index: {}]   ;;  %s4486_s9 = inlined_call_operand.vmem [shape: f32[1,32], index: 9, kind: input, shape index: {}]   ;;  %s4487_s10 = inlined_call_operand.vmem [shape: bf16[2,64,32], index: 10, kind: output, shape index: {}]  }
   0x1 LB: > { %s2883_s14 = sadd.s32 4294967295, %s3412_s13   ;;  %p2887_p0 = scmp.ge.s32.totalorder %s3412_s13, 1  ;;  %s3412_s13 = sphi %s3473_s13, %s20_s13  }
   0x2   : > { %p312_p1 = scmp.lt.s32.totalorder %s3412_s13, 3 }
   0x4   : > { %p313_p2 = pnand %p2887_p0, %p312_p1 }
   0x5   : > { %p350_p3 = scmp.lt.s32.totalorder (!%p313_p2), %s2883_s14, 1  ;;  %s3415_s23 = smov (!%p313_p2), 32  }
   0x6   : > { %316 = sbr.rel (%p313_p2) target bundleno = 991 (0x3df), region = 60  ;;  %s3416_s24 = smov (!%p313_p2), 96  }
   0x7   : > { %s3417_s25 = smov (!%p313_p2), 64  }
   0xb   : > { %v3257_v0 = vld [vmem:[%s4478_s1 + $0x8] sm:$0xff]  ;;  %v3256_v1 = vld [vmem:[%s4478_s1] sm:$0xff]  ;;  %s4489_s14 = smov (!%p350_p3, %s2883_s14), 1  ;;  %vm405_vm0 = vcmask 261120   ;;  %vm544_vm1 = vcmask 257024   ;;  %v3414_v6 = vmov 0.0  }
   0xc   : > { %424 = vmatpush.bf16.msra.mxu0 %v3257_v0  ;;  %3338 = vmatpush.bf16.msra.mxu1 %v3257_v0  ;;  %s3250_s19 = sshll.u32 %s4489_s14, 5  ;;  %548 = vst.msk [vmem:[#allocation2 + $0x20] sm:$0xff] %vm405_vm0, %v3414_v6  ;;  %v3537_v23 = vld [vmem:[%s4479_s2] ss:$0 sm:$0xff]  ;;  %vm656_vm2 = vcmask 519424   ;;  %vm713_vm3 = vcmask 781824  }
   0xd   : > { %s354_s22 = scalar_lea.vmem %s4477_s0, %s3250_s19  ;;  %549 = vst.msk [vmem:[#allocation2 + $0x28] sm:$0xf] %vm544_vm1, %v3414_v6  ;;  %v3543_v24 = vld [vmem:[%s4480_s3] ss:$0 sm:$0xff]  ;;  %vm770_vm4 = vcmask 1044224   ;;  %s4437_s29 = scalar_lea.vmem %s4487_s10, %s3250_s19 }
   0xe   : > { %v3252_v2 = vld [vmem:[%s354_s22] sm:$0xff]  ;;  %v3254_v3 = vld [vmem:[%s354_s22 + $0x10] sm:$0xff]  ;;  %v3253_v4 = vld [vmem:[%s354_s22 + $0x8] sm:$0xff]  ;;  %543 = vst.msk [vmem:[#allocation2] sm:$0xff] %vm405_vm0, %v3414_v6 }
   0xf   : > { %v3255_v5 = vld [vmem:[%s354_s22 + $0x18] sm:$0xff]  ;;  %545 = vst.msk [vmem:[#allocation2 + $0x8] sm:$0xf] %vm544_vm1, %v3414_v6 }
  0x10   : > { %425 = vmatpush.bf16.msra.mxu0 %v3256_v1  ;;  %3339 = vmatpush.bf16.msra.mxu1 %v3256_v1  ;;  %546 = vst.msk [vmem:[#allocation2 + $0x10] sm:$0xff] %vm405_vm0, %v3414_v6 }
  0x11   : > { %547 = vst.msk [vmem:[#allocation2 + $0x18] sm:$0xf] %vm544_vm1, %v3414_v6 }
  0x12   : > { %550 = vst.msk [vmem:[#allocation2 + $0x30] sm:$0xff] %vm405_vm0, %v3414_v6 }
  0x13   : > { %2916 = vmatmul.msk.bf16.vlgmr.msra.gmra.mxu0 %vm405_vm0, %v3252_v2  ;;  %2918 = vmatmul.msk.bf16.vlgmr.msra.gmra.mxu1 %vm405_vm0, %v3254_v3  ;;  %551 = vst.msk [vmem:[#allocation2 + $0x38] sm:$0xf] %vm544_vm1, %v3414_v6 }
  0x14   : > { %552 = vst.msk [vmem:[#allocation2 + $0x40] sm:$0xff] %vm405_vm0, %v3414_v6 }
  0x15   : > { %553 = vst.msk [vmem:[#allocation2 + $0x48] sm:$0xf] %vm544_vm1, %v3414_v6 }
  0x16   : > { %554 = vst.msk [vmem:[#allocation2 + $0x50] sm:$0xff] %vm405_vm0, %v3414_v6  ;;  %v608_v15 = vld [vmem:[#allocation2 + $0x1] sm:$0xff] }
  0x17   : > { %555 = vst.msk [vmem:[#allocation2 + $0x58] sm:$0xf] %vm544_vm1, %v3414_v6  ;;  %v804_v7 = vld [vmem:[#allocation2 + $0x10] sm:$0xff]  ;;  %v616_v16 = vpack.c.bf16 %v608_v15, %v608_v15  ;;  %v665_v17 = vld [vmem:[#allocation2 + $0x2] sm:$0xff] }
  0x18   : > { %556 = vst.msk [vmem:[#allocation2 + $0x60] sm:$0xff] %vm405_vm0, %v3414_v6  ;;  %v916_v8 = vld [vmem:[#allocation2 + $0x12] sm:$0xff]  ;;  %v812_v9 = vpack.c.bf16 %v804_v7, %v804_v7  ;;  %v722_v18 = vld [vmem:[#allocation2 + $0x3] sm:$0xff]  ;;  %v673_v19 = vpack.c.bf16 %v665_v17, %v665_v17 }
  0x19   : > { %v860_v10 = vld [vmem:[#allocation2 + $0x11] sm:$0xff]  ;;  %557 = vst.msk [vmem:[#allocation2 + $0x68] sm:$0xf] %vm544_vm1, %v3414_v6  ;;  %v924_v11 = vpack.c.bf16 %v916_v8, %v916_v8  ;;  %v730_v20 = vpack.c.bf16 %v722_v18, %v722_v18 }
  0x1a   : > { %v868_v12 = vpack.c.bf16 %v860_v10, %v860_v10  ;;  %558 = vst.msk [vmem:[#allocation2 + $0x70] sm:$0xff] %vm405_vm0, %v3414_v6  ;;  %828 = vrot.lane.b32.xlu0 %v812_v9, %s3415_s23  ;;  %v996_v13 = vld [vmem:[#allocation2 + $0x14] sm:$0xff] }
  0x1b   : > { %559 = vst.msk [vmem:[#allocation2 + $0x78] sm:$0xf] %vm544_vm1, %v3414_v6  ;;  %940 = vrot.lane.b32.xlu2 %v924_v11, %s3416_s24  ;;  %v1004_v14 = vpack.c.bf16 %v996_v13, %v996_v13  ;;  %v723_v21 = vld [vmem:[#allocation2 + $0x13] sm:$0xff] }
  0x1c   : > { %884 = vrot.lane.b32.xlu1 %v868_v12, %s3417_s25  ;;  %560 = vst.msk [vmem:[#allocation2 + $0x80] sm:$0xff] %vm405_vm0, %v3414_v6  ;;  %v731_v22 = vpack.c.bf16 %v723_v21, %v723_v21 }
  0x1d   : > { %561 = vst.msk [vmem:[#allocation2 + $0x88] sm:$0xf] %vm544_vm1, %v3414_v6 }
  0x1e   : > { %562 = vst.msk [vmem:[#allocation2 + $0x90] sm:$0xff] %vm405_vm0, %v3414_v6 }
  0x1f   : > { %563 = vst.msk [vmem:[#allocation2 + $0x98] sm:$0xf] %vm544_vm1, %v3414_v6 }
  0x20   : > { %564 = vst.msk [vmem:[#allocation2 + $0xa0] sm:$0xff] %vm405_vm0, %v3414_v6 }
  0x21   : > { %565 = vst.msk [vmem:[#allocation2 + $0xa8] sm:$0xf] %vm544_vm1, %v3414_v6 }
  0x22   : > { %566 = vst.msk [vmem:[#allocation2 + $0xb0] sm:$0xff] %vm405_vm0, %v3414_v6  ;;  %1020 = vrot.lane.b32.xlu0 %v1004_v14, %s3415_s23 }
  0x23   : > { %2917 = vmatmul.msk.bf16.gmra.mxu0 %vm405_vm0, %v3253_v4  ;;  %2919 = vmatmul.msk.bf16.gmra.mxu1 %vm405_vm0, %v3255_v5  ;;  %567 = vst.msk [vmem:[#allocation2 + $0xb8] sm:$0xf] %vm544_vm1, %v3414_v6 }
  0x24   : > { %634 = vrot.lane.b32.xlu2 %v868_v12, %s3415_s23  ;;  %632 = vrot.lane.b32.xlu1 %v616_v16, %s3415_s23  ;;  %601 = vst.msk [vmem:[#allocation3 + $0x1c] sm:$0xf] %vm544_vm1, %v812_v9 }
  0x25   : > { %796 = vst.msk [vmem:[#allocation3 + $0x20] sm:$0xf] %vm544_vm1, %v1004_v14 }
  0x26   : > { %988 = vst.msk [vmem:[#allocation3 + $0x8] sm:$0xf] %vm544_vm1, %v731_v22 }
  0x2a   : > { %691 = vrot.lane.b32.xlu0 %v924_v11, %s3417_s25 }
  0x2c   : > { %689 = vrot.lane.b32.xlu2 %v673_v19, %s3417_s25  ;;  %746 = vrot.lane.b32.xlu1 %v730_v20, %s3416_s24 }
  0x34   : > { %748 = vrot.lane.b32.xlu2 %v731_v22, %s3416_s24 }
  0x90   : > { %v427_v25 = vpop.f32.mrf.mxu0  ;;  %v437_v26 = vpop.f32.mrf.mxu1 }
  0x91   : > { %v451_v27 = vmul.f32 %v3537_v23, %v427_v25  ;;  %v455_v28 = vmul.f32 %v3537_v23, %v437_v26 }
  0x93   : > { %v463_v29 = vadd.f32 %v3543_v24, %v451_v27  ;;  %v467_v30 = vadd.f32 %v3543_v24, %v455_v28 }
  0x95   : > { %v479_v31 = vmul.f32 0.044715, %v463_v29  ;;  %v483_v32 = vmul.f32 0.044715, %v467_v30  ;;  %v475_v56 = vmul.f32 0.5, %v467_v30  ;;  %v471_v58 = vmul.f32 0.5, %v463_v29 }
  0x97   : > { %v487_v33 = vmul.f32 %v479_v31, %v463_v29  ;;  %v491_v34 = vmul.f32 %v483_v32, %v467_v30 }
  0x98   : > { %v429_v35 = vpop.f32.mrf.mxu0  ;;  %v439_v36 = vpop.f32.mrf.mxu1 }
  0x99   : > { %v495_v37 = vmul.f32 %v487_v33, %v463_v29  ;;  %v499_v38 = vmul.f32 %v491_v34, %v467_v30  ;;  %v452_v39 = vmul.f32 %v3537_v23, %v429_v35  ;;  %v456_v40 = vmul.f32 %v3537_v23, %v439_v36 }
  0x9b   : > { %v503_v41 = vadd.f32 %v495_v37, %v463_v29  ;;  %v507_v42 = vadd.f32 %v499_v38, %v467_v30  ;;  %v464_v43 = vadd.f32 %v3543_v24, %v452_v39  ;;  %v468_v44 = vadd.f32 %v3543_v24, %v456_v40 }
  0x9d   : > { %v511_v45 = vmul.f32 0.7978846, %v503_v41  ;;  %v515_v46 = vmul.f32 0.7978846, %v507_v42  ;;  %v480_v47 = vmul.f32 0.044715, %v464_v43 }
  0x9e   : > { %v484_v48 = vmul.f32 0.044715, %v468_v44  ;;  %v472_v3 = vmul.f32 0.5, %v464_v43  ;;  %v476_v5 = vmul.f32 0.5, %v468_v44 }
  0x9f   : > { %3358 = vtanh.f32 %v511_v45  ;;  %v488_v49 = vmul.f32 %v480_v47, %v464_v43 }
  0xa0   : > { %3360 = vtanh.f32 %v515_v46  ;;  %v492_v50 = vmul.f32 %v484_v48, %v468_v44  ;;  %v432_v25 = vpop.f32.mrf.mxu0 }
  0xa1   : > { %v496_v51 = vmul.f32 %v488_v49, %v464_v43  ;;  %v453_v27 = vmul.f32 %v3537_v23, %v432_v25 }
  0xa2   : > { %v500_v52 = vmul.f32 %v492_v50, %v468_v44 }
  0xa3   : > { %v504_v53 = vadd.f32 %v496_v51, %v464_v43  ;;  %v3596_v30 = vadd.f32 %v3543_v24, %v453_v27 }
  0xa4   : > { %v508_v54 = vadd.f32 %v500_v52, %v468_v44 }
  0xa5   : > { %v3359_v55 = vpop.eup %3358  ;;  %v512_v60 = vmul.f32 0.7978846, %v504_v53  ;;  %v481_v33 = vmul.f32 0.044715, %v3596_v30 }
  0xa6   : > { %v3361_v57 = vpop.eup %3360  ;;  %v527_v59 = vadd.f32 1.0, %v3359_v55  ;;  %v516_v61 = vmul.f32 0.7978846, %v508_v54 }
  0xa7   : > { %v531_v62 = vadd.f32 1.0, %v3361_v57  ;;  %3362 = vtanh.f32 %v512_v60  ;;  %v489_v37 = vmul.f32 %v481_v33, %v3596_v30 }
  0xa8   : > { %v3554_v63 = vmul.f32 %v527_v59, %v471_v58  ;;  %3364 = vtanh.f32 %v516_v61  ;;  %v434_v40 = vpop.f32.mrf.mxu0 }
  0xa9   : > { %v3556_v0 = vmul.f32 %v531_v62, %v475_v56  ;;  %v497_v44 = vmul.f32 %v489_v37, %v3596_v30  ;;  %v454_v45 = vmul.f32 %v3537_v23, %v434_v40 }
  0xaa   : > { %569 = vst.msk [vmem:[#allocation2 + $0x22] sm:$0xff] %vm405_vm0, %v3554_v63 }
  0xab   : > { %577 = vst.msk [vmem:[#allocation2 + $0x62] sm:$0xff] %vm405_vm0, %v3556_v0  ;;  %v505_v51 = vadd.f32 %v497_v44, %v3596_v30  ;;  %v3630_v52 = vadd.f32 %v3543_v24, %v454_v45 }
  0xad   : > { %v3363_v1 = vpop.eup %3362  ;;  %v513_v57 = vmul.f32 0.7978846, %v505_v51  ;;  %v482_v58 = vmul.f32 0.044715, %v3630_v52  ;;  %v474_v45 = vmul.f32 0.5, %v3630_v52 }
  0xae   : > { %v3365_v2 = vpop.eup %3364  ;;  %v528_v4 = vadd.f32 1.0, %v3363_v1 }
  0xaf   : > { %v532_v6 = vadd.f32 1.0, %v3365_v2  ;;  %3366 = vtanh.f32 %v513_v57  ;;  %v490_v1 = vmul.f32 %v482_v58, %v3630_v52 }
  0xb0   : > { %v3562_v7 = vmul.f32 %v528_v4, %v472_v3  ;;  %v442_v4 = vpop.f32.mrf.mxu1 }
  0xb1   : > { %v917_v8 = vld [vmem:[#allocation2 + $0x22] sm:$0xff]  ;;  %v3564_v11 = vmul.f32 %v532_v6, %v476_v5 }
  0xb2   : > { %v861_v9 = vld [vmem:[#allocation2 + $0x21] sm:$0xff]  ;;  %v3566_v12 = vpack.c.bf16 %v917_v8, %v917_v8  ;;  %571 = vst.msk [vmem:[#allocation2 + $0x32] sm:$0xff] %vm405_vm0, %v3562_v7  ;;  %v498_v8 = vmul.f32 %v490_v1, %v3630_v52  ;;  %v3293_v1 = vld [vmem:[%s4481_s4 + $0x38] sm:$0xff] }
  0xb3   : > { %v805_v10 = vld [vmem:[#allocation2 + $0x20] sm:$0xff]  ;;  %v3568_v13 = vpack.c.bf16 %v861_v9, %v861_v9  ;;  %579 = vst.msk [vmem:[#allocation2 + $0x72] sm:$0xff] %vm405_vm0, %v3564_v11  ;;  %v457_v9 = vmul.f32 %v3537_v23, %v442_v4  ;;  %2348 = vmatpush.bf16.msrb.mxu1 %v3293_v1  ;;  %v3300_v1 = vld [vmem:[%s4481_s4 + $0x70] sm:$0xff] }
  0xb4   : > { %v813_v14 = vpack.c.bf16 %v805_v10, %v805_v10  ;;  %v997_v15 = vld [vmem:[#allocation2 + $0x24] sm:$0xff]  ;;  %942 = vrot.lane.b32.xlu2 %v3566_v12, %s3416_s24 }
  0xb5   : > { %v724_v16 = vld [vmem:[#allocation2 + $0x23] sm:$0xff]  ;;  %886 = vrot.lane.b32.xlu1 %v3568_v13, %s3417_s25  ;;  %v3578_v18 = vpack.c.bf16 %v997_v15, %v997_v15  ;;  %v506_v15 = vadd.f32 %v498_v8, %v3630_v52  ;;  %v3367_v27 = vpop.eup %3366 }
  0xb6   : > { %v1056_v17 = vld [vmem:[#allocation2 + $0x60] sm:$0xff]  ;;  %v3580_v19 = vpack.c.bf16 %v724_v16, %v724_v16  ;;  %830 = vrot.lane.b32.xlu0 %v813_v14, %s3415_s23  ;;  %602 = vst.msk [vmem:[#allocation3 + $0x38] sm:$0xf] %vm544_vm1, %v813_v14  ;;  %v469_v16 = vadd.f32 %v3543_v24, %v457_v9 }
  0xb7   : > { %v1001_v20 = vld [vmem:[#allocation2 + $0x64] sm:$0xff]  ;;  %v3583_v22 = vpack.c.bf16 %v1056_v17, %v1056_v17  ;;  %797 = vst.msk [vmem:[#allocation3 + $0x3c] sm:$0xf] %vm544_vm1, %v3578_v18 }
  0xb8   : > { %v728_v21 = vld [vmem:[#allocation2 + $0x63] sm:$0xff]  ;;  %989 = vst.msk [vmem:[#allocation3 + $0x24] sm:$0xf] %vm544_vm1, %v3580_v19  ;;  %v3591_v29 = vpack.c.bf16 %v1001_v20, %v1001_v20  ;;  %v473_v20 = vmul.f32 0.5, %v3596_v30 }
  0xb9   : > { %v3585_v26 = vpack.c.bf16 %v728_v21, %v728_v21  ;;  %v1164_v28 = vld [vmem:[#allocation2 + $0x22] sm:$0xff]  ;;  %606 = vst.msk [vmem:[#allocation3 + $0xa8] sm:$0xf] %vm544_vm1, %v3583_v22  ;;  %v1053_v32 = vld [vmem:[#allocation2 + $0x30] sm:$0xff] }
  0xba   : > { %v1172_v31 = vpack.c.bf16 %v1164_v28, %v1164_v28  ;;  %v3603_v34 = vpack.c.bf16 %v1053_v32, %v1053_v32  ;;  %v1057_v35 = vld [vmem:[#allocation2 + $0x70] sm:$0xff]  ;;  %801 = vst.msk [vmem:[#allocation3 + $0xac] sm:$0xf] %vm544_vm1, %v3591_v29  ;;  %v865_v50 = vld [vmem:[#allocation2 + $0x61] sm:$0xff]  ;;  %v485_v32 = vmul.f32 0.044715, %v469_v16 }
  0xbb   : > { %993 = vst.msk [vmem:[#allocation3 + $0x94] sm:$0xf] %vm544_vm1, %v3585_v26  ;;  %v725_v36 = vld [vmem:[#allocation2 + $0x33] sm:$0xff]  ;;  %v3611_v39 = vpack.c.bf16 %v1057_v35, %v1057_v35  ;;  %v1303_v55 = vld [vmem:[#allocation2 + $0x60] sm:$0xff]  ;;  %v3639_v61 = vpack.c.bf16 %v865_v50, %v865_v50  ;;  %v529_v35 = vadd.f32 1.0, %v3367_v27 }
  0xbc   : > { %1076 = vrot.lane.b32.xlu2 %v813_v14, %s3417_s25  ;;  %v998_v38 = vld [vmem:[#allocation2 + $0x34] sm:$0xff]  ;;  %1180 = vst.msk [vmem:[#allocation3 + $0xc] sm:$0xf] %vm544_vm1, %v1172_v31  ;;  %v3616_v41 = vpack.c.bf16 %v725_v36, %v725_v36  ;;  %v1495_v59 = vld [vmem:[#allocation2 + $0x64] sm:$0xff]  ;;  %v3650_v2 = vpack.c.bf16 %v1303_v55, %v1303_v55  ;;  %v514_v31 = vmul.f32 0.7978846, %v506_v15  ;;  %v493_v30 = vmul.f32 %v485_v32, %v469_v16 }
  0xbd   : > { %1022 = vrot.lane.b32.xlu1 %v3578_v18, %s3415_s23  ;;  %v1002_v42 = vld [vmem:[#allocation2 + $0x74] sm:$0xff]  ;;  %603 = vst.msk [vmem:[#allocation3 + $0x54] sm:$0xf] %vm544_vm1, %v3603_v34  ;;  %v3624_v48 = vpack.c.bf16 %v998_v38, %v998_v38  ;;  %v3656_v5 = vpack.c.bf16 %v1495_v59, %v1495_v59  ;;  %v1359_v10 = vld [vmem:[#allocation2 + $0x61] sm:$0xff]  ;;  %v3684_v37 = vmul.f32 %v529_v35, %v473_v20  ;;  %v444_v38 = vpop.f32.mrf.mxu1  ;;  %v885_v35 = vpop.permute.xlu1 %884 }
  0xbe   : > { %1132 = vrot.lane.b32.xlu0 %v3568_v13, %s3416_s24  ;;  %v729_v43 = vld [vmem:[#allocation2 + $0x73] sm:$0xff]  ;;  %990 = vst.msk [vmem:[#allocation3 + $0x40] sm:$0xf] %vm544_vm1, %v3616_v41  ;;  %v3632_v53 = vpack.c.bf16 %v1002_v42, %v1002_v42  ;;  %v1168_v14 = vld [vmem:[#allocation2 + $0x62] sm:$0xff]  ;;  %v1367_v21 = vpack.c.bf16 %v1359_v10, %v1359_v10  ;;  %3368 = vtanh.f32 %v514_v31  ;;  %v501_v40 = vmul.f32 %v493_v30, %v469_v16  ;;  %v829_v31 = vpop.permute.xlu0 %828 }
  0xbf   : > { %v3620_v46 = vpack.c.bf16 %v729_v43, %v729_v43  ;;  %v1165_v47 = vld [vmem:[#allocation2 + $0x32] sm:$0xff]  ;;  %607 = vst.msk [vmem:[#allocation3 + $0xc4] sm:$0xf] %vm544_vm1, %v3611_v39  ;;  %v1176_v33 = vpack.c.bf16 %v1168_v14, %v1168_v14  ;;  %v458_v42 = vmul.f32 %v3537_v23, %v444_v38  ;;  %v779_v10 = vld [vmem:[#allocation2 + $0x4] sm:$0xff] }
  0xc0   : > { %v1356_v49 = vld [vmem:[#allocation2 + $0x31] sm:$0xff]  ;;  %v1173_v56 = vpack.c.bf16 %v1165_v47, %v1165_v47  ;;  %798 = vst.msk [vmem:[#allocation3 + $0x58] sm:$0xf] %vm544_vm1, %v3624_v48  ;;  %v509_v43 = vadd.f32 %v501_v40, %v469_v16  ;;  %v787_v14 = vpack.c.bf16 %v779_v10, %v779_v10  ;;  %v584_v38 = vld [vmem:[#allocation2] sm:$0xff] }
  0xc1   : > { %v1304_v54 = vld [vmem:[#allocation2 + $0x70] sm:$0xff]  ;;  %994 = vst.msk [vmem:[#allocation3 + $0xb0] sm:$0xf] %vm544_vm1, %v3620_v46  ;;  %v1364_v60 = vpack.c.bf16 %v1356_v49, %v1356_v49  ;;  %v470_v44 = vadd.f32 %v3543_v24, %v458_v42  ;;  %v3290_v40 = vld [vmem:[%s4481_s4 + $0x20] sm:$0xff] }
  0xc2   : > { %v3643_v62 = vpack.c.bf16 %v1304_v54, %v1304_v54  ;;  %802 = vst.msk [vmem:[#allocation3 + $0xc8] sm:$0xf] %vm544_vm1, %v3632_v53  ;;  %v1249_v3 = vld [vmem:[#allocation2 + $0x74] sm:$0xff]  ;;  %v517_v49 = vmul.f32 0.7978846, %v509_v43  ;;  %v3694_v54 = vpop.permute.xlu2 %940  ;;  %v592_v43 = vpack.c.bf16 %v584_v38, %v584_v38  ;;  %v3298_v38 = vld [vmem:[%s4481_s4 + $0x60] sm:$0xff] }
  0xc3   : > { %1181 = vst.msk [vmem:[#allocation3 + $0x28] sm:$0xf] %vm544_vm1, %v1173_v56  ;;  %v1384_v6 = vld [vmem:[#allocation2 + $0x72] sm:$0xff]  ;;  %v486_v50 = vmul.f32 0.044715, %v470_v44  ;;  %v477_v56 = vmul.f32 0.5, %v469_v16 }
  0xc4   : > { %693 = vrot.lane.b32.xlu2 %v3566_v12, %s3417_s25  ;;  %1372 = vst.msk [vmem:[#allocation3 + $0x10] sm:$0xf] %vm544_vm1, %v1364_v60  ;;  %v921_v12 = vld [vmem:[#allocation2 + $0x62] sm:$0xff]  ;;  %v3668_v17 = vpack.c.bf16 %v1384_v6, %v1384_v6  ;;  %v1360_v25 = vld [vmem:[#allocation2 + $0x71] sm:$0xff]  ;;  %v3369_v47 = vpop.eup %3368  ;;  %3370 = vtanh.f32 %v517_v49  ;;  %v478_v4 = vmul.f32 0.5, %v470_v44 }
  0xc5   : > { %636 = vrot.lane.b32.xlu1 %v3568_v13, %s3415_s23  ;;  %v3662_v13 = vpack.c.bf16 %v1249_v3, %v1249_v3  ;;  %1567 = vst.msk [vmem:[#allocation3 + $0x68] sm:$0xf] %vm544_vm1, %v3643_v62  ;;  %v929_v28 = vpack.c.bf16 %v921_v12, %v921_v12  ;;  %v1368_v36 = vpack.c.bf16 %v1360_v25, %v1360_v25  ;;  %v530_v51 = vadd.f32 1.0, %v3369_v47  ;;  %v862_v3 = vld [vmem:[#allocation2 + $0x31] sm:$0xff] }
  0xc6   : > { %894 = vrot.lane.b32.xlu0 %v3639_v61, %s3417_s25  ;;  %1566 = vst.msk [vmem:[#allocation3 + $0x4c] sm:$0xf] %vm544_vm1, %v3650_v2  ;;  %v494_v23 = vmul.f32 %v486_v50, %v470_v44  ;;  %v3292_v12 = vld [vmem:[%s4481_s4 + $0x30] sm:$0xff]  ;;  %v3289_v49 = vld [vmem:[%s4481_s4 + $0x18] sm:$0xff] }
  0xc7   : > { %1758 = vst.msk [vmem:[#allocation3 + $0x50] sm:$0xf] %vm544_vm1, %v3656_v5  ;;  %v3702_v24 = vmul.f32 %v530_v51, %v474_v45  ;;  %2349 = vmatpush.bf16.msrb.mxu1 %v3292_v12  ;;  %v668_v25 = vld [vmem:[#allocation2 + $0x32] sm:$0xff]  ;;  %v1021_v51 = vpop.permute.xlu0 %1020  ;;  %v3299_v12 = vld [vmem:[%s4481_s4 + $0x68] sm:$0xff] }
  0xc8   : > { %1759 = vst.msk [vmem:[#allocation3 + $0x6c] sm:$0xf] %vm544_vm1, %v3662_v13  ;;  %v502_v52 = vmul.f32 %v494_v23, %v470_v44 }
  0xc9   : > { %1185 = vst.msk [vmem:[#allocation3 + $0x98] sm:$0xf] %vm544_vm1, %v3668_v17 }
  0xca   : > { %1375 = vst.msk [vmem:[#allocation3 + $0x64] sm:$0xf] %vm544_vm1, %v1367_v21  ;;  %v510_v55 = vadd.f32 %v502_v52, %v470_v44  ;;  %v3371_v57 = vpop.eup %3370  ;;  %v635_v60 = vpop.permute.xlu2 %634  ;;  %v3301_v44 = vld [vmem:[%s4481_s4 + $0x78] sm:$0xff] }
  0xcb   : > { %1184 = vst.msk [vmem:[#allocation3 + $0x7c] sm:$0xf] %vm544_vm1, %v1176_v33  ;;  %v533_v59 = vadd.f32 1.0, %v3371_v57  ;;  %v3745_v33 = vpack.c.bf16 %v668_v25, %v668_v25  ;;  %2377 = vmatpush.bf16.msra.mxu2 %v3301_v44  ;;  %v633_v52 = vpop.permute.xlu1 %632 }
  0xcc   : > { %950 = vrot.lane.b32.xlu2 %v929_v28, %s3416_s24  ;;  %573 = vst.msk [vmem:[#allocation2 + $0x42] sm:$0xff] %vm405_vm0, %v3684_v37  ;;  %v518_v58 = vmul.f32 0.7978846, %v510_v55 }
  0xcd   : > { %750 = vrot.lane.b32.xlu1 %v3580_v19, %s3416_s24  ;;  %1376 = vst.msk [vmem:[#allocation3 + $0x80] sm:$0xf] %vm544_vm1, %v1368_v36 }
  0xce   : > { %1140 = vrot.lane.b32.xlu0 %v3639_v61, %s3416_s24  ;;  %575 = vst.msk [vmem:[#allocation2 + $0x52] sm:$0xff] %vm405_vm0, %v3702_v24  ;;  %3372 = vtanh.f32 %v518_v58 }
  0xcf   : > { %658 = vst.msk [vmem:[#allocation3 + $0x1c] sm:$0xf] %vm656_vm2, %v635_v60  ;;  %v3288_v60 = vld [vmem:[%s4481_s4 + $0x10] sm:$0xff]  ;;  %2378 = vmatpush.bf16.msra.mxu2 %v3300_v1  ;;  %v692_v10 = vpop.permute.xlu0 %691 }
  0xd0   : > { %795 = vst.msk [vmem:[#allocation3 + $0x4] sm:$0xf] %vm544_vm1, %v787_v14 }
  0xd1   : > { %852 = vst.msk [vmem:[#allocation3 + $0x4] sm:$0xf] %vm656_vm2, %v829_v31 }
  0xd2   : > { %908 = vst.msk [vmem:[#allocation3 + $0x4] sm:$0xf] %vm713_vm3, %v885_v35  ;;  %v690_v47 = vpop.permute.xlu2 %689 }
  0xd3   : > { %v726_v15 = vld [vmem:[#allocation2 + $0x43] sm:$0xff]  ;;  %964 = vst.msk [vmem:[#allocation3 + $0x4] sm:$0xf] %vm770_vm4, %v3694_v54  ;;  %2379 = vmatpush.bf16.msra.mxu2 %v3299_v12 }
  0xd4   : > { %1084 = vrot.lane.b32.xlu2 %v3583_v22, %s3417_s25  ;;  %v3373_v6 = vpop.eup %3372  ;;  %v807_v16 = vld [vmem:[#allocation2 + $0x40] sm:$0xff]  ;;  %v3734_v20 = vpack.c.bf16 %v726_v15, %v726_v15  ;;  %600 = vst.msk [vmem:[#allocation3] sm:$0xf] %vm544_vm1, %v592_v43 }
  0xd5   : > { %838 = vrot.lane.b32.xlu1 %v3583_v22, %s3415_s23  ;;  %v3712_v22 = vmul.f32 %v533_v59, %v477_v56  ;;  %v534_v8 = vadd.f32 1.0, %v3373_v6  ;;  %v784_v21 = vld [vmem:[#allocation2 + $0x54] sm:$0xff]  ;;  %v3741_v32 = vpack.c.bf16 %v807_v16, %v807_v16  ;;  %v999_v30 = vld [vmem:[#allocation2 + $0x44] sm:$0xff]  ;;  %1044 = vst.msk [vmem:[#allocation3 + $0x8] sm:$0xf] %vm656_vm2, %v1021_v51  ;;  %v747_v16 = vpop.permute.xlu1 %746 }
  0xd6   : > { %1078 = vrot.lane.b32.xlu0 %v3603_v34, %s3417_s25  ;;  %v3737_v27 = vpack.c.bf16 %v784_v21, %v784_v21  ;;  %991 = vst.msk [vmem:[#allocation3 + $0x5c] sm:$0xf] %vm544_vm1, %v3734_v20  ;;  %v3761_v42 = vpack.c.bf16 %v999_v30, %v999_v30  ;;  %v727_v45 = vld [vmem:[#allocation2 + $0x53] sm:$0xff]  ;;  %v1357_v23 = vld [vmem:[#allocation2 + $0x41] sm:$0xff] }
  0xd7   : > { %581 = vst.msk [vmem:[#allocation2 + $0x82] sm:$0xff] %vm405_vm0, %v3712_v22  ;;  %v3724_v9 = vmul.f32 %v534_v8, %v478_v4  ;;  %v920_v50 = vld [vmem:[#allocation2 + $0x52] sm:$0xff]  ;;  %v3776_v54 = vpack.c.bf16 %v727_v45, %v727_v45  ;;  %v1740_v55 = vld [vmem:[#allocation2 + $0x44] sm:$0xff]  ;;  %v1365_v57 = vpack.c.bf16 %v1357_v23, %v1357_v23  ;;  %2380 = vmatpush.bf16.msra.mxu2 %v3298_v38 }
  0xd8   : > { %800 = vst.msk [vmem:[#allocation3 + $0x90] sm:$0xf] %vm544_vm1, %v3737_v27  ;;  %v3785_v56 = vpack.c.bf16 %v920_v50, %v920_v50  ;;  %v1748_v58 = vpack.c.bf16 %v1740_v55, %v1740_v55  ;;  %v866_v59 = vld [vmem:[#allocation2 + $0x71] sm:$0xff]  ;;  %v3287_v6 = vld [vmem:[%s4481_s4 + $0x8] sm:$0xff]  ;;  %v3286_v30 = vld [vmem:[%s4481_s4] sm:$0xff] }
  0xd9   : > { %583 = vst.msk [vmem:[#allocation2 + $0x92] sm:$0xff] %vm405_vm0, %v3724_v9  ;;  %v1741_v4 = vld [vmem:[#allocation2 + $0x54] sm:$0xff]  ;;  %v3806_v8 = vpack.c.bf16 %v866_v59, %v866_v59  ;;  %v919_v12 = vld [vmem:[#allocation2 + $0x42] sm:$0xff] }
  0xda   : > { %604 = vst.msk [vmem:[#allocation3 + $0x70] sm:$0xf] %vm544_vm1, %v3741_v32  ;;  %v1749_v21 = vpack.c.bf16 %v1741_v4, %v1741_v4  ;;  %v1358_v25 = vld [vmem:[#allocation2 + $0x51] sm:$0xff] }
  0xdb   : > { %1564 = vst.msk [vmem:[#allocation3 + $0x14] sm:$0xf] %vm544_vm1, %v3741_v32 }
  0xdc   : > { %701 = vrot.lane.b32.xlu2 %v929_v28, %s3417_s25  ;;  %v1055_v28 = vld [vmem:[#allocation2 + $0x50] sm:$0xff]  ;;  %799 = vst.msk [vmem:[#allocation3 + $0x74] sm:$0xf] %vm544_vm1, %v3761_v42 }
  0xdd   : > { %1030 = vrot.lane.b32.xlu1 %v3591_v29, %s3415_s23  ;;  %v870_v29 = vpack.c.bf16 %v862_v3, %v862_v3  ;;  %v3752_v36 = vpack.c.bf16 %v1055_v28, %v1055_v28  ;;  %657 = vst.msk [vmem:[#allocation3] sm:$0xf] %vm656_vm2, %v633_v52  ;;  %v922_v52 = vld [vmem:[#allocation2 + $0x72] sm:$0xff] }
  0xde   : > { %832 = vrot.lane.b32.xlu0 %v3603_v34, %s3415_s23  ;;  %714 = vst.msk [vmem:[#allocation3] sm:$0xf] %vm713_vm3, %v690_v47  ;;  %v979_v3 = vld [vmem:[#allocation2 + $0x83] sm:$0xff] }
  0xdf   : > { %605 = vst.msk [vmem:[#allocation3 + $0x8c] sm:$0xf] %vm544_vm1, %v3752_v36  ;;  %v3811_v14 = vpack.c.bf16 %v979_v3, %v979_v3  ;;  %v1250_v15 = vld [vmem:[#allocation2 + $0x84] sm:$0xff] }
  0xe0   : > { %992 = vst.msk [vmem:[#allocation3 + $0x78] sm:$0xf] %vm544_vm1, %v3776_v54  ;;  %v1633_v28 = vld [vmem:[#allocation2 + $0x92] sm:$0xff]  ;;  %v3823_v35 = vpack.c.bf16 %v1250_v15, %v1250_v15  ;;  %v1552_v55 = vld [vmem:[#allocation2 + $0x80] sm:$0xff] }
  0xe1   : > { %1565 = vst.msk [vmem:[#allocation3 + $0x30] sm:$0xf] %vm544_vm1, %v3752_v36  ;;  %v3833_v43 = vpack.c.bf16 %v1633_v28, %v1633_v28  ;;  %v1251_v50 = vld [vmem:[#allocation2 + $0x94] sm:$0xff]  ;;  %v1361_v59 = vld [vmem:[#allocation2 + $0x81] sm:$0xff] }
  0xe2   : > { %1183 = vst.msk [vmem:[#allocation3 + $0x60] sm:$0xf] %vm544_vm1, %v3785_v56  ;;  %v3853_v23 = vpack.c.bf16 %v1251_v50, %v1251_v50  ;;  %v1170_v1 = vld [vmem:[#allocation2 + $0x82] sm:$0xff]  ;;  %v1362_v3 = vld [vmem:[#allocation2 + $0x91] sm:$0xff] }
  0xe3   : > { %1373 = vst.msk [vmem:[#allocation3 + $0x2c] sm:$0xf] %vm544_vm1, %v1365_v57  ;;  %v3859_v57 = vpack.c.bf16 %v922_v52, %v922_v52  ;;  %v1178_v4 = vpack.c.bf16 %v1170_v1, %v1170_v1  ;;  %v863_v15 = vld [vmem:[#allocation2 + $0x41] sm:$0xff]  ;;  %v3308_v1 = vld [vmem:[%s4481_s4 + $0xb0] sm:$0xff] }
  0xe4   : > { %888 = vrot.lane.b32.xlu2 %v870_v29, %s3417_s25  ;;  %1756 = vst.msk [vmem:[#allocation3 + $0x18] sm:$0xf] %vm544_vm1, %v1748_v58  ;;  %v1560_v58 = vpack.c.bf16 %v1552_v55, %v1552_v55  ;;  %v1058_v52 = vld [vmem:[#allocation2 + $0x80] sm:$0xff] }
  0xe5   : > { %644 = vrot.lane.b32.xlu1 %v3639_v61, %s3415_s23  ;;  %v3291_v61 = vld [vmem:[%s4481_s4 + $0x28] sm:$0xff]  ;;  %715 = vst.msk [vmem:[#allocation3 + $0x1c] sm:$0xf] %vm713_vm3, %v692_v10  ;;  %v3258_v55 = vld [vmem:[#allocation3 + $0x4] sm:$0xf] }
  0xe6   : > { %1024 = vrot.lane.b32.xlu0 %v3624_v48, %s3415_s23  ;;  %2350 = vmatpush.bf16.msrb.mxu1 %v3291_v61  ;;  %v749_v61 = vpop.permute.xlu2 %748  ;;  %771 = vst.msk [vmem:[#allocation3] sm:$0xf] %vm770_vm4, %v747_v16  ;;  %v3880_v16 = vpack.c.bf16 %v919_v12, %v919_v12 }
  0xe7   : > { %772 = vst.msk [vmem:[#allocation3 + $0x1c] sm:$0xf] %vm770_vm4, %v749_v61  ;;  %v3294_v61 = vld [vmem:[%s4481_s4 + $0x40] sm:$0xff] }
  0xe8   : > { %995 = vst.msk [vmem:[#allocation3 + $0xcc] sm:$0xf] %vm544_vm1, %v3811_v14 }
  0xe9   : > { %1757 = vst.msk [vmem:[#allocation3 + $0x34] sm:$0xf] %vm544_vm1, %v1749_v21  ;;  %v871_v21 = vpack.c.bf16 %v863_v15, %v863_v15  ;;  %v3306_v15 = vld [vmem:[%s4481_s4 + $0xa0] sm:$0xff] }
  0xea   : > { %2351 = vmatpush.bf16.msrb.mxu1 %v3290_v40  ;;  %v1366_v40 = vpack.c.bf16 %v1358_v25, %v1358_v25  ;;  %1760 = vst.msk [vmem:[#allocation3 + $0x88] sm:$0xf] %vm544_vm1, %v3823_v35 }
  0xeb   : > { %1187 = vst.msk [vmem:[#allocation3 + $0xd0] sm:$0xf] %vm544_vm1, %v3833_v43 }
  0xec   : > { %638 = vrot.lane.b32.xlu2 %v870_v29, %s3415_s23  ;;  %1374 = vst.msk [vmem:[#allocation3 + $0x48] sm:$0xf] %vm544_vm1, %v1366_v40 }
  0xed   : > { %758 = vrot.lane.b32.xlu1 %v3585_v26, %s3416_s24  ;;  %v2922_v45 = vld [vmem:[#allocation3] sm:$0xf]  ;;  %1761 = vst.msk [vmem:[#allocation3 + $0xa4] sm:$0xf] %vm544_vm1, %v3853_v23 }
  0xee   : > { %695 = vrot.lane.b32.xlu0 %v3745_v33, %s3417_s25  ;;  %2352 = vmatpush.bf16.msrb.mxu1 %v3289_v49  ;;  %v3261_v44 = vld [vmem:[#allocation3 + $0x18] sm:$0xf0]  ;;  %v1306_v49 = vld [vmem:[#allocation2 + $0x90] sm:$0xff]  ;;  %1568 = vst.msk [vmem:[#allocation3 + $0x84] sm:$0xf] %vm544_vm1, %v1560_v58 }
  0xef   : > { %v2923_v47 = vor.u32 %v3261_v44, %v2922_v45  ;;  %v3851_v51 = vpack.c.bf16 %v1306_v49, %v1306_v49  ;;  %1186 = vst.msk [vmem:[#allocation3 + $0xb4] sm:$0xf] %vm544_vm1, %v1178_v4  ;;  %v923_v44 = vld [vmem:[#allocation2 + $0x82] sm:$0xff]  ;;  %v3309_v58 = vld [vmem:[%s4481_s4 + $0xb8] sm:$0xff] }
  0xf0   : > { %v3903_v45 = vpack.c.bf16 %v923_v44, %v923_v44  ;;  %2406 = vmatpush.bf16.msra.mxu3 %v3309_v58 }
  0xf1   : > { %1569 = vst.msk [vmem:[#allocation3 + $0xa0] sm:$0xf] %vm544_vm1, %v3851_v51 }
  0xf2   : > { %2353 = vmatpush.bf16.msrb.mxu1 %v3288_v60  ;;  %v1369_v60 = vpack.c.bf16 %v1361_v59, %v1361_v59 }
  0xf4   : > { %752 = vrot.lane.b32.xlu2 %v3616_v41, %s3416_s24  ;;  %1377 = vst.msk [vmem:[#allocation3 + $0x9c] sm:$0xf] %vm544_vm1, %v1369_v60  ;;  %v3918_v60 = vpack.c.bf16 %v1058_v52, %v1058_v52  ;;  %2407 = vmatpush.bf16.msra.mxu3 %v3308_v1  ;;  %v3303_v52 = vld [vmem:[%s4481_s4 + $0x88] sm:$0xff] }
  0xf5   : > { %1134 = vrot.lane.b32.xlu1 %v870_v29, %s3416_s24  ;;  %v1166_v29 = vld [vmem:[#allocation2 + $0x42] sm:$0xff] }
  0xf6   : > { %1086 = vrot.lane.b32.xlu0 %v3611_v39, %s3417_s25  ;;  %v1174_v31 = vpack.c.bf16 %v1166_v29, %v1166_v29  ;;  %2354 = vmatpush.bf16.msrb.mxu1 %v3287_v6  ;;  %v1370_v6 = vpack.c.bf16 %v1362_v3, %v1362_v3  ;;  %v3295_v29 = vld [vmem:[%s4481_s4 + $0x48] sm:$0xff] }
  0xf8   : > { %1182 = vst.msk [vmem:[#allocation3 + $0x44] sm:$0xf] %vm544_vm1, %v1174_v31  ;;  %v867_v31 = vld [vmem:[#allocation2 + $0x81] sm:$0xff] }
  0xf9   : > { %1378 = vst.msk [vmem:[#allocation3 + $0xb8] sm:$0xf] %vm544_vm1, %v1370_v6 }
  0xfa   : > { %2355 = vmatpush.bf16.msrb.mxu1 %v3286_v30  ;;  %v3893_v30 = vpack.c.bf16 %v867_v31, %v867_v31 }
  0xfc   : > { %896 = vrot.lane.b32.xlu2 %v3806_v8, %s3417_s25 }
  0xfd   : > { %944 = vrot.lane.b32.xlu1 %v3745_v33, %s3416_s24  ;;  %2356 = vmatmul.bf16.vlgmr.msrb.gmra.mxu1 %v2923_v47 }
  0xfe   : > { %840 = vrot.lane.b32.xlu0 %v3611_v39, %s3415_s23  ;;  %v3297_v39 = vld [vmem:[%s4481_s4 + $0x58] sm:$0xff] }
  0xff   : > { %2381 = vmatpush.bf16.msra.mxu2 %v3297_v39 }
 0x104   : > { %646 = vrot.lane.b32.xlu2 %v3806_v8, %s3415_s23 }
 0x105   : > { %1142 = vrot.lane.b32.xlu1 %v3806_v8, %s3416_s24 }
 0x106   : > { %1032 = vrot.lane.b32.xlu0 %v3632_v53, %s3415_s23  ;;  %v3296_v53 = vld [vmem:[%s4481_s4 + $0x50] sm:$0xff] }
 0x107   : > { %2382 = vmatpush.bf16.msra.mxu2 %v3296_v53 }
 0x10b   : > { %2383 = vmatpush.bf16.msra.mxu2 %v3295_v29  ;;  %v1003_v29 = vld [vmem:[#allocation2 + $0x84] sm:$0xff] }
 0x10c   : > { %760 = vrot.lane.b32.xlu2 %v3620_v46, %s3416_s24  ;;  %v3933_v12 = vpack.c.bf16 %v1003_v29, %v1003_v29 }
 0x10d   : > { %952 = vrot.lane.b32.xlu1 %v3859_v57, %s3416_s24 }
 0x10e   : > { %703 = vrot.lane.b32.xlu0 %v3859_v57, %s3417_s25  ;;  %v943_v10 = vpop.permute.xlu2 %942 }
 0x10f   : > { %2384 = vmatpush.bf16.msra.mxu2 %v3294_v61 }
 0x114   : > { %946 = vrot.lane.b32.xlu2 %v3880_v16, %s3416_s24 }
 0x115   : > { %834 = vrot.lane.b32.xlu1 %v3741_v32, %s3415_s23 }
 0x116   : > { %890 = vrot.lane.b32.xlu0 %v871_v21, %s3417_s25  ;;  %v1077_v25 = vpop.permute.xlu2 %1076 }
 0x117   : > { %1100 = vst.msk [vmem:[#allocation3 + $0x8] sm:$0xf] %vm713_vm3, %v1077_v25 }
 0x11c   : > { %1080 = vrot.lane.b32.xlu2 %v3741_v32, %s3417_s25 }
 0x11d   : > { %1026 = vrot.lane.b32.xlu1 %v3761_v42, %s3415_s23 }
 0x11e   : > { %1136 = vrot.lane.b32.xlu0 %v871_v21, %s3416_s24  ;;  %v694_v28 = vpop.permute.xlu2 %693 }
 0x124   : > { %697 = vrot.lane.b32.xlu2 %v3880_v16, %s3417_s25 }
 0x125   : > { %640 = vrot.lane.b32.xlu1 %v871_v21, %s3415_s23 }
 0x126   : > { %898 = vrot.lane.b32.xlu0 %v3893_v30, %s3417_s25  ;;  %v951_v40 = vpop.permute.xlu2 %950 }
 0x127   : > { %v887_v38 = vpop.permute.xlu1 %886 }
 0x128   : > { %v831_v39 = vpop.permute.xlu0 %830 }
 0x129   : > { %853 = vst.msk [vmem:[#allocation3 + $0x20] sm:$0xf] %vm656_vm2, %v831_v39  ;;  %v3304_v39 = vld [vmem:[%s4481_s4 + $0x90] sm:$0xff] }
 0x12a   : > { %909 = vst.msk [vmem:[#allocation3 + $0x20] sm:$0xf] %vm713_vm3, %v887_v38  ;;  %v3305_v38 = vld [vmem:[%s4481_s4 + $0x98] sm:$0xff] }
 0x12b   : > { %965 = vst.msk [vmem:[#allocation3 + $0x20] sm:$0xf] %vm770_vm4, %v943_v10  ;;  %v3307_v10 = vld [vmem:[%s4481_s4 + $0xa8] sm:$0xff] }
 0x12c   : > { %954 = vrot.lane.b32.xlu2 %v3903_v45, %s3416_s24  ;;  %2408 = vmatpush.bf16.msra.mxu3 %v3307_v10  ;;  %v1059_v10 = vld [vmem:[#allocation2 + $0x90] sm:$0xff] }
 0x12d   : > { %754 = vrot.lane.b32.xlu1 %v3734_v20, %s3416_s24 }
 0x12e   : > { %1144 = vrot.lane.b32.xlu0 %v3893_v30, %s3416_s24  ;;  %v3911_v49 = vpop.permute.xlu2 %1084 }
 0x12f   : > { %v1023_v47 = vpop.permute.xlu1 %1022 }
 0x130   : > { %1045 = vst.msk [vmem:[#allocation3 + $0x24] sm:$0xf] %vm656_vm2, %v1023_v47  ;;  %v1133_v50 = vpop.permute.xlu0 %1132  ;;  %2409 = vmatpush.bf16.msra.mxu3 %v3306_v15  ;;  %v1067_v15 = vpack.c.bf16 %v1059_v10, %v1059_v10  ;;  %v1574_v10 = vld [vmem:[#allocation2 + $0x61] sm:$0xff] }
 0x131   : > { %1156 = vst.msk [vmem:[#allocation3 + $0x8] sm:$0xf] %vm770_vm4, %v1133_v50 }
 0x132   : > { %v2924_v53 = vld [vmem:[#allocation3 + $0x1c] sm:$0xf0] }
 0x133   : > { %v2927_v59 = vor.u32 %v3258_v55, %v2924_v53 }
 0x134   : > { %1088 = vrot.lane.b32.xlu2 %v3918_v60, %s3417_s25  ;;  %2410 = vmatpush.bf16.msra.mxu3 %v3305_v38 }
 0x135   : > { %2385 = vmatmul.bf16.vlgmr.msra.gmra.mxu2 %v2927_v59  ;;  %842 = vrot.lane.b32.xlu1 %v3918_v60, %s3415_s23  ;;  %v1115_v59 = vld [vmem:[#allocation2 + $0x91] sm:$0xff] }
 0x136   : > { %1596 = vrot.lane.b32.xlu0 %v871_v21, %s3415_s23  ;;  %v702_v3 = vpop.permute.xlu2 %701  ;;  %v3976_v1 = vpack.c.bf16 %v1115_v59, %v1115_v59 }
 0x137   : > { %v637_v4 = vpop.permute.xlu1 %636 }
 0x138   : > { %v895_v6 = vpop.permute.xlu0 %894  ;;  %659 = vst.msk [vmem:[#allocation3 + $0x38] sm:$0xf] %vm656_vm2, %v637_v4  ;;  %2411 = vmatpush.bf16.msra.mxu3 %v3304_v39 }
 0x139   : > { %716 = vst.msk [vmem:[#allocation3 + $0x38] sm:$0xf] %vm713_vm3, %v694_v28  ;;  %v1111_v28 = vld [vmem:[#allocation2 + $0x51] sm:$0xff] }
 0x13a   : > { %v1119_v31 = vpack.c.bf16 %v1111_v28, %v1111_v28 }
 0x13c   : > { %1652 = vrot.lane.b32.xlu2 %v3880_v16, %s3417_s25  ;;  %2412 = vmatpush.bf16.msra.mxu3 %v3303_v52 }
 0x13d   : > { %1034 = vrot.lane.b32.xlu1 %v3933_v12, %s3415_s23 }
 0x13e   : > { %1082 = vrot.lane.b32.xlu0 %v3752_v36, %s3417_s25  ;;  %v889_v21 = vpop.permute.xlu2 %888 }
 0x13f   : > { %v751_v61 = vpop.permute.xlu1 %750 }
 0x140   : > { %v3944_v25 = vpop.permute.xlu0 %1140  ;;  %773 = vst.msk [vmem:[#allocation3 + $0x38] sm:$0xf] %vm770_vm4, %v751_v61 }
 0x144   : > { %892 = vrot.lane.b32.xlu2 %v1119_v31, %s3417_s25 }
 0x145   : > { %1138 = vrot.lane.b32.xlu1 %v1119_v31, %s3416_s24 }
 0x146   : > { %836 = vrot.lane.b32.xlu0 %v3752_v36, %s3415_s23  ;;  %v639_v47 = vpop.permute.xlu2 %638 }
 0x147   : > { %v839_v44 = vpop.permute.xlu1 %838  ;;  %660 = vst.msk [vmem:[#allocation3 + $0x54] sm:$0xf] %vm656_vm2, %v639_v47  ;;  %v2950_v39 = vld [vmem:[#allocation3 + $0x38] sm:$0xf] }
 0x148   : > { %857 = vst.msk [vmem:[#allocation3 + $0x90] sm:$0xf] %vm656_vm2, %v839_v44  ;;  %v1079_v50 = vpop.permute.xlu0 %1078 }
 0x149   : > { %913 = vst.msk [vmem:[#allocation3 + $0x90] sm:$0xf] %vm713_vm3, %v895_v6 }
 0x14a   : > { %969 = vst.msk [vmem:[#allocation3 + $0x90] sm:$0xf] %vm770_vm4, %v951_v40  ;;  %v3302_v40 = vld [vmem:[%s4481_s4 + $0x80] sm:$0xff] }
 0x14b   : > { %1101 = vst.msk [vmem:[#allocation3 + $0x24] sm:$0xf] %vm713_vm3, %v1079_v50  ;;  %2413 = vmatpush.bf16.msra.mxu3 %v3302_v40  ;;  %v2930_v50 = vld [vmem:[#allocation3 + $0x8] sm:$0xf] }
 0x14c   : > { %642 = vrot.lane.b32.xlu2 %v1119_v31, %s3415_s23 }
 0x14d   : > { %948 = vrot.lane.b32.xlu1 %v3785_v56, %s3416_s24 }
 0x14e   : > { %1028 = vrot.lane.b32.xlu0 %v3737_v27, %s3415_s23  ;;  %v753_v53 = vpop.permute.xlu2 %752 }
 0x14f   : > { %v1031_v55 = vpop.permute.xlu1 %1030 }
 0x150   : > { %1049 = vst.msk [vmem:[#allocation3 + $0x94] sm:$0xf] %vm656_vm2, %v1031_v55  ;;  %v833_v58 = vpop.permute.xlu0 %832 }
 0x151   : > { %854 = vst.msk [vmem:[#allocation3 + $0x3c] sm:$0xf] %vm656_vm2, %v833_v58 }
 0x152   : > { %910 = vst.msk [vmem:[#allocation3 + $0x3c] sm:$0xf] %vm713_vm3, %v889_v21 }
 0x154   : > { %756 = vrot.lane.b32.xlu2 %v3776_v54, %s3416_s24 }
 0x155   : > { %1146 = vrot.lane.b32.xlu1 %v3976_v1, %s3416_s24 }
 0x156   : > { %699 = vrot.lane.b32.xlu0 %v3785_v56, %s3417_s25  ;;  %v897_v6 = vpop.permute.xlu2 %896 }
 0x157   : > { %v645_v4 = vpop.permute.xlu1 %644 }
 0x158   : > { %663 = vst.msk [vmem:[#allocation3 + $0xa8] sm:$0xf] %vm656_vm2, %v645_v4  ;;  %v1025_v29 = vpop.permute.xlu0 %1024  ;;  %v1630_v4 = vld [vmem:[#allocation2 + $0x62] sm:$0xff] }
 0x159   : > { %720 = vst.msk [vmem:[#allocation3 + $0xa8] sm:$0xf] %vm713_vm3, %v702_v3 }
 0x15a   : > { %1046 = vst.msk [vmem:[#allocation3 + $0x40] sm:$0xf] %vm656_vm2, %v1025_v29 }
 0x15c   : > { %1214 = vrot.lane.b32.xlu2 %v3616_v41, %s3415_s23 }
 0x15d   : > { %1598 = vrot.lane.b32.xlu1 %v1119_v31, %s3415_s23 }
 0x15e   : > { %1090 = vrot.lane.b32.xlu0 %v1067_v15, %s3417_s25  ;;  %v647_v21 = vpop.permute.xlu2 %646  ;;  %v1582_v15 = vpack.c.bf16 %v1574_v10, %v1574_v10 }
 0x15f   : > { %v759_v61 = vpop.permute.xlu1 %758  ;;  %664 = vst.msk [vmem:[#allocation3 + $0xc4] sm:$0xf] %vm656_vm2, %v647_v21 }
 0x160   : > { %777 = vst.msk [vmem:[#allocation3 + $0xa8] sm:$0xf] %vm770_vm4, %v759_v61  ;;  %v696_v28 = vpop.permute.xlu0 %695 }
 0x161   : > { %717 = vst.msk [vmem:[#allocation3 + $0x54] sm:$0xf] %vm713_vm3, %v696_v28 }
 0x162   : > { %774 = vst.msk [vmem:[#allocation3 + $0x54] sm:$0xf] %vm770_vm4, %v753_v53 }
 0x164   : > { %1268 = vrot.lane.b32.xlu2 %v3578_v18, %s3417_s25 }
 0x165   : > { %1212 = vrot.lane.b32.xlu1 %v3580_v19, %s3415_s23 }
 0x166   : > { %1654 = vrot.lane.b32.xlu0 %v3785_v56, %s3417_s25  ;;  %v761_v31 = vpop.permute.xlu2 %760 }
 0x167   : > { %v1135_v3 = vpop.permute.xlu1 %1134 }
 0x168   : > { %1157 = vst.msk [vmem:[#allocation3 + $0x24] sm:$0xf] %vm770_vm4, %v1135_v3  ;;  %v1087_v38 = vpop.permute.xlu0 %1086 }
 0x169   : > { %1105 = vst.msk [vmem:[#allocation3 + $0x94] sm:$0xf] %vm713_vm3, %v1087_v38  ;;  %v3268_v44 = vld [vmem:[#allocation3 + $0x50] sm:$0xf0] }
 0x16a   : > { %v2951_v47 = vor.u32 %v3268_v44, %v2950_v39 }
 0x16c   : > { %2361 = vmatmul.bf16.gmra.mxu1 %v2951_v47  ;;  %1326 = vrot.lane.b32.xlu2 %v3741_v32, %s3416_s24 }
 0x16d   : > { %1710 = vrot.lane.b32.xlu1 %v3776_v54, %s3416_s24 }
 0x16e   : > { %1708 = vrot.lane.b32.xlu0 %v3734_v20, %s3416_s24  ;;  %v947_v19 = vpop.permute.xlu2 %946 }
 0x16f   : > { %v945_v18 = vpop.permute.xlu1 %944  ;;  %v3262_v52 = vld [vmem:[#allocation3 + $0x20] sm:$0xf0] }
 0x170   : > { %966 = vst.msk [vmem:[#allocation3 + $0x3c] sm:$0xf] %vm770_vm4, %v945_v18  ;;  %v841_v55 = vpop.permute.xlu0 %840  ;;  %v2931_v53 = vor.u32 %v3262_v52, %v2930_v50  ;;  %v1439_v50 = vld [vmem:[#allocation2 + $0x63] sm:$0xff] }
 0x171   : > { %858 = vst.msk [vmem:[#allocation3 + $0xac] sm:$0xf] %vm656_vm2, %v841_v55  ;;  %v1447_v52 = vpack.c.bf16 %v1439_v50, %v1439_v50  ;;  %v3317_v55 = vld [vmem:[%s4481_s4 + $0xf8] sm:$0xff] }
 0x172   : > { %914 = vst.msk [vmem:[#allocation3 + $0xac] sm:$0xf] %vm713_vm3, %v897_v6  ;;  %2414 = vmatmul.bf16.vlgmr.msra.gmra.mxu3 %v2931_v53  ;;  %v1638_v6 = vpack.c.bf16 %v1630_v4, %v1630_v4  ;;  %2435 = vmatpush.bf16.msrb.mxu0 %v3317_v55  ;;  %v3329_v4 = vld [vmem:[%s4481_s4 + $0x158] sm:$0xff] }
 0x174   : > { %1460 = vrot.lane.b32.xlu2 %v3616_v41, %s3417_s25 }
 0x175   : > { %1324 = vrot.lane.b32.xlu1 %v3603_v34, %s3416_s24 }
 0x176   : > { %1270 = vrot.lane.b32.xlu0 %v3624_v48, %s3417_s25  ;;  %v1081_v40 = vpop.permute.xlu2 %1080 }
 0x177   : > { %v1143_v32 = vpop.permute.xlu1 %1142  ;;  %1102 = vst.msk [vmem:[#allocation3 + $0x40] sm:$0xf] %vm713_vm3, %v1081_v40  ;;  %v3265_v28 = vld [vmem:[#allocation3 + $0x3c] sm:$0xf]  ;;  %v3330_v40 = vld [vmem:[%s4481_s4 + $0x160] sm:$0xff] }
 0x178   : > { %1161 = vst.msk [vmem:[#allocation3 + $0x94] sm:$0xf] %vm770_vm4, %v1143_v32  ;;  %v1033_v58 = vpop.permute.xlu0 %1032 }
 0x179   : > { %1050 = vst.msk [vmem:[#allocation3 + $0xb0] sm:$0xf] %vm656_vm2, %v1033_v58 }
 0x17a   : > { %v2357_v53 = vpop.f32.mrf.mxu1 }
 0x17c   : > { %1518 = vrot.lane.b32.xlu2 %v3761_v42, %s3416_s24 }
 0x17d   : > { %1406 = vrot.lane.b32.xlu1 %v3880_v16, %s3415_s23 }
 0x17e   : > { %1404 = vrot.lane.b32.xlu0 %v3745_v33, %s3415_s23  ;;  %v698_v41 = vpop.permute.xlu2 %697 }
 0x17f   : > { %v953_v34 = vpop.permute.xlu1 %952 }
 0x180   : > { %970 = vst.msk [vmem:[#allocation3 + $0xac] sm:$0xf] %vm770_vm4, %v953_v34  ;;  %v704_v59 = vpop.permute.xlu0 %703 }
 0x181   : > { %721 = vst.msk [vmem:[#allocation3 + $0xc4] sm:$0xf] %vm713_vm3, %v704_v59 }
 0x182   : > { %778 = vst.msk [vmem:[#allocation3 + $0xc4] sm:$0xf] %vm770_vm4, %v761_v31 }
 0x184   : > { %1656 = vrot.lane.b32.xlu2 %v1638_v6, %s3417_s25 }
 0x185   : > { %1516 = vrot.lane.b32.xlu1 %v3624_v48, %s3416_s24 }
 0x186   : > { %1462 = vrot.lane.b32.xlu0 %v3734_v20, %s3417_s25  ;;  %v955_v16 = vpop.permute.xlu2 %954 }
 0x187   : > { %v835_v33 = vpop.permute.xlu1 %834 }
 0x188   : > { %v891_v29 = vpop.permute.xlu0 %890  ;;  %855 = vst.msk [vmem:[#allocation3 + $0x58] sm:$0xf] %vm656_vm2, %v835_v33 }
 0x189   : > { %911 = vst.msk [vmem:[#allocation3 + $0x58] sm:$0xf] %vm713_vm3, %v891_v29 }
 0x18a   : > { %967 = vst.msk [vmem:[#allocation3 + $0x58] sm:$0xf] %vm770_vm4, %v947_v19 }
 0x18c   : > { %1218 = vrot.lane.b32.xlu2 %v3776_v54, %s3415_s23 }
 0x18d   : > { %1602 = vrot.lane.b32.xlu1 %v3806_v8, %s3415_s23 }
 0x18e   : > { %1600 = vrot.lane.b32.xlu0 %v1582_v15, %s3415_s23  ;;  %v1089_v61 = vpop.permute.xlu2 %1088 }
 0x18f   : > { %v1027_v48 = vpop.permute.xlu1 %1026  ;;  %1106 = vst.msk [vmem:[#allocation3 + $0xb0] sm:$0xf] %vm713_vm3, %v1089_v61  ;;  %v3313_v61 = vld [vmem:[%s4481_s4 + $0xd8] sm:$0xff] }
 0x190   : > { %v1137_v21 = vpop.permute.xlu0 %1136  ;;  %1047 = vst.msk [vmem:[#allocation3 + $0x5c] sm:$0xf] %vm656_vm2, %v1027_v48 }
 0x191   : > { %1158 = vst.msk [vmem:[#allocation3 + $0x40] sm:$0xf] %vm770_vm4, %v1137_v21  ;;  %v2952_v3 = vld [vmem:[#allocation3 + $0x54] sm:$0xf0] }
 0x192   : > { %v2955_v31 = vor.u32 %v3265_v28, %v2952_v3  ;;  %v2980_v28 = vld [vmem:[#allocation3 + $0x8c] sm:$0xf0]  ;;  %v3326_v3 = vld [vmem:[%s4481_s4 + $0x140] sm:$0xff] }
 0x194   : > { %2390 = vmatmul.bf16.gmra.mxu2 %v2955_v31  ;;  %1272 = vrot.lane.b32.xlu2 %v3761_v42, %s3417_s25 }
 0x195   : > { %1216 = vrot.lane.b32.xlu1 %v3734_v20, %s3415_s23 }
 0x196   : > { %1658 = vrot.lane.b32.xlu0 %v3859_v57, %s3417_s25  ;;  %v1653_v8 = vpop.permute.xlu2 %1652 }
 0x197   : > { %v641_v38 = vpop.permute.xlu1 %640 }
 0x198   : > { %v899_v39 = vpop.permute.xlu0 %898  ;;  %661 = vst.msk [vmem:[#allocation3 + $0x70] sm:$0xf] %vm656_vm2, %v641_v38  ;;  %v1689_v38 = vld [vmem:[#allocation2 + $0x93] sm:$0xff] }
 0x199   : > { %718 = vst.msk [vmem:[#allocation3 + $0x70] sm:$0xf] %vm713_vm3, %v698_v41 }
 0x19c   : > { %1330 = vrot.lane.b32.xlu2 %v3650_v2, %s3416_s24 }
 0x19d   : > { %1714 = vrot.lane.b32.xlu1 %v3620_v46, %s3416_s24 }
 0x19e   : > { %1712 = vrot.lane.b32.xlu0 %v3585_v26, %s3416_s24  ;;  %v893_v42 = vpop.permute.xlu2 %892  ;;  %v3333_v26 = vld [vmem:[%s4481_s4 + $0x178] sm:$0xff] }
 0x19f   : > { %v755_v20 = vpop.permute.xlu1 %754  ;;  %2493 = vmatpush.bf16.msrb.mxu2 %v3333_v26  ;;  %v1578_v26 = vld [vmem:[#allocation2 + $0xa1] sm:$0xff] }
 0x1a0   : > { %v1145_v44 = vpop.permute.xlu0 %1144  ;;  %775 = vst.msk [vmem:[#allocation3 + $0x70] sm:$0xf] %vm770_vm4, %v755_v20  ;;  %v3324_v20 = vld [vmem:[%s4481_s4 + $0x130] sm:$0xff] }
 0x1a1   : > { %1162 = vst.msk [vmem:[#allocation3 + $0xb0] sm:$0xf] %vm770_vm4, %v1145_v44  ;;  %v3335_v44 = vld [vmem:[%s4481_s4 + $0x188] sm:$0xff] }
 0x1a2   : > { %2528 = vmatpush.bf16.msrb.mxu3 %v3335_v44 }
 0x1a4   : > { %1464 = vrot.lane.b32.xlu2 %v3776_v54, %s3417_s25 }
 0x1a5   : > { %1328 = vrot.lane.b32.xlu1 %v3752_v36, %s3416_s24  ;;  %v3332_v36 = vld [vmem:[%s4481_s4 + $0x170] sm:$0xff] }
 0x1a6   : > { %1274 = vrot.lane.b32.xlu0 %v3737_v27, %s3417_s25  ;;  %v643_v2 = vpop.permute.xlu2 %642  ;;  %2494 = vmatpush.bf16.msrb.mxu2 %v3332_v36 }
 0x1a7   : > { %v843_v47 = vpop.permute.xlu1 %842  ;;  %662 = vst.msk [vmem:[#allocation3 + $0x8c] sm:$0xf] %vm656_vm2, %v643_v2  ;;  %v3311_v2 = vld [vmem:[%s4481_s4 + $0xc8] sm:$0xff] }
 0x1a8   : > { %v1597_v57 = vpop.permute.xlu0 %1596  ;;  %859 = vst.msk [vmem:[#allocation3 + $0xc8] sm:$0xf] %vm656_vm2, %v843_v47 }
 0x1a9   : > { %1620 = vst.msk [vmem:[#allocation3 + $0x14] sm:$0xf] %vm656_vm2, %v1597_v57 }
 0x1aa   : > { %1676 = vst.msk [vmem:[#allocation3 + $0x14] sm:$0xf] %vm713_vm3, %v1653_v8 }
 0x1ab   : > { %915 = vst.msk [vmem:[#allocation3 + $0xc8] sm:$0xf] %vm713_vm3, %v899_v39  ;;  %v3312_v39 = vld [vmem:[%s4481_s4 + $0xd0] sm:$0xff] }
 0x1ac   : > { %971 = vst.msk [vmem:[#allocation3 + $0xc8] sm:$0xf] %vm770_vm4, %v955_v16  ;;  %1522 = vrot.lane.b32.xlu2 %v3656_v5, %s3416_s24  ;;  %v3328_v16 = vld [vmem:[%s4481_s4 + $0x150] sm:$0xff] }
 0x1ad   : > { %1410 = vrot.lane.b32.xlu1 %v1638_v6, %s3415_s23  ;;  %v3315_v6 = vld [vmem:[%s4481_s4 + $0xe8] sm:$0xff] }
 0x1ae   : > { %1408 = vrot.lane.b32.xlu0 %v3785_v56, %s3415_s23  ;;  %v4085_v54 = vpop.permute.xlu2 %756  ;;  %v3331_v56 = vld [vmem:[%s4481_s4 + $0x168] sm:$0xff] }
 0x1af   : > { %v1035_v18 = vpop.permute.xlu1 %1034  ;;  %2495 = vmatpush.bf16.msrb.mxu2 %v3331_v56  ;;  %v2978_v56 = vld [vmem:[#allocation3 + $0x70] sm:$0xf] }
 0x1b0   : > { %v1083_v19 = vpop.permute.xlu0 %1082  ;;  %1051 = vst.msk [vmem:[#allocation3 + $0xcc] sm:$0xf] %vm656_vm2, %v1035_v18  ;;  %v1440_v18 = vld [vmem:[#allocation2 + $0x73] sm:$0xff] }
 0x1b1   : > { %1103 = vst.msk [vmem:[#allocation3 + $0x5c] sm:$0xf] %vm713_vm3, %v1083_v19  ;;  %v3334_v19 = vld [vmem:[%s4481_s4 + $0x180] sm:$0xff] }
 0x1b2   : > { %2529 = vmatpush.bf16.msrb.mxu3 %v3334_v19 }
 0x1b3   : > { %2496 = vmatpush.bf16.msrb.mxu2 %v3330_v40  ;;  %v1448_v40 = vpack.c.bf16 %v1440_v18, %v1440_v18 }
 0x1b4   : > { %1660 = vrot.lane.b32.xlu2 %v3903_v45, %s3417_s25 }
 0x1b5   : > { %1520 = vrot.lane.b32.xlu1 %v3737_v27, %s3416_s24  ;;  %v3316_v27 = vld [vmem:[%s4481_s4 + $0xf0] sm:$0xff] }
 0x1b6   : > { %1466 = vrot.lane.b32.xlu0 %v1447_v52, %s3417_s25  ;;  %v1215_v32 = vpop.permute.xlu2 %1214  ;;  %2436 = vmatpush.bf16.msrb.mxu0 %v3316_v27 }
 0x1b7   : > { %v1139_v34 = vpop.permute.xlu1 %1138  ;;  %1237 = vst.msk [vmem:[#allocation3 + $0x28] sm:$0xf] %vm656_vm2, %v1215_v32  ;;  %2497 = vmatpush.bf16.msrb.mxu2 %v3329_v4  ;;  %v3321_v4 = vld [vmem:[%s4481_s4 + $0x118] sm:$0xff] }
 0x1b8   : > { %v2386_v58 = vpop.f32.mrf.mxu2  ;;  %1159 = vst.msk [vmem:[#allocation3 + $0x5c] sm:$0xf] %vm770_vm4, %v1139_v34  ;;  %v837_v59 = vpop.permute.xlu0 %836  ;;  %v3322_v34 = vld [vmem:[%s4481_s4 + $0x120] sm:$0xff] }
 0x1b9   : > { %v4104_v41 = vadd.f32 %v2386_v58, %v2357_v53  ;;  %856 = vst.msk [vmem:[#allocation3 + $0x74] sm:$0xf] %vm656_vm2, %v837_v59  ;;  %v4190_v53 = vpack.c.bf16 %v1578_v26, %v1578_v26  ;;  %v3310_v58 = vld [vmem:[%s4481_s4 + $0xc0] sm:$0xff]  ;;  %v3008_v59 = vld [vmem:[#allocation3 + $0xc4] sm:$0xf0] }
 0x1ba   : > { %912 = vst.msk [vmem:[#allocation3 + $0x74] sm:$0xf] %vm713_vm3, %v893_v42  ;;  %2437 = vmatpush.bf16.msrb.mxu0 %v3315_v6  ;;  %v4166_v42 = vpack.c.bf16 %v1689_v38, %v1689_v38 }
 0x1bb   : > { %2498 = vmatpush.bf16.msrb.mxu2 %v3328_v16  ;;  %1379 = vst.msk [vmem:[#allocation3 + $0xd4] sm:$0xf] %vm544_vm1, %v4190_v53  ;;  %v3279_v16 = vld [vmem:[#allocation3 + $0xac] sm:$0xf] }
 0x1bc   : > { %1222 = vrot.lane.b32.xlu2 %v3620_v46, %s3415_s23  ;;  %v2958_v46 = vld [vmem:[#allocation3 + $0x40] sm:$0xf] }
 0x1bd   : > { %1606 = vrot.lane.b32.xlu1 %v3976_v1, %s3415_s23  ;;  %v3327_v1 = vld [vmem:[%s4481_s4 + $0x148] sm:$0xff] }
 0x1be   : > { %1604 = vrot.lane.b32.xlu0 %v3893_v30, %s3415_s23  ;;  %v4124_v33 = vpop.permute.xlu2 %1268  ;;  %v3314_v30 = vld [vmem:[%s4481_s4 + $0xe0] sm:$0xff] }
 0x1bf   : > { %v949_v29 = vpop.permute.xlu1 %948  ;;  %v3269_v10 = vld [vmem:[#allocation3 + $0x58] sm:$0xf0]  ;;  %2438 = vmatpush.bf16.msrb.mxu0 %v3314_v30  ;;  %2499 = vmatpush.bf16.msrb.mxu2 %v3327_v1  ;;  %v3319_v30 = vld [vmem:[%s4481_s4 + $0x108] sm:$0xff] }
 0x1c0   : > { %968 = vst.msk [vmem:[#allocation3 + $0x74] sm:$0xf] %vm770_vm4, %v949_v29  ;;  %v1029_v15 = vpop.permute.xlu0 %1028  ;;  %v2959_v48 = vor.u32 %v3269_v10, %v2958_v46  ;;  %v3011_v46 = vor.u32 %v3279_v16, %v3008_v59 }
 0x1c1   : > { %1048 = vst.msk [vmem:[#allocation3 + $0x78] sm:$0xf] %vm656_vm2, %v1029_v15  ;;  %v1634_v15 = vld [vmem:[#allocation2 + $0xa2] sm:$0xff] }
 0x1c2   : > { %1104 = vst.msk [vmem:[#allocation3 + $0x78] sm:$0xf] %vm713_vm3, %v3911_v49  ;;  %2419 = vmatmul.bf16.gmra.mxu3 %v2959_v48  ;;  %v3325_v49 = vld [vmem:[%s4481_s4 + $0x138] sm:$0xff] }
 0x1c3   : > { %1160 = vst.msk [vmem:[#allocation3 + $0x78] sm:$0xf] %vm770_vm4, %v3944_v25  ;;  %2464 = vmatpush.bf16.msra.mxu1 %v3325_v49  ;;  %2439 = vmatpush.bf16.msrb.mxu0 %v3313_v61  ;;  %v3014_v61 = vld [vmem:[#allocation3 + $0xb0] sm:$0xf]  ;;  %v3282_v49 = vld [vmem:[#allocation3 + $0xc0] sm:$0xf0] }
 0x1c4   : > { %1276 = vrot.lane.b32.xlu2 %v3656_v5, %s3417_s25  ;;  %2500 = vmatpush.bf16.msrb.mxu2 %v3326_v3  ;;  %v3318_v3 = vld [vmem:[%s4481_s4 + $0x100] sm:$0xff] }
 0x1c5   : > { %1220 = vrot.lane.b32.xlu1 %v1447_v52, %s3415_s23 }
 0x1c6   : > { %1662 = vrot.lane.b32.xlu0 %v3833_v43, %s3417_s25  ;;  %v4152_v25 = vpop.permute.xlu2 %1326 }
 0x1c7   : > { %v1147_v5 = vpop.permute.xlu1 %1146  ;;  %v3272_v21 = vld [vmem:[#allocation3 + $0x74] sm:$0xf]  ;;  %2440 = vmatpush.bf16.msrb.mxu0 %v3312_v39  ;;  %2465 = vmatpush.bf16.msra.mxu1 %v3324_v20 }
 0x1c8   : > { %v700_v31 = vpop.permute.xlu0 %699  ;;  %v2983_v8 = vor.u32 %v3272_v21, %v2980_v28  ;;  %v3006_v21 = vld [vmem:[#allocation3 + $0xa8] sm:$0xf] }
 0x1c9   : > { %719 = vst.msk [vmem:[#allocation3 + $0x8c] sm:$0xf] %vm713_vm3, %v700_v31  ;;  %v3007_v28 = vor.u32 %v3282_v49, %v3006_v21 }
 0x1ca   : > { %776 = vst.msk [vmem:[#allocation3 + $0x8c] sm:$0xf] %vm770_vm4, %v4085_v54  ;;  %2395 = vmatmul.bf16.gmra.mxu2 %v2983_v8  ;;  %v2986_v57 = vld [vmem:[#allocation3 + $0x78] sm:$0xf]  ;;  %v3276_v54 = vld [vmem:[#allocation3 + $0x90] sm:$0xf0] }
 0x1cb   : > { %v2987_v52 = vor.u32 %v3276_v54, %v2986_v57  ;;  %2441 = vmatpush.bf16.msrb.mxu0 %v3311_v2  ;;  %v1579_v8 = vld [vmem:[#allocation2 + $0xb1] sm:$0xff] }
 0x1cc   : > { %1334 = vrot.lane.b32.xlu2 %v3918_v60, %s3416_s24  ;;  %v3323_v60 = vld [vmem:[%s4481_s4 + $0x128] sm:$0xff]  ;;  %v1587_v57 = vpack.c.bf16 %v1579_v8, %v1579_v8 }
 0x1cd   : > { %1718 = vrot.lane.b32.xlu1 %v4166_v42, %s3416_s24  ;;  %2466 = vmatpush.bf16.msra.mxu1 %v3323_v60  ;;  %v3264_v60 = vld [vmem:[#allocation3 + $0x30] sm:$0xf0] }
 0x1ce   : > { %1716 = vrot.lane.b32.xlu0 %v3811_v14, %s3416_s24  ;;  %v4180_v47 = vpop.permute.xlu2 %1460 }
 0x1cf   : > { %v1599_v36 = vpop.permute.xlu1 %1598  ;;  %2442 = vmatpush.bf16.msrb.mxu0 %v3310_v58 }
 0x1d0   : > { %1621 = vst.msk [vmem:[#allocation3 + $0x30] sm:$0xf] %vm656_vm2, %v1599_v36  ;;  %v1091_v50 = vpop.permute.xlu0 %1090  ;;  %v1635_v36 = vld [vmem:[#allocation2 + $0xb2] sm:$0xff] }
 0x1d1   : > { %1107 = vst.msk [vmem:[#allocation3 + $0xcc] sm:$0xf] %vm713_vm3, %v1091_v50  ;;  %v3275_v55 = vld [vmem:[#allocation3 + $0x88] sm:$0xf0]  ;;  %2467 = vmatpush.bf16.msra.mxu1 %v3322_v34 }
 0x1d2   : > { %1163 = vst.msk [vmem:[#allocation3 + $0xcc] sm:$0xf] %vm770_vm4, %v1147_v5  ;;  %2424 = vmatmul.bf16.gmra.mxu3 %v2987_v52  ;;  %v2979_v32 = vor.u32 %v3275_v55, %v2978_v56  ;;  %v4230_v5 = vpack.c.bf16 %v1634_v15, %v1634_v15  ;;  %v1643_v52 = vpack.c.bf16 %v1635_v36, %v1635_v36 }
 0x1d4   : > { %2366 = vmatmul.bf16.gmra.mxu1 %v2979_v32  ;;  %1468 = vrot.lane.b32.xlu2 %v1448_v40, %s3417_s25  ;;  %v1691_v40 = vld [vmem:[#allocation2 + $0xb3] sm:$0xff] }
 0x1d5   : > { %1332 = vrot.lane.b32.xlu1 %v3643_v62, %s3416_s24  ;;  %2468 = vmatpush.bf16.msra.mxu1 %v3321_v4  ;;  %v3320_v62 = vld [vmem:[%s4481_s4 + $0x110] sm:$0xff]  ;;  %v1699_v59 = vpack.c.bf16 %v1691_v40, %v1691_v40 }
 0x1d6   : > { %1278 = vrot.lane.b32.xlu0 %v3662_v13, %s3417_s25  ;;  %v4206_v27 = vpop.permute.xlu2 %1518 }
 0x1d7   : > { %v1213_v6 = vpop.permute.xlu1 %1212 }
 0x1d8   : > { %1236 = vst.msk [vmem:[#allocation3 + $0xc] sm:$0xf] %vm656_vm2, %v1213_v6  ;;  %v1655_v29 = vpop.permute.xlu0 %1654  ;;  %v2974_v6 = vld [vmem:[#allocation3 + $0x50] sm:$0xf] }
 0x1d9   : > { %1292 = vst.msk [vmem:[#allocation3 + $0xc] sm:$0xf] %vm713_vm3, %v4124_v33  ;;  %v3283_v10 = vld [vmem:[#allocation3 + $0xc8] sm:$0xf0]  ;;  %v1307_v33 = vld [vmem:[#allocation2 + $0xa0] sm:$0xff]  ;;  %2469 = vmatpush.bf16.msra.mxu1 %v3320_v62 }
 0x1da   : > { %1677 = vst.msk [vmem:[#allocation3 + $0x30] sm:$0xf] %vm713_vm3, %v1655_v29  ;;  %2400 = vmatmul.bf16.gmra.mxu2 %v3011_v46 }
 0x1dc   : > { %1526 = vrot.lane.b32.xlu2 %v3933_v12, %s3416_s24 }
 0x1dd   : > { %1414 = vrot.lane.b32.xlu1 %v3903_v45, %s3415_s23  ;;  %v3015_v45 = vor.u32 %v3283_v10, %v3014_v61  ;;  %2470 = vmatpush.bf16.msra.mxu1 %v3319_v30  ;;  %v4291_v30 = vpop.f32.mrf.mxu1  ;;  %v4298_v61 = vpop.f32.mrf.mxu2 }
 0x1de   : > { %1412 = vrot.lane.b32.xlu0 %v3668_v17, %s3415_s23  ;;  %v4224_v48 = vpop.permute.xlu2 %1656  ;;  %v1315_v17 = vpack.c.bf16 %v1307_v33, %v1307_v33 }
 0x1df   : > { %v1711_v1 = vpop.permute.xlu1 %1710 }
 0x1e0   : > { %1733 = vst.msk [vmem:[#allocation3 + $0x30] sm:$0xf] %vm770_vm4, %v1711_v1  ;;  %v1709_v12 = vpop.permute.xlu0 %1708 }
 0x1e1   : > { %1732 = vst.msk [vmem:[#allocation3 + $0x14] sm:$0xf] %vm770_vm4, %v1709_v12  ;;  %2471 = vmatpush.bf16.msra.mxu1 %v3318_v3 }
 0x1e2   : > { %2429 = vmatmul.bf16.gmra.mxu3 %v3015_v45  ;;  %1570 = vst.msk [vmem:[#allocation3 + $0xbc] sm:$0xf] %vm544_vm1, %v1315_v17 }
 0x1e4   : > { %2371 = vmatmul.bf16.gmra.mxu1 %v3007_v28  ;;  %1664 = vrot.lane.b32.xlu2 %v4230_v5, %s3417_s25 }
 0x1e5   : > { %1524 = vrot.lane.b32.xlu1 %v3662_v13, %s3416_s24  ;;  %v2946_v13 = vld [vmem:[#allocation3 + $0x18] sm:$0xf] }
 0x1e6   : > { %1470 = vrot.lane.b32.xlu0 %v3811_v14, %s3417_s25  ;;  %v1219_v31 = vpop.permute.xlu2 %1218  ;;  %v2947_v50 = vor.u32 %v3264_v60, %v2946_v13 }
 0x1e7   : > { %v1325_v38 = vpop.permute.xlu1 %1324  ;;  %1239 = vst.msk [vmem:[#allocation3 + $0x60] sm:$0xf] %vm656_vm2, %v1219_v31  ;;  %v2940_v39 = vld [vmem:[#allocation3 + $0x2c] sm:$0xf0] }
 0x1e8   : > { %1348 = vst.msk [vmem:[#allocation3 + $0xc] sm:$0xf] %vm770_vm4, %v1325_v38  ;;  %v1271_v20 = vpop.permute.xlu0 %1270  ;;  %v3260_v44 = vld [vmem:[#allocation3 + $0x14] sm:$0xf] }
 0x1e9   : > { %1293 = vst.msk [vmem:[#allocation3 + $0x28] sm:$0xf] %vm713_vm3, %v1271_v20  ;;  %v2943_v2 = vor.u32 %v3260_v44, %v2940_v39 }
 0x1ea   : > { %1349 = vst.msk [vmem:[#allocation3 + $0x28] sm:$0xf] %vm770_vm4, %v4152_v25 }
 0x1eb   : > { %2501 = vmatmul.bf16.vlgmr.msrb.gmra.mxu2 %v2943_v2 }
 0x1ec   : > { %1226 = vrot.lane.b32.xlu2 %v4166_v42, %s3415_s23 }
 0x1ed   : > { %1610 = vrot.lane.b32.xlu1 %v1587_v57, %s3415_s23 }
 0x1ee   : > { %1608 = vrot.lane.b32.xlu0 %v4190_v53, %s3415_s23  ;;  %v1273_v26 = vpop.permute.xlu2 %1272 }
 0x1ef   : > { %v1407_v54 = vpop.permute.xlu1 %1406  ;;  %v3259_v18 = vld [vmem:[#allocation3 + $0xc] sm:$0xf] }
 0x1f0   : > { %1429 = vst.msk [vmem:[#allocation3 + $0x2c] sm:$0xf] %vm656_vm2, %v1407_v54  ;;  %v1405_v19 = vpop.permute.xlu0 %1404 }
 0x1f1   : > { %1428 = vst.msk [vmem:[#allocation3 + $0x10] sm:$0xf] %vm656_vm2, %v1405_v19  ;;  %v2932_v25 = vld [vmem:[#allocation3 + $0x24] sm:$0xf0] }
 0x1f2   : > { %1484 = vst.msk [vmem:[#allocation3 + $0x10] sm:$0xf] %vm713_vm3, %v4180_v47  ;;  %3232 = vmatmul.msk.bf16.vlgmr.msrb.gmra.mxu3 %vm405_vm0, %v2947_v50  ;;  %v2935_v56 = vor.u32 %v3259_v18, %v2932_v25  ;;  %v1690_v47 = vld [vmem:[#allocation2 + $0xa3] sm:$0xff] }
 0x1f4   : > { %2443 = vmatmul.bf16.vlgmr.msrb.gmra.mxu0 %v2935_v56  ;;  %1280 = vrot.lane.b32.xlu2 %v3823_v35, %s3417_s25  ;;  %v1698_v35 = vpack.c.bf16 %v1690_v47, %v1690_v47 }
 0x1f5   : > { %v2415_v55 = vpop.f32.mrf.mxu3  ;;  %1224 = vrot.lane.b32.xlu1 %v3811_v14, %s3415_s23  ;;  %v3271_v14 = vld [vmem:[#allocation3 + $0x68] sm:$0xf0] }
 0x1f6   : > { %v4261_v53 = vadd.f32 %v2415_v55, %v4104_v41  ;;  %1666 = vrot.lane.b32.xlu0 %v1643_v52, %s3417_s25  ;;  %v4266_v32 = vpop.permute.xlu2 %1330  ;;  %v2975_v46 = vor.u32 %v3271_v14, %v2974_v6 }
 0x1f7   : > { %v1517_v58 = vpop.permute.xlu1 %1516 }
 0x1f8   : > { %1540 = vst.msk [vmem:[#allocation3 + $0x10] sm:$0xf] %vm770_vm4, %v1517_v58  ;;  %v1463_v34 = vpop.permute.xlu0 %1462 }
 0x1f9   : > { %1485 = vst.msk [vmem:[#allocation3 + $0x2c] sm:$0xf] %vm713_vm3, %v1463_v34 }
 0x1fa   : > { %1541 = vst.msk [vmem:[#allocation3 + $0x2c] sm:$0xf] %vm770_vm4, %v4206_v27 }
 0x1fc   : > { %1338 = vrot.lane.b32.xlu2 %v1315_v17, %s3416_s24 }
 0x1fd   : > { %1722 = vrot.lane.b32.xlu1 %v1699_v59, %s3416_s24  ;;  %v4325_v34 = vpop.f32.mrf.mxu3 }
 0x1fe   : > { %1720 = vrot.lane.b32.xlu0 %v1698_v35, %s3416_s24  ;;  %v4275_v41 = vpop.permute.xlu2 %1464 }
 0x1ff   : > { %v1603_v4 = vpop.permute.xlu1 %1602  ;;  %v2938_v16 = vld [vmem:[#allocation3 + $0x10] sm:$0xf] }
 0x200   : > { %1623 = vst.msk [vmem:[#allocation3 + $0x68] sm:$0xf] %vm656_vm2, %v1603_v4  ;;  %v1601_v29 = vpop.permute.xlu0 %1600 }
 0x201   : > { %1622 = vst.msk [vmem:[#allocation3 + $0x4c] sm:$0xf] %vm656_vm2, %v1601_v29  ;;  %v3263_v62 = vld [vmem:[#allocation3 + $0x28] sm:$0xf0] }
 0x202   : > { %1678 = vst.msk [vmem:[#allocation3 + $0x4c] sm:$0xf] %vm713_vm3, %v4224_v48  ;;  %3233 = vmatmul.msk.bf16.gmra.mxu3 %vm405_vm0, %v2975_v46  ;;  %v2939_v27 = vor.u32 %v3263_v62, %v2938_v16  ;;  %v1499_v48 = vld [vmem:[#allocation2 + $0xa4] sm:$0xff] }
 0x203   : > { %v1507_v1 = vpack.c.bf16 %v1499_v48, %v1499_v48 }
 0x204   : > { %2472 = vmatmul.bf16.vlgmr.msra.gmra.mxu1 %v2939_v27  ;;  %1472 = vrot.lane.b32.xlu2 %v4166_v42, %s3417_s25  ;;  %v3278_v42 = vld [vmem:[#allocation3 + $0xa0] sm:$0xf0] }
 0x205   : > { %1336 = vrot.lane.b32.xlu1 %v3851_v51, %s3416_s24  ;;  %v3002_v51 = vld [vmem:[#allocation3 + $0x88] sm:$0xf]  ;;  %1762 = vst.msk [vmem:[#allocation3 + $0xc0] sm:$0xf] %vm544_vm1, %v1507_v1 }
 0x206   : > { %1282 = vrot.lane.b32.xlu0 %v3853_v23, %s3417_s25  ;;  %v1523_v10 = vpop.permute.xlu2 %1522  ;;  %v3003_v17 = vor.u32 %v3278_v42, %v3002_v51 }
 0x207   : > { %v1217_v15 = vpop.permute.xlu1 %1216 }
 0x208   : > { %1238 = vst.msk [vmem:[#allocation3 + $0x44] sm:$0xf] %vm656_vm2, %v1217_v15  ;;  %v1659_v33 = vpop.permute.xlu0 %1658 }
 0x209   : > { %1294 = vst.msk [vmem:[#allocation3 + $0x44] sm:$0xf] %vm713_vm3, %v1273_v26 }
 0x20a   : > { %1679 = vst.msk [vmem:[#allocation3 + $0x68] sm:$0xf] %vm713_vm3, %v1659_v33 }
 0x20c   : > { %1530 = vrot.lane.b32.xlu2 %v1507_v1, %s3416_s24 }
 0x20d   : > { %1418 = vrot.lane.b32.xlu1 %v4230_v5, %s3415_s23  ;;  %v2362_v5 = vpop.f32.mrf.mxu1 }
 0x20e   : > { %1416 = vrot.lane.b32.xlu0 %v3833_v43, %s3415_s23  ;;  %v1661_v49 = vpop.permute.xlu2 %1660 }
 0x20f   : > { %v1715_v12 = vpop.permute.xlu1 %1714 }
 0x210   : > { %1735 = vst.msk [vmem:[#allocation3 + $0x68] sm:$0xf] %vm770_vm4, %v1715_v12  ;;  %v1713_v45 = vpop.permute.xlu0 %1712 }
 0x211   : > { %1734 = vst.msk [vmem:[#allocation3 + $0x4c] sm:$0xf] %vm770_vm4, %v1713_v45 }
 0x212   : > { %3234 = vmatmul.msk.bf16.gmra.mxu3 %vm405_vm0, %v3003_v17 }
 0x215   : > { %1528 = vrot.lane.b32.xlu1 %v3853_v23, %s3416_s24  ;;  %v2364_v23 = vpop.f32.mrf.mxu1 }
 0x216   : > { %1474 = vrot.lane.b32.xlu0 %v1698_v35, %s3417_s25  ;;  %v1223_v21 = vpop.permute.xlu2 %1222  ;;  %v1555_v35 = vld [vmem:[#allocation2 + $0xb0] sm:$0xff] }
 0x217   : > { %v2391_v43 = vpop.f32.mrf.mxu2  ;;  %v1329_v3 = vpop.permute.xlu1 %1328  ;;  %1241 = vst.msk [vmem:[#allocation3 + $0x98] sm:$0xf] %vm656_vm2, %v1223_v21  ;;  %v2968_v31 = vld [vmem:[#allocation3 + $0x64] sm:$0xf0] }
 0x218   : > { %v2392_v28 = vadd.f32 %v2391_v43, %v2362_v5  ;;  %1350 = vst.msk [vmem:[#allocation3 + $0x44] sm:$0xf] %vm770_vm4, %v1329_v3  ;;  %v1275_v8 = vpop.permute.xlu0 %1274  ;;  %v3267_v38 = vld [vmem:[#allocation3 + $0x4c] sm:$0xf] }
 0x219   : > { %1295 = vst.msk [vmem:[#allocation3 + $0x60] sm:$0xf] %vm713_vm3, %v1275_v8  ;;  %v2971_v39 = vor.u32 %v3267_v38, %v2968_v31 }
 0x21a   : > { %1351 = vst.msk [vmem:[#allocation3 + $0x60] sm:$0xf] %vm770_vm4, %v4266_v32 }
 0x21b   : > { %2506 = vmatmul.bf16.gmra.mxu2 %v2971_v39 }
 0x21e   : > { %v1277_v44 = vpop.permute.xlu2 %1276 }
 0x21f   : > { %v2393_v20 = vpop.f32.mrf.mxu2  ;;  %v1411_v57 = vpop.permute.xlu1 %1410  ;;  %v3266_v13 = vld [vmem:[#allocation3 + $0x44] sm:$0xf] }
 0x220   : > { %v2394_v2 = vadd.f32 %v2393_v20, %v2364_v23  ;;  %1431 = vst.msk [vmem:[#allocation3 + $0x64] sm:$0xf] %vm656_vm2, %v1411_v57  ;;  %v1409_v60 = vpop.permute.xlu0 %1408 }
 0x221   : > { %1430 = vst.msk [vmem:[#allocation3 + $0x48] sm:$0xf] %vm656_vm2, %v1409_v60  ;;  %v2960_v26 = vld [vmem:[#allocation3 + $0x5c] sm:$0xf0] }
 0x222   : > { %1486 = vst.msk [vmem:[#allocation3 + $0x48] sm:$0xf] %vm713_vm3, %v4275_v41  ;;  %v2963_v36 = vor.u32 %v3266_v13, %v2960_v26  ;;  %v1563_v41 = vpack.c.bf16 %v1555_v35, %v1555_v35  ;;  %v1747_v35 = vld [vmem:[#allocation2 + $0xb4] sm:$0xff] }
 0x224   : > { %2448 = vmatmul.bf16.gmra.mxu0 %v2963_v36  ;;  %1571 = vst.msk [vmem:[#allocation3 + $0xd8] sm:$0xf] %vm544_vm1, %v1563_v41 }
 0x226   : > { %v1335_v54 = vpop.permute.xlu2 %1334 }
 0x227   : > { %v1521_v18 = vpop.permute.xlu1 %1520 }
 0x228   : > { %1542 = vst.msk [vmem:[#allocation3 + $0x48] sm:$0xf] %vm770_vm4, %v1521_v18  ;;  %v1467_v19 = vpop.permute.xlu0 %1466 }
 0x229   : > { %1487 = vst.msk [vmem:[#allocation3 + $0x64] sm:$0xf] %vm713_vm3, %v1467_v19 }
 0x22a   : > { %1543 = vst.msk [vmem:[#allocation3 + $0x64] sm:$0xf] %vm770_vm4, %v1523_v10 }
 0x22e   : > { %v1469_v50 = vpop.permute.xlu2 %1468 }
 0x22f   : > { %v1607_v25 = vpop.permute.xlu1 %1606  ;;  %v2966_v52 = vld [vmem:[#allocation3 + $0x48] sm:$0xf] }
 0x230   : > { %1625 = vst.msk [vmem:[#allocation3 + $0xa0] sm:$0xf] %vm656_vm2, %v1607_v25  ;;  %v1605_v56 = vpop.permute.xlu0 %1604 }
 0x231   : > { %1624 = vst.msk [vmem:[#allocation3 + $0x84] sm:$0xf] %vm656_vm2, %v1605_v56  ;;  %v3270_v55 = vld [vmem:[#allocation3 + $0x60] sm:$0xf0] }
 0x232   : > { %1680 = vst.msk [vmem:[#allocation3 + $0x84] sm:$0xf] %vm713_vm3, %v1661_v49  ;;  %v2967_v32 = vor.u32 %v3270_v55, %v2966_v52 }
 0x234   : > { %2477 = vmatmul.bf16.gmra.mxu1 %v2967_v32 }
 0x236   : > { %v1527_v40 = vpop.permute.xlu2 %1526 }
 0x237   : > { %v1221_v47 = vpop.permute.xlu1 %1220 }
 0x238   : > { %1240 = vst.msk [vmem:[#allocation3 + $0x7c] sm:$0xf] %vm656_vm2, %v1221_v47  ;;  %v1663_v58 = vpop.permute.xlu0 %1662 }
 0x239   : > { %1296 = vst.msk [vmem:[#allocation3 + $0x7c] sm:$0xf] %vm713_vm3, %v1277_v44 }
 0x23a   : > { %1681 = vst.msk [vmem:[#allocation3 + $0xa0] sm:$0xf] %vm713_vm3, %v1663_v58 }
 0x23e   : > { %v1665_v59 = vpop.permute.xlu2 %1664 }
 0x23f   : > { %v1719_v14 = vpop.permute.xlu1 %1718 }
 0x240   : > { %1737 = vst.msk [vmem:[#allocation3 + $0xa0] sm:$0xf] %vm770_vm4, %v1719_v14  ;;  %v1717_v4 = vpop.permute.xlu0 %1716 }
 0x241   : > { %1736 = vst.msk [vmem:[#allocation3 + $0x84] sm:$0xf] %vm770_vm4, %v1717_v4  ;;  %v1755_v4 = vpack.c.bf16 %v1747_v35, %v1747_v35 }
 0x243   : > { %1763 = vst.msk [vmem:[#allocation3 + $0xdc] sm:$0xf] %vm544_vm1, %v1755_v4 }
 0x245   : > { %v2420_v6 = vpop.f32.mrf.mxu3 }
 0x246   : > { %v4330_v16 = vadd.f32 %v2420_v6, %v2392_v28  ;;  %v1227_v29 = vpop.permute.xlu2 %1226 }
 0x247   : > { %v1333_v46 = vpop.permute.xlu1 %1332  ;;  %1243 = vst.msk [vmem:[#allocation3 + $0xd0] sm:$0xf] %vm656_vm2, %v1227_v29  ;;  %v2996_v62 = vld [vmem:[#allocation3 + $0x9c] sm:$0xf0] }
 0x248   : > { %1352 = vst.msk [vmem:[#allocation3 + $0x7c] sm:$0xf] %vm770_vm4, %v1333_v46  ;;  %v1279_v27 = vpop.permute.xlu0 %1278  ;;  %v3274_v10 = vld [vmem:[#allocation3 + $0x84] sm:$0xf] }
 0x249   : > { %1297 = vst.msk [vmem:[#allocation3 + $0x98] sm:$0xf] %vm713_vm3, %v1279_v27  ;;  %v2999_v15 = vor.u32 %v3274_v10, %v2996_v62 }
 0x24a   : > { %1353 = vst.msk [vmem:[#allocation3 + $0x98] sm:$0xf] %vm770_vm4, %v1335_v54 }
 0x24b   : > { %2511 = vmatmul.bf16.gmra.mxu2 %v2999_v15 }
 0x24d   : > { %v2396_v33 = vpop.f32.mrf.mxu2  ;;  %v2422_v48 = vpop.f32.mrf.mxu3 }
 0x24e   : > { %v4336_v1 = vadd.f32 %v2422_v48, %v2394_v2 }
 0x24f   : > { %v1415_v51 = vpop.permute.xlu1 %1414  ;;  %v3273_v42 = vld [vmem:[#allocation3 + $0x7c] sm:$0xf] }
 0x250   : > { %1433 = vst.msk [vmem:[#allocation3 + $0x9c] sm:$0xf] %vm656_vm2, %v1415_v51  ;;  %v1413_v49 = vpop.permute.xlu0 %1412  ;;  %v3030_v51 = vld [vmem:[#allocation3 + $0xc0] sm:$0xf] }
 0x251   : > { %1432 = vst.msk [vmem:[#allocation3 + $0x80] sm:$0xf] %vm656_vm2, %v1413_v49  ;;  %v2367_v12 = vpop.f32.mrf.mxu1  ;;  %v2988_v45 = vld [vmem:[#allocation3 + $0x94] sm:$0xf0] }
 0x252   : > { %1488 = vst.msk [vmem:[#allocation3 + $0x80] sm:$0xf] %vm713_vm3, %v1469_v50  ;;  %v2397_v17 = vadd.f32 %v2396_v33, %v2367_v12  ;;  %v2991_v5 = vor.u32 %v3273_v42, %v2988_v45  ;;  %v1281_v50 = vpop.permute.xlu2 %1280 }
 0x254   : > { %2453 = vmatmul.bf16.gmra.mxu0 %v2991_v5  ;;  %v3285_v5 = vld [vmem:[#allocation3 + $0xd8] sm:$0xf0] }
 0x255   : > { %v2398_v43 = vpop.f32.mrf.mxu2  ;;  %v2425_v21 = vpop.f32.mrf.mxu3 }
 0x256   : > { %v4341_v28 = vadd.f32 %v2425_v21, %v2397_v17 }
 0x257   : > { %v1525_v3 = vpop.permute.xlu1 %1524 }
 0x258   : > { %1544 = vst.msk [vmem:[#allocation3 + $0x80] sm:$0xf] %vm770_vm4, %v1525_v3  ;;  %v1471_v31 = vpop.permute.xlu0 %1470  ;;  %v2389_v3 = vadd.f32 %v4298_v61, %v4291_v30  ;;  %v3336_v30 = vld [vmem:[%s4484_s7] sm:$0xff] }
 0x259   : > { %1489 = vst.msk [vmem:[#allocation3 + $0x9c] sm:$0xf] %vm713_vm3, %v1471_v31  ;;  %v2369_v8 = vpop.f32.mrf.mxu1 }
 0x25a   : > { %1545 = vst.msk [vmem:[#allocation3 + $0x9c] sm:$0xf] %vm770_vm4, %v1527_v40  ;;  %v2399_v38 = vadd.f32 %v2398_v43, %v2369_v8  ;;  %v3337_v43 = vld [vmem:[%s4484_s7 + $0x8] sm:$0xff]  ;;  %v4376_v8 = vld [vmem:[%s4482_s5] ss:$0 sm:$0xff] }
 0x25b   : > { %2685 = vmatpush.bf16.msra.mxu0 %v3337_v43 }
 0x25d   : > { %v2427_v39 = vpop.f32.mrf.mxu3  ;;  %v2401_v20 = vpop.f32.mrf.mxu2 }
 0x25e   : > { %v4346_v23 = vadd.f32 %v2427_v39, %v2399_v38  ;;  %v2418_v39 = vadd.f32 %v4325_v34, %v2389_v3 }
 0x25f   : > { %v1611_v44 = vpop.permute.xlu1 %1610  ;;  %v2994_v2 = vld [vmem:[#allocation3 + $0x80] sm:$0xf]  ;;  %2686 = vmatpush.bf16.msra.mxu0 %v3336_v30 }
 0x260   : > { %1627 = vst.msk [vmem:[#allocation3 + $0xd8] sm:$0xf] %vm656_vm2, %v1611_v44  ;;  %v1609_v57 = vpop.permute.xlu0 %1608  ;;  %v4383_v44 = vld [vmem:[%s4483_s6] ss:$0 sm:$0xff] }
 0x261   : > { %1626 = vst.msk [vmem:[#allocation3 + $0xbc] sm:$0xf] %vm656_vm2, %v1609_v57  ;;  %v2372_v13 = vpop.f32.mrf.mxu1  ;;  %v3277_v60 = vld [vmem:[#allocation3 + $0x98] sm:$0xf0] }
 0x262   : > { %1682 = vst.msk [vmem:[#allocation3 + $0xbc] sm:$0xf] %vm713_vm3, %v1665_v59  ;;  %v2402_v26 = vadd.f32 %v2401_v20, %v2372_v13  ;;  %v2995_v36 = vor.u32 %v3277_v60, %v2994_v2  ;;  %v1339_v59 = vpop.permute.xlu2 %1338 }
 0x264   : > { %2482 = vmatmul.bf16.gmra.mxu1 %v2995_v36 }
 0x265   : > { %v2430_v54 = vpop.f32.mrf.mxu3  ;;  %v2403_v52 = vpop.f32.mrf.mxu2 }
 0x266   : > { %v4351_v18 = vadd.f32 %v2430_v54, %v2402_v26 }
 0x267   : > { %v1225_v19 = vpop.permute.xlu1 %1224 }
 0x268   : > { %1242 = vst.msk [vmem:[#allocation3 + $0xb4] sm:$0xf] %vm656_vm2, %v1225_v19  ;;  %v1667_v25 = vpop.permute.xlu0 %1666 }
 0x269   : > { %1298 = vst.msk [vmem:[#allocation3 + $0xb4] sm:$0xf] %vm713_vm3, %v1281_v50  ;;  %v2374_v56 = vpop.f32.mrf.mxu1 }
 0x26a   : > { %1683 = vst.msk [vmem:[#allocation3 + $0xd8] sm:$0xf] %vm713_vm3, %v1667_v25  ;;  %v2404_v55 = vadd.f32 %v2403_v52, %v2374_v56  ;;  %v1473_v27 = vpop.permute.xlu2 %1472 }
 0x26d   : > { %v2432_v32 = vpop.f32.mrf.mxu3 }
 0x26e   : > { %v4356_v40 = vadd.f32 %v2432_v32, %v2404_v55  ;;  %v2502_v42 = vpop.f32.mrf.mxu2 }
 0x26f   : > { %v1723_v47 = vpop.permute.xlu1 %1722 }
 0x270   : > { %1739 = vst.msk [vmem:[#allocation3 + $0xd8] sm:$0xf] %vm770_vm4, %v1723_v47  ;;  %v1721_v58 = vpop.permute.xlu0 %1720 }
 0x271   : > { %1738 = vst.msk [vmem:[#allocation3 + $0xbc] sm:$0xf] %vm770_vm4, %v1721_v58  ;;  %v2444_v62 = vpop.f32.mrf.mxu0 }
 0x272   : > { %v2445_v33 = vadd.f32 %v2444_v62, %v4261_v53  ;;  %v3031_v53 = vor.u32 %v3285_v5, %v3030_v51  ;;  %v1531_v2 = vpop.permute.xlu2 %1530 }
 0x274   : > { %3235 = vmatmul.msk.bf16.gmra.mxu3 %vm405_vm0, %v3031_v53 }
 0x275   : > { %v2531_v21 = vpop.f32.mrf.mxu3 }
 0x276   : > { %v2504_v54 = vpop.f32.mrf.mxu2 }
 0x277   : > { %v1337_v14 = vpop.permute.xlu1 %1336  ;;  %v3024_v41 = vld [vmem:[#allocation3 + $0xd4] sm:$0xf0] }
 0x278   : > { %1354 = vst.msk [vmem:[#allocation3 + $0xb4] sm:$0xf] %vm770_vm4, %v1337_v14  ;;  %v1283_v6 = vpop.permute.xlu0 %1282  ;;  %v3281_v29 = vld [vmem:[#allocation3 + $0xbc] sm:$0xf] }
 0x279   : > { %1299 = vst.msk [vmem:[#allocation3 + $0xd0] sm:$0xf] %vm713_vm3, %v1283_v6  ;;  %v3027_v46 = vor.u32 %v3281_v29, %v3024_v41  ;;  %v2446_v38 = vpop.f32.mrf.mxu0 }
 0x27a   : > { %1355 = vst.msk [vmem:[#allocation3 + $0xd0] sm:$0xf] %vm770_vm4, %v1339_v59  ;;  %v2447_v57 = vadd.f32 %v2446_v38, %v2418_v39 }
 0x27b   : > { %2516 = vmatmul.bf16.gmra.mxu2 %v3027_v46 }
 0x27d   : > { %v2533_v25 = vpop.f32.mrf.mxu3 }
 0x27f   : > { %v1419_v10 = vpop.permute.xlu1 %1418  ;;  %v3280_v15 = vld [vmem:[#allocation3 + $0xb4] sm:$0xf] }
 0x280   : > { %1435 = vst.msk [vmem:[#allocation3 + $0xd4] sm:$0xf] %vm656_vm2, %v1419_v10  ;;  %v1417_v48 = vpop.permute.xlu0 %1416 }
 0x281   : > { %1434 = vst.msk [vmem:[#allocation3 + $0xb8] sm:$0xf] %vm656_vm2, %v1417_v48  ;;  %v2473_v49 = vpop.f32.mrf.mxu1  ;;  %v3016_v12 = vld [vmem:[#allocation3 + $0xcc] sm:$0xf0] }
 0x282   : > { %1490 = vst.msk [vmem:[#allocation3 + $0xb8] sm:$0xf] %vm713_vm3, %v1473_v27  ;;  %v2474_v45 = vadd.f32 %v2473_v49, %v2445_v33  ;;  %v3019_v17 = vor.u32 %v3280_v15, %v3016_v12 }
 0x284   : > { %v2503_v31 = vadd.f32 %v2502_v42, %v2474_v45  ;;  %2458 = vmatmul.bf16.gmra.mxu0 %v3019_v17 }
 0x285   : > { %v2536_v53 = vpop.f32.mrf.mxu3 }
 0x286   : > { %v2532_v20 = vadd.f32 %v2531_v21, %v2503_v31 }
 0x287   : > { %v1529_v61 = vpop.permute.xlu1 %1528 }
 0x288   : > { %v2555_v13 = vmul.f32 %v4376_v8, %v2532_v20  ;;  %1546 = vst.msk [vmem:[#allocation3 + $0xb8] sm:$0xf] %vm770_vm4, %v1529_v61  ;;  %v1475_v60 = vpop.permute.xlu0 %1474 }
 0x289   : > { %1491 = vst.msk [vmem:[#allocation3 + $0xd4] sm:$0xf] %vm713_vm3, %v1475_v60  ;;  %v2475_v34 = vpop.f32.mrf.mxu1 }
 0x28a   : > { %v2567_v26 = vadd.f32 %v4383_v44, %v2555_v13  ;;  %1547 = vst.msk [vmem:[#allocation3 + $0xd4] sm:$0xf] %vm770_vm4, %v1531_v2  ;;  %v2476_v36 = vadd.f32 %v2475_v34, %v2447_v57 }
 0x28c   : > { %v2583_v19 = vmul.f32 0.044715, %v2567_v26  ;;  %v2505_v50 = vadd.f32 %v2504_v54, %v2476_v36  ;;  %v2575_v33 = vmul.f32 0.5, %v2567_v26 }
 0x28d   : > { %v2538_v34 = vpop.f32.mrf.mxu3 }
 0x28e   : > { %v2591_v52 = vmul.f32 %v2583_v19, %v2567_v26  ;;  %v2534_v56 = vadd.f32 %v2533_v25, %v2505_v50 }
 0x28f   : > { %v3022_v55 = vld [vmem:[#allocation3 + $0xb8] sm:$0xf] }
 0x290   : > { %v2556_v32 = vmul.f32 %v4376_v8, %v2534_v56  ;;  %v2599_v47 = vmul.f32 %v2591_v52, %v2567_v26 }
 0x291   : > { %v3284_v58 = vld [vmem:[#allocation3 + $0xd0] sm:$0xf0] }
 0x292   : > { %v2568_v59 = vadd.f32 %v4383_v44, %v2556_v32  ;;  %v3023_v35 = vor.u32 %v3284_v58, %v3022_v55  ;;  %v2607_v14 = vadd.f32 %v2599_v47, %v2567_v26 }
 0x294   : > { %v2584_v41 = vmul.f32 0.044715, %v2568_v59  ;;  %2487 = vmatmul.bf16.gmra.mxu1 %v3023_v35  ;;  %v2615_v6 = vmul.f32 0.7978846, %v2607_v14  ;;  %v2576_v48 = vmul.f32 0.5, %v2568_v59 }
 0x296   : > { %v2592_v4 = vmul.f32 %v2584_v41, %v2568_v59  ;;  %3374 = vtanh.f32 %v2615_v6 }
 0x298   : > { %v2600_v29 = vmul.f32 %v2592_v4, %v2568_v59 }
 0x29a   : > { %v2608_v46 = vadd.f32 %v2600_v29, %v2568_v59 }
 0x29c   : > { %v2616_v62 = vmul.f32 0.7978846, %v2608_v46  ;;  %v3375_v27 = vpop.eup %3374 }
 0x29d   : > { %v2631_v10 = vadd.f32 1.0, %v3375_v27 }
 0x29e   : > { %3376 = vtanh.f32 %v2616_v62  ;;  %v2507_v5 = vpop.f32.mrf.mxu2 }
 0x29f   : > { %v2639_v42 = vmul.f32 %v2631_v10, %v2575_v33  ;;  %v2541_v33 = vpop.f32.mrf.mxu3 }
 0x2a1   : > { %v2449_v45 = vpop.f32.mrf.mxu0 }
 0x2a2   : > { %v2450_v17 = vadd.f32 %v2449_v45, %v4330_v16 }
 0x2a4   : > { %v3377_v15 = vpop.eup %3376 }
 0x2a5   : > { %v2632_v51 = vadd.f32 1.0, %v3377_v15 }
 0x2a6   : > { %v2509_v57 = vpop.f32.mrf.mxu2 }
 0x2a7   : > { %v2640_v49 = vmul.f32 %v2632_v51, %v2576_v48 }
 0x2a9   : > { %v2647_v12 = vpack.c.bf16 %v2640_v49, %v2639_v42  ;;  %v2451_v31 = vpop.f32.mrf.mxu0 }
 0x2aa   : > { %v2452_v39 = vadd.f32 %v2451_v31, %v4336_v1 }
 0x2ab   : > { %3244 = vmatmul.msk.bf16.vlgmr.msra.gmra.mxu0 %vm405_vm0, %v2647_v12 }
 0x2b1   : > { %v2478_v43 = vpop.f32.mrf.mxu1 }
 0x2b2   : > { %v2479_v21 = vadd.f32 %v2478_v43, %v2450_v17 }
 0x2b4   : > { %v2508_v3 = vadd.f32 %v2507_v5, %v2479_v21 }
 0x2b6   : > { %v2537_v38 = vadd.f32 %v2536_v53, %v2508_v3  ;;  %v2543_v3 = vpop.f32.mrf.mxu3 }
 0x2b8   : > { %v2557_v20 = vmul.f32 %v4376_v8, %v2537_v38 }
 0x2b9   : > { %v2480_v30 = vpop.f32.mrf.mxu1 }
 0x2ba   : > { %v2569_v61 = vadd.f32 %v4383_v44, %v2557_v20  ;;  %v2481_v2 = vadd.f32 %v2480_v30, %v2452_v39 }
 0x2bc   : > { %v2510_v13 = vadd.f32 %v2509_v57, %v2481_v2  ;;  %v2585_v60 = vmul.f32 0.044715, %v2569_v61  ;;  %v2577_v35 = vmul.f32 0.5, %v2569_v61 }
 0x2be   : > { %v2539_v16 = vadd.f32 %v2538_v34, %v2510_v13  ;;  %v2593_v26 = vmul.f32 %v2585_v60, %v2569_v61 }
 0x2c0   : > { %v2558_v36 = vmul.f32 %v4376_v8, %v2539_v16  ;;  %v2601_v54 = vmul.f32 %v2593_v26, %v2569_v61 }
 0x2c2   : > { %v2570_v19 = vadd.f32 %v4383_v44, %v2558_v36  ;;  %v2609_v50 = vadd.f32 %v2601_v54, %v2569_v61 }
 0x2c4   : > { %v2586_v25 = vmul.f32 0.044715, %v2570_v19  ;;  %v2617_v52 = vmul.f32 0.7978846, %v2609_v50  ;;  %v2578_v14 = vmul.f32 0.5, %v2570_v19 }
 0x2c6   : > { %v2594_v1 = vmul.f32 %v2586_v25, %v2570_v19  ;;  %3378 = vtanh.f32 %v2617_v52 }
 0x2c8   : > { %v2602_v56 = vmul.f32 %v2594_v1, %v2570_v19 }
 0x2ca   : > { %v2610_v55 = vadd.f32 %v2602_v56, %v2570_v19 }
 0x2cc   : > { %v2618_v32 = vmul.f32 0.7978846, %v2610_v55  ;;  %v3379_v47 = vpop.eup %3378 }
 0x2cd   : > { %v2633_v58 = vadd.f32 1.0, %v3379_v47 }
 0x2ce   : > { %3380 = vtanh.f32 %v2618_v32  ;;  %v2512_v27 = vpop.f32.mrf.mxu2 }
 0x2cf   : > { %v2641_v4 = vmul.f32 %v2633_v58, %v2577_v35 }
 0x2d1   : > { %v2454_v46 = vpop.f32.mrf.mxu0 }
 0x2d2   : > { %v2455_v62 = vadd.f32 %v2454_v46, %v4341_v28 }
 0x2d4   : > { %v3381_v59 = vpop.eup %3380 }
 0x2d5   : > { %v2634_v41 = vadd.f32 1.0, %v3381_v59 }
 0x2d6   : > { %v2514_v43 = vpop.f32.mrf.mxu2 }
 0x2d7   : > { %v2642_v6 = vmul.f32 %v2634_v41, %v2578_v14 }
 0x2d9   : > { %v2648_v29 = vpack.c.bf16 %v2642_v6, %v2641_v4  ;;  %v2456_v51 = vpop.f32.mrf.mxu0 }
 0x2da   : > { %v2457_v49 = vadd.f32 %v2456_v51, %v4346_v23 }
 0x2db   : > { %3245 = vmatmul.msk.bf16.gmra.mxu0 %vm405_vm0, %v2648_v29 }
 0x2e1   : > { %v2483_v10 = vpop.f32.mrf.mxu1 }
 0x2e2   : > { %v2484_v15 = vadd.f32 %v2483_v10, %v2455_v62 }
 0x2e4   : > { %v2513_v48 = vadd.f32 %v2512_v27, %v2484_v15 }
 0x2e6   : > { %v2542_v42 = vadd.f32 %v2541_v33, %v2513_v48 }
 0x2e8   : > { %v2559_v12 = vmul.f32 %v4376_v8, %v2542_v42 }
 0x2e9   : > { %v2485_v45 = vpop.f32.mrf.mxu1 }
 0x2ea   : > { %v2571_v17 = vadd.f32 %v4383_v44, %v2559_v12  ;;  %v2486_v5 = vadd.f32 %v2485_v45, %v2457_v49 }
 0x2ec   : > { %v2515_v21 = vadd.f32 %v2514_v43, %v2486_v5  ;;  %v2587_v53 = vmul.f32 0.044715, %v2571_v17  ;;  %v2579_v36 = vmul.f32 0.5, %v2571_v17  ;;  %v4424_v5 = vld [vmem:[%s4486_s9] ss:$0 sm:$0xff] }
 0x2ee   : > { %v2544_v28 = vadd.f32 %v2543_v3, %v2515_v21  ;;  %v2595_v31 = vmul.f32 %v2587_v53, %v2571_v17 }
 0x2f0   : > { %v2560_v38 = vmul.f32 %v4376_v8, %v2544_v28  ;;  %v2603_v39 = vmul.f32 %v2595_v31, %v2571_v17 }
 0x2f2   : > { %v2572_v20 = vadd.f32 %v4383_v44, %v2560_v38  ;;  %v2611_v30 = vadd.f32 %v2603_v39, %v2571_v17 }
 0x2f4   : > { %v2588_v61 = vmul.f32 0.044715, %v2572_v20  ;;  %v2619_v2 = vmul.f32 0.7978846, %v2611_v30  ;;  %v2580_v54 = vmul.f32 0.5, %v2572_v20 }
 0x2f6   : > { %v2596_v23 = vmul.f32 %v2588_v61, %v2572_v20  ;;  %3382 = vtanh.f32 %v2619_v2 }
 0x2f7   : > { %v2546_v58 = vpop.f32.mrf.mxu3 }
 0x2f8   : > { %v2604_v57 = vmul.f32 %v2596_v23, %v2572_v20 }
 0x2fa   : > { %v2612_v13 = vadd.f32 %v2604_v57, %v2572_v20 }
 0x2fc   : > { %v2620_v60 = vmul.f32 0.7978846, %v2612_v13  ;;  %v3383_v34 = vpop.eup %3382 }
 0x2fd   : > { %v2635_v16 = vadd.f32 1.0, %v3383_v34 }
 0x2fe   : > { %3384 = vtanh.f32 %v2620_v60  ;;  %v2517_v55 = vpop.f32.mrf.mxu2 }
 0x2ff   : > { %v2643_v50 = vmul.f32 %v2635_v16, %v2579_v36  ;;  %v2548_v15 = vpop.f32.mrf.mxu3 }
 0x301   : > { %v2459_v52 = vpop.f32.mrf.mxu0 }
 0x302   : > { %v2460_v56 = vadd.f32 %v2459_v52, %v4351_v18 }
 0x304   : > { %v3385_v26 = vpop.eup %3384 }
 0x305   : > { %v2636_v19 = vadd.f32 1.0, %v3385_v26 }
 0x306   : > { %v2519_v62 = vpop.f32.mrf.mxu2 }
 0x307   : > { %v2644_v25 = vmul.f32 %v2636_v19, %v2580_v54 }
 0x309   : > { %v2649_v1 = vpack.c.bf16 %v2644_v25, %v2643_v50  ;;  %v2461_v35 = vpop.f32.mrf.mxu0 }
 0x30a   : > { %v2462_v41 = vadd.f32 %v2461_v35, %v4356_v40  ;;  %v4419_v40 = vld [vmem:[%s4485_s8] ss:$0 sm:$0xff] }
 0x30b   : > { %3246 = vmatmul.msk.bf16.gmra.mxu0 %vm405_vm0, %v2649_v1 }
 0x311   : > { %v2488_v32 = vpop.f32.mrf.mxu1 }
 0x312   : > { %v2489_v47 = vadd.f32 %v2488_v32, %v2460_v56 }
 0x314   : > { %v2518_v59 = vadd.f32 %v2517_v55, %v2489_v47 }
 0x316   : > { %v2547_v14 = vadd.f32 %v2546_v58, %v2518_v59 }
 0x318   : > { %v2561_v4 = vmul.f32 %v4376_v8, %v2547_v14 }
 0x319   : > { %v2490_v6 = vpop.f32.mrf.mxu1 }
 0x31a   : > { %v2573_v29 = vadd.f32 %v4383_v44, %v2561_v4  ;;  %v2491_v46 = vadd.f32 %v2490_v6, %v2462_v41 }
 0x31c   : > { %v2520_v27 = vadd.f32 %v2519_v62, %v2491_v46  ;;  %v2589_v10 = vmul.f32 0.044715, %v2573_v29  ;;  %v2581_v13 = vmul.f32 0.5, %v2573_v29 }
 0x31e   : > { %v2549_v18 = vadd.f32 %v2548_v15, %v2520_v27  ;;  %v2597_v33 = vmul.f32 %v2589_v10, %v2573_v29 }
 0x320   : > { %v2562_v48 = vmul.f32 %v4376_v8, %v2549_v18  ;;  %v2605_v51 = vmul.f32 %v2597_v33, %v2573_v29 }
 0x322   : > { %v2574_v42 = vadd.f32 %v4383_v44, %v2562_v48  ;;  %v2613_v49 = vadd.f32 %v2605_v51, %v2573_v29 }
 0x324   : > { %v2590_v12 = vmul.f32 0.044715, %v2574_v42  ;;  %v2621_v17 = vmul.f32 0.7978846, %v2613_v49  ;;  %v2582_v16 = vmul.f32 0.5, %v2574_v42 }
 0x326   : > { %v2598_v45 = vmul.f32 %v2590_v12, %v2574_v42  ;;  %3386 = vtanh.f32 %v2621_v17 }
 0x328   : > { %v2688_v43 = vpop.f32.mrf.mxu0  ;;  %v2606_v21 = vmul.f32 %v2598_v45, %v2574_v42 }
 0x329   : > { %v2712_v8 = vmul.f32 %v4419_v40, %v2688_v43 }
 0x32a   : > { %v2614_v53 = vadd.f32 %v2606_v21, %v2574_v42 }
 0x32b   : > { %v2724_v44 = vadd.f32 %v4424_v5, %v2712_v8 }
 0x32c   : > { %v2622_v3 = vmul.f32 0.7978846, %v2614_v53  ;;  %v3387_v38 = vpop.eup %3386 }
 0x32d   : > { %v2740_v28 = vmul.f32 0.044715, %v2724_v44  ;;  %v2637_v2 = vadd.f32 1.0, %v3387_v38  ;;  %v2732_v55 = vmul.f32 0.5, %v2724_v44 }
 0x32e   : > { %3388 = vtanh.f32 %v2622_v3 }
 0x32f   : > { %v2748_v31 = vmul.f32 %v2740_v28, %v2724_v44  ;;  %v2645_v54 = vmul.f32 %v2637_v2, %v2581_v13 }
 0x330   : > { %v2690_v39 = vpop.f32.mrf.mxu0 }
 0x331   : > { %v2756_v20 = vmul.f32 %v2748_v31, %v2724_v44  ;;  %v2713_v30 = vmul.f32 %v4419_v40, %v2690_v39 }
 0x333   : > { %v2764_v61 = vadd.f32 %v2756_v20, %v2724_v44  ;;  %v2725_v23 = vadd.f32 %v4424_v5, %v2713_v30 }
 0x334   : > { %v3389_v57 = vpop.eup %3388 }
 0x335   : > { %v2772_v60 = vmul.f32 0.7978846, %v2764_v61  ;;  %v2741_v34 = vmul.f32 0.044715, %v2725_v23  ;;  %v2638_v26 = vadd.f32 1.0, %v3389_v57  ;;  %v2733_v14 = vmul.f32 0.5, %v2725_v23 }
 0x337   : > { %3390 = vtanh.f32 %v2772_v60  ;;  %v2749_v36 = vmul.f32 %v2741_v34, %v2725_v23  ;;  %v2646_v19 = vmul.f32 %v2638_v26, %v2582_v16 }
 0x339   : > { %v2757_v50 = vmul.f32 %v2749_v36, %v2725_v23  ;;  %v2650_v25 = vpack.c.bf16 %v2646_v19, %v2645_v54 }
 0x33b   : > { %v2765_v1 = vadd.f32 %v2757_v50, %v2725_v23  ;;  %3247 = vmatmul.msk.bf16.gmra.mxu0 %vm405_vm0, %v2650_v25 }
 0x33d   : > { %v3391_v52 = vpop.eup %3390  ;;  %v2773_v56 = vmul.f32 0.7978846, %v2765_v1 }
 0x33e   : > { %v2788_v32 = vadd.f32 1.0, %v3391_v52 }
 0x33f   : > { %3392 = vtanh.f32 %v2773_v56 }
 0x340   : > { %v2796_v47 = vmul.f32 %v2788_v32, %v2732_v55 }
 0x342   : > { %v2804_v58 = vadd.f32 %v2796_v47, %v3554_v63 }
 0x344   : > { %v2812_v59 = vpack.c.bf16 %v2804_v58, %v2804_v58 }
 0x345   : > { %v3393_v35 = vpop.eup %3392 }
 0x346   : > { %2820 = vst.msk [vmem:[%s4437_s29] sm:$0xf] %vm544_vm1, %v2812_v59  ;;  %v2789_v41 = vadd.f32 1.0, %v3393_v35 }
 0x348   : > { %v2797_v4 = vmul.f32 %v2789_v41, %v2733_v14 }
 0x34a   : > { %v2805_v6 = vadd.f32 %v2797_v4, %v3562_v7 }
 0x34c   : > { %v2813_v29 = vpack.c.bf16 %v2805_v6, %v2805_v6 }
 0x34e   : > { %2821 = vst.msk [vmem:[%s4437_s29 + $0x4] sm:$0xf] %vm544_vm1, %v2813_v29 }
 0x358   : > { %v2693_v63 = vpop.f32.mrf.mxu0 }
 0x359   : > { %v2714_v46 = vmul.f32 %v4419_v40, %v2693_v63 }
 0x35b   : > { %v2726_v62 = vadd.f32 %v4424_v5, %v2714_v46 }
 0x35d   : > { %v2742_v27 = vmul.f32 0.044715, %v2726_v62  ;;  %v2734_v21 = vmul.f32 0.5, %v2726_v62 }
 0x35f   : > { %v2750_v10 = vmul.f32 %v2742_v27, %v2726_v62 }
 0x360   : > { %v2695_v15 = vpop.f32.mrf.mxu0 }
 0x361   : > { %v2758_v18 = vmul.f32 %v2750_v10, %v2726_v62  ;;  %v2715_v33 = vmul.f32 %v4419_v40, %v2695_v15 }
 0x363   : > { %v2766_v48 = vadd.f32 %v2758_v18, %v2726_v62  ;;  %v2727_v51 = vadd.f32 %v4424_v5, %v2715_v33 }
 0x365   : > { %v2774_v42 = vmul.f32 0.7978846, %v2766_v48  ;;  %v2743_v7 = vmul.f32 0.044715, %v2727_v51  ;;  %v2735_v31 = vmul.f32 0.5, %v2727_v51 }
 0x367   : > { %3394 = vtanh.f32 %v2774_v42  ;;  %v2751_v49 = vmul.f32 %v2743_v7, %v2727_v51 }
 0x369   : > { %v2759_v12 = vmul.f32 %v2751_v49, %v2727_v51 }
 0x36b   : > { %v2767_v45 = vadd.f32 %v2759_v12, %v2727_v51 }
 0x36d   : > { %v3395_v17 = vpop.eup %3394  ;;  %v2775_v43 = vmul.f32 0.7978846, %v2767_v45 }
 0x36e   : > { %v2790_v8 = vadd.f32 1.0, %v3395_v17 }
 0x36f   : > { %3396 = vtanh.f32 %v2775_v43 }
 0x370   : > { %v2798_v53 = vmul.f32 %v2790_v8, %v2734_v21 }
 0x372   : > { %v2806_v44 = vadd.f32 %v2798_v53, %v3684_v37 }
 0x374   : > { %v2814_v3 = vpack.c.bf16 %v2806_v44, %v2806_v44 }
 0x375   : > { %v3397_v28 = vpop.eup %3396 }
 0x376   : > { %2822 = vst.msk [vmem:[%s4437_s29 + $0x8] sm:$0xf] %vm544_vm1, %v2814_v3  ;;  %v2791_v38 = vadd.f32 1.0, %v3397_v28 }
 0x378   : > { %v2799_v39 = vmul.f32 %v2791_v38, %v2735_v31 }
 0x37a   : > { %v2807_v20 = vadd.f32 %v2799_v39, %v3702_v24 }
 0x37c   : > { %v2815_v30 = vpack.c.bf16 %v2807_v20, %v2807_v20 }
 0x37e   : > { %2823 = vst.msk [vmem:[%s4437_s29 + $0xc] sm:$0xf] %vm544_vm1, %v2815_v30 }
 0x388   : > { %v2698_v61 = vpop.f32.mrf.mxu0 }
 0x389   : > { %v2716_v23 = vmul.f32 %v4419_v40, %v2698_v61 }
 0x38b   : > { %v2728_v2 = vadd.f32 %v4424_v5, %v2716_v23 }
 0x38d   : > { %v2744_v57 = vmul.f32 0.044715, %v2728_v2  ;;  %v2736_v52 = vmul.f32 0.5, %v2728_v2 }
 0x38f   : > { %v2752_v13 = vmul.f32 %v2744_v57, %v2728_v2 }
 0x390   : > { %v2700_v37 = vpop.f32.mrf.mxu0 }
 0x391   : > { %v2760_v60 = vmul.f32 %v2752_v13, %v2728_v2  ;;  %v2717_v34 = vmul.f32 %v4419_v40, %v2700_v37 }
 0x393   : > { %v2768_v16 = vadd.f32 %v2760_v60, %v2728_v2  ;;  %v2729_v26 = vadd.f32 %v4424_v5, %v2717_v34 }
 0x395   : > { %v2776_v36 = vmul.f32 0.7978846, %v2768_v16  ;;  %v2745_v24 = vmul.f32 0.044715, %v2729_v26  ;;  %v2737_v59 = vmul.f32 0.5, %v2729_v26 }
 0x397   : > { %3398 = vtanh.f32 %v2776_v36  ;;  %v2753_v54 = vmul.f32 %v2745_v24, %v2729_v26 }
 0x399   : > { %v2761_v19 = vmul.f32 %v2753_v54, %v2729_v26 }
 0x39b   : > { %v2769_v50 = vadd.f32 %v2761_v19, %v2729_v26 }
 0x39d   : > { %v3399_v25 = vpop.eup %3398  ;;  %v2777_v1 = vmul.f32 0.7978846, %v2769_v50 }
 0x39e   : > { %v2792_v56 = vadd.f32 1.0, %v3399_v25 }
 0x39f   : > { %3400 = vtanh.f32 %v2777_v1 }
 0x3a0   : > { %v2800_v55 = vmul.f32 %v2792_v56, %v2736_v52 }
 0x3a2   : > { %v2808_v32 = vadd.f32 %v2800_v55, %v3556_v0 }
 0x3a4   : > { %v2816_v47 = vpack.c.bf16 %v2808_v32, %v2808_v32 }
 0x3a5   : > { %v3401_v58 = vpop.eup %3400 }
 0x3a6   : > { %2824 = vst.msk [vmem:[%s4437_s29 + $0x10] sm:$0xf] %vm544_vm1, %v2816_v47  ;;  %v2793_v35 = vadd.f32 1.0, %v3401_v58 }
 0x3a8   : > { %v2801_v14 = vmul.f32 %v2793_v35, %v2737_v59 }
 0x3aa   : > { %v2809_v41 = vadd.f32 %v2801_v14, %v3564_v11 }
 0x3ac   : > { %v2817_v4 = vpack.c.bf16 %v2809_v41, %v2809_v41 }
 0x3ae   : > { %2825 = vst.msk [vmem:[%s4437_s29 + $0x14] sm:$0xf] %vm544_vm1, %v2817_v4 }
 0x3b8   : > { %v2703_v6 = vpop.f32.mrf.mxu0 }
 0x3b9   : > { %v2718_v29 = vmul.f32 %v4419_v40, %v2703_v6 }
 0x3bb   : > { %v2730_v63 = vadd.f32 %v4424_v5, %v2718_v29 }
 0x3bd   : > { %v2746_v46 = vmul.f32 0.044715, %v2730_v63  ;;  %v2738_v12 = vmul.f32 0.5, %v2730_v63 }
 0x3bf   : > { %v2754_v62 = vmul.f32 %v2746_v46, %v2730_v63 }
 0x3c0   : > { %v2705_v0 = vpop.f32.mrf.mxu0 }
 0x3c1   : > { %v2762_v27 = vmul.f32 %v2754_v62, %v2730_v63  ;;  %v2719_v10 = vmul.f32 %v4419_v40, %v2705_v0 }
 0x3c3   : > { %v2770_v15 = vadd.f32 %v2762_v27, %v2730_v63  ;;  %v2731_v18 = vadd.f32 %v4424_v5, %v2719_v10 }
 0x3c5   : > { %v2778_v33 = vmul.f32 0.7978846, %v2770_v15  ;;  %v2747_v11 = vmul.f32 0.044715, %v2731_v18  ;;  %v2739_v5 = vmul.f32 0.5, %v2731_v18 }
 0x3c7   : > { %3402 = vtanh.f32 %v2778_v33  ;;  %v2755_v48 = vmul.f32 %v2747_v11, %v2731_v18 }
 0x3c9   : > { %v2763_v51 = vmul.f32 %v2755_v48, %v2731_v18 }
 0x3cb   : > { %v2771_v42 = vadd.f32 %v2763_v51, %v2731_v18 }
 0x3cd   : > { %v3403_v7 = vpop.eup %3402  ;;  %v2779_v49 = vmul.f32 0.7978846, %v2771_v42 }
 0x3ce   : > { %v2794_v45 = vadd.f32 1.0, %v3403_v7 }
 0x3cf   : > { %3404 = vtanh.f32 %v2779_v49 }
 0x3d0   : > { %v2802_v17 = vmul.f32 %v2794_v45, %v2738_v12 }
 0x3d2   : > { %v2810_v43 = vadd.f32 %v2802_v17, %v3712_v22 }
 0x3d4   : > { %v2818_v40 = vpack.c.bf16 %v2810_v43, %v2810_v43 }
 0x3d5   : > { %v3405_v21 = vpop.eup %3404 }
 0x3d6   : > { %2826 = vst.msk [vmem:[%s4437_s29 + $0x18] sm:$0xf] %vm544_vm1, %v2818_v40  ;;  %v2795_v8 = vadd.f32 1.0, %v3405_v21 }
 0x3d8   : > { %v2803_v53 = vmul.f32 %v2795_v8, %v2739_v5 }
 0x3da   : > { %v2811_v44 = vadd.f32 %v2803_v53, %v3724_v9 }
 0x3dc   : > { %v2819_v3 = vpack.c.bf16 %v2811_v44, %v2811_v44 }
 0x3de   : > { %2827 = vst.msk [vmem:[%s4437_s29 + $0x1c] sm:$0xf] %vm544_vm1, %v2819_v3 }
 0x3df PF: > { %s20_s13 = sadd.s32 1, %s3412_s13  }
 0x3e0   : > { %p17_p4 = scmp.ge.s32.totalorder %s20_s13, 4  }
 0x3e2   :  { %19 = sbr.rel (!%p17_p4) target bundleno = 1 (0x1), region = 99 }

</bundles_post_ra>
